<compile_context>
chip_gen: v6e
topology: v6e:2x2x1
jax: 0.10.0
libtpu: 0.0.40
codegen_flags: <defaults>
</compile_context>

<pallas_src>
import math

import jax
import jax.numpy as jnp
from jax.experimental import pallas as pl
from jax.experimental.pallas import tpu as pltpu


def _round_up(x, m):
    return ((x + m - 1) // m) * m


def _pick_tile_t(T, max_tile=64):
    """Pick a time-tile length. For T <= max_tile take the whole sequence;
    otherwise pick a divisor of T that is a multiple of 8 (sublane aligned)."""
    if T <= max_tile:
        return T
    for cand in range(max_tile - max_tile % 8, 7, -8):
        if T % cand == 0:
            return cand
    return T  # fallback: whole sequence in one tile


# ----------------------------------------------------------------------------
# Fused kernel: per grid step (one time tile):
#   1) project the input tile to r/z/n gate pre-activations (big MXU matmul),
#   2) run the serial GRU recurrence for each layer (hidden carried in VMEM),
#   3) on the last grid step, compute static_fc + the final fc (split-concat).
# ----------------------------------------------------------------------------
def _make_fused_gru_kernel(num_layers, tile_t):
    L = num_layers

    def kernel(x_ref, xs_ref,
               wih0_ref, bih0_ref, wihr_ref, bihr_ref,
               whh_ref, bhh_ref,
               ws_ref, bs_ref, wfc_h_ref, wfc_s_ref, bfc_ref,
               out_ref,
               h_carry, buf, gi_r, gi_z, gi_n):
        # x_ref   : (B, TILE_T, F)   batch_first tile of the input sequence
        # xs_ref  : (B, S_in)        static features (used on last grid step)
        # wih0    : (3, F, H), bih0: (3, 1, H)          layer-0 input weights (T)
        # wihr    : (max(L-1,1), 3, H, H), bihr: (max(L-1,1), 3, 1, H)
        # whh     : (L, 3, H, H),   bhh : (L, 3, 1, H)  hidden weights (T)
        # head    : ws (S_in,S_hid), bs (1,S_hid), wfc_h (H,out), wfc_s (S_hid,out), bfc (1,out)
        # out_ref : (B, out)
        # scratch : h_carry (L,B,H), buf (TILE_T,B,H), gi_* (TILE_T,B,H)
        t_blk = pl.program_id(0)
        n_blk = pl.num_programs(0)

        B = x_ref.shape[0]
        H = whh_ref.shape[2]
        gi_refs = (gi_r, gi_z, gi_n)

        @pl.when(t_blk == 0)
        def _init():
            h_carry[...] = jnp.zeros_like(h_carry)

        # ---- layer-0 input projection, hoisted off the serial chain:
        #      one (TILE_T*B, F) @ (F, H) matmul per gate ----
        x_tm = jnp.transpose(x_ref[...], (1, 0, 2)).reshape(tile_t * B, -1)
        for g in range(3):
            gi_refs[g][...] = (
                jnp.dot(x_tm, wih0_ref[g], preferred_element_type=jnp.float32)
                + bih0_ref[g]
            ).reshape(tile_t, B, H)

        # ---- recurrences, layer by layer (activations stay in VMEM) ----
        for l in range(L):
            if l > 0:
                # input projection for layer l from layer (l-1)'s tile output
                prev = buf[...].reshape(tile_t * B, H)
                for g in range(3):
                    gi_refs[g][...] = (
                        jnp.dot(prev, wihr_ref[l - 1, g],
                                preferred_element_type=jnp.float32)
                        + bihr_ref[l - 1, g]
                    ).reshape(tile_t, B, H)

            w_hr = whh_ref[l, 0]
            w_hz = whh_ref[l, 1]
            w_hn = whh_ref[l, 2]
            # broadcast biases once per tile (not per time step)
            b_hr = jnp.broadcast_to(bhh_ref[l, 0], (B, H))
            b_hz = jnp.broadcast_to(bhh_ref[l, 1], (B, H))
            b_hn = jnp.broadcast_to(bhh_ref[l, 2], (B, H))
            write_buf = (l < L - 1)  # last layer only needs its final hidden

            def step(tt, h, _whr=w_hr, _whz=w_hz, _whn=w_hn,
                     _bhr=b_hr, _bhz=b_hz, _bhn=b_hn, _write=write_buf):
                gh_r = jnp.dot(h, _whr, preferred_element_type=jnp.float32) + _bhr
                gh_z = jnp.dot(h, _whz, preferred_element_type=jnp.float32) + _bhz
                gh_n = jnp.dot(h, _whn, preferred_element_type=jnp.float32) + _bhn
                r = jax.nn.sigmoid(gi_r[tt] + gh_r)
                z = jax.nn.sigmoid(gi_z[tt] + gh_z)
                n = jnp.tanh(gi_n[tt] + r * gh_n)
                h_new = (1.0 - z) * n + z * h
                if _write:
                    buf[tt] = h_new
                return h_new

            h_last = jax.lax.fori_loop(0, tile_t, step, h_carry[l],
                                       unroll=min(tile_t, 8))
            h_carry[l] = h_last

        # ---- head (only on the last grid step): fc(concat([h_last, static_fc(xs)]))
        #      computed as h_last @ Wfc_h + h1 @ Wfc_s + bfc (no concat) ----
        @pl.when(t_blk == n_blk - 1)
        def _head():
            h_fin = h_carry[L - 1]
            h1 = (jnp.dot(xs_ref[...], ws_ref[...],
                          preferred_element_type=jnp.float32) + bs_ref[...])
            out_ref[...] = (
                jnp.dot(h_fin, wfc_h_ref[...], preferred_element_type=jnp.float32)
                + jnp.dot(h1, wfc_s_ref[...], preferred_element_type=jnp.float32)
                + bfc_ref[...])

    return kernel


@jax.jit
def _fused_forward(x, xs, wih0, bih0, wihr, bihr, whh, bhh,
                   ws, bs, wfc_h, wfc_s, bfc):
    B, T, F = x.shape
    H = whh.shape[2]
    L = whh.shape[0]
    out_dim = wfc_h.shape[1]
    tile_t = _pick_tile_t(T)
    n_blocks = T // tile_t

    kernel = _make_fused_gru_kernel(L, tile_t)

    def full(shape):
        # full-extent block with a constant index_map -> stays VMEM resident
        return pl.BlockSpec(shape, lambda t, _n=len(shape): (0,) * _n)

    in_specs = [
        pl.BlockSpec((B, tile_t, F), lambda t: (0, t, 0)),  # x: tiled over T
        full(xs.shape),
        full(wih0.shape), full(bih0.shape),
        full(wihr.shape), full(bihr.shape),
        full(whh.shape), full(bhh.shape),
        full(ws.shape), full(bs.shape),
        full(wfc_h.shape), full(wfc_s.shape), full(bfc.shape),
    ]
    out_spec = pl.BlockSpec((B, out_dim), lambda t: (0, 0))

    return pl.pallas_call(
        kernel,
        out_shape=jax.ShapeDtypeStruct((B, out_dim), jnp.float32),
        grid=(n_blocks,),
        in_specs=in_specs,
        out_specs=out_spec,
        scratch_shapes=[
            pltpu.VMEM((L, B, H), jnp.float32),        # carried hidden per layer
            pltpu.VMEM((tile_t, B, H), jnp.float32),   # current layer tile output
            pltpu.VMEM((tile_t, B, H), jnp.float32),   # gi_r
            pltpu.VMEM((tile_t, B, H), jnp.float32),   # gi_z
            pltpu.VMEM((tile_t, B, H), jnp.float32),   # gi_n
        ],
        compiler_params=pltpu.CompilerParams(
            dimension_semantics=("arbitrary",)),       # serial recurrence over T
    )(x, xs, wih0, bih0, wihr, bihr, whh, bhh, ws, bs, wfc_h, wfc_s, bfc)


# ----------------------------------------------------------------------------
# Model wrapper: PyTorch-convention init, params pre-split per gate/pre-transposed.
# ----------------------------------------------------------------------------
class GRUModelPallas:
    def __init__(self, input_dim, static_input_dim, hidden_dim, static_hidden_dim,
                 layer_dim, output_dim, key):
        self.input_dim = input_dim
        self.static_input_dim = static_input_dim
        self.hidden_dim = hidden_dim
        self.static_hidden_dim = static_hidden_dim
        self.layer_dim = layer_dim
        self.output_dim = output_dim

        def uniform(k, shape, fan_in):
            bound = 1.0 / math.sqrt(float(fan_in))
            return jax.random.uniform(k, shape, jnp.float32, -bound, bound)

        keys = jax.random.split(key, 4 * layer_dim + 4)
        ki = iter(keys)
        H = hidden_dim

        wihr_l, bihr_l, whh_l, bhh_l = [], [], [], []
        for layer in range(layer_dim):
            f_in = input_dim if layer == 0 else hidden_dim
            w_ih = uniform(next(ki), (3 * H, f_in), H)   # PyTorch layout (3H, in)
            w_hh = uniform(next(ki), (3 * H, H), H)      # (3H, H)
            b_ih = uniform(next(ki), (3 * H,), H)
            b_hh = uniform(next(ki), (3 * H,), H)
            w_ih_g = jnp.stack([w_ih[g * H:(g + 1) * H].T for g in range(3)])
            b_ih_g = jnp.stack([b_ih[g * H:(g + 1) * H].reshape(1, H) for g in range(3)])
            w_hh_g = jnp.stack([w_hh[g * H:(g + 1) * H].T for g in range(3)])
            b_hh_g = jnp.stack([b_hh[g * H:(g + 1) * H].reshape(1, H) for g in range(3)])
            if layer == 0:
                self.wih0, self.bih0 = w_ih_g, b_ih_g          # (3,F,H), (3,1,H)
            else:
                wihr_l.append(w_ih_g)
                bihr_l.append(b_ih_g)
            whh_l.append(w_hh_g)
            bhh_l.append(b_hh_g)

        if wihr_l:
            self.wihr = jnp.stack(wihr_l)                      # (L-1,3,H,H)
            self.bihr = jnp.stack(bihr_l)                      # (L-1,3,1,H)
        else:                                                  # dummy (unused) if L==1
            self.wihr = jnp.zeros((1, 3, H, H), jnp.float32)
            self.bihr = jnp.zeros((1, 3, 1, H), jnp.float32)
        self.whh = jnp.stack(whh_l)                            # (L,3,H,H)
        self.bhh = jnp.stack(bhh_l)                            # (L,3,1,H)

        # static_fc: Linear(static_input_dim -> static_hidden_dim)
        self.ws = uniform(next(ki), (static_hidden_dim, static_input_dim),
                          static_input_dim).T                  # (S_in, S_hid)
        self.bs = uniform(next(ki), (1, static_hidden_dim), static_input_dim)

        # fc: Linear(hidden_dim + static_hidden_dim -> output_dim), split columns
        fc_in = hidden_dim + static_hidden_dim
        w_fc = uniform(next(ki), (output_dim, fc_in), fc_in)
        self.wfc_h = w_fc[:, :hidden_dim].T                    # (H, out)
        self.wfc_s = w_fc[:, hidden_dim:].T                    # (S_hid, out)
        self.bfc = uniform(next(ki), (1, output_dim), fc_in)

    def __call__(self, x, x_static):
        # x: (B, T, F) batch_first, h0 = zeros (in-kernel).
        # TODO(synk): the x_static is None branch of the reference has an
        # fc input-dim mismatch (hidden_dim vs hidden_dim+static_hidden_dim);
        # only the x_static path is implemented here.
        B, T, F = x.shape
        B_pad = _round_up(B, 8)                                # f32 sublane alignment
        x_p = jnp.zeros((B_pad, T, F), jnp.float32).at[:B].set(x.astype(jnp.float32))
        xs_p = jnp.zeros((B_pad, self.static_input_dim), jnp.float32).at[:B].set(
            x_static.astype(jnp.float32))
        out = _fused_forward(x_p, xs_p, self.wih0, self.bih0, self.wihr, self.bihr,
                             self.whh, self.bhh, self.ws, self.bs,
                             self.wfc_h, self.wfc_s, self.bfc)
        return out[:B]


# ----------------------------------------------------------------------------
# Pure-JAX reference (same math, used as a correctness check in __main__).
# ----------------------------------------------------------------------------
def _reference_forward(model, x, x_static):
    H = model.hidden_dim
    h_seq = x.astype(jnp.float32)
    for l in range(model.layer_dim):
        if l == 0:
            w_ih_g, b_ih_g = model.wih0, model.bih0
        else:
            w_ih_g, b_ih_g = model.wihr[l - 1], model.bihr[l - 1]
        w_hh_g, b_hh_g = model.whh[l], model.bhh[l]
        B = h_seq.shape[0]
        h = jnp.zeros((B, H), jnp.float32)
        outs = []
        for t in range(h_seq.shape[1]):
            xt = h_seq[:, t, :]
            r = jax.nn.sigmoid(xt @ w_ih_g[0] + b_ih_g[0] + h @ w_hh_g[0] + b_hh_g[0])
            z = jax.nn.sigmoid(xt @ w_ih_g[1] + b_ih_g[1] + h @ w_hh_g[1] + b_hh_g[1])
            n = jnp.tanh(xt @ w_ih_g[2] + b_ih_g[2] + r * (h @ w_hh_g[2] + b_hh_g[2]))
            h = (1.0 - z) * n + z * h
            outs.append(h)
        h_seq = jnp.stack(outs, axis=1)
    h_last = h_seq[:, -1, :]
    h1 = x_static.astype(jnp.float32) @ model.ws + model.bs
    return h_last @ model.wfc_h + h1 @ model.wfc_s + model.bfc


if __name__ == "__main__":
    batch, seq = 2, 8
    input_dim, hidden_dim = 16, 32
    static_input_dim, static_hidden_dim = 8, 16
    layer_dim, output_dim = 2, 4

    key = jax.random.PRNGKey(0)
    k_model, k_x, k_s = jax.random.split(key, 3)

    model = GRUModelPallas(input_dim, static_input_dim, hidden_dim,
                           static_hidden_dim, layer_dim, output_dim, k_model)

    x = jax.random.normal(k_x, (batch, seq, input_dim), jnp.float32)
    x_static = jax.random.normal(k_s, (batch, static_input_dim), jnp.float32)

    out = model(x, x_static)
    out = jax.block_until_ready(out)
    assert out.shape == (batch, output_dim)

    ref = _reference_forward(model, x, x_static)
    assert bool(jnp.allclose(out, ref, atol=1e-4, rtol=1e-4)), (out, ref)

    print("KERNEL_OK")
</pallas_src>

<mosaic_0001>
module attributes {stable_mosaic.version = 11 : i64} {
  func.func @kernel(%arg0: i32, %arg1: memref<8x8x16xf32, #tpu.memory_space<vmem>>, %arg2: memref<8x8xf32, #tpu.memory_space<vmem>>, %arg3: memref<3x16x32xf32, #tpu.memory_space<vmem>>, %arg4: memref<3x1x32xf32, #tpu.memory_space<vmem>>, %arg5: memref<1x3x32x32xf32, #tpu.memory_space<vmem>>, %arg6: memref<1x3x1x32xf32, #tpu.memory_space<vmem>>, %arg7: memref<2x3x32x32xf32, #tpu.memory_space<vmem>>, %arg8: memref<2x3x1x32xf32, #tpu.memory_space<vmem>>, %arg9: memref<8x16xf32, #tpu.memory_space<vmem>>, %arg10: memref<1x16xf32, #tpu.memory_space<vmem>>, %arg11: memref<32x4xf32, #tpu.memory_space<vmem>>, %arg12: memref<16x4xf32, #tpu.memory_space<vmem>>, %arg13: memref<1x4xf32, #tpu.memory_space<vmem>>, %arg14: memref<8x4xf32, #tpu.memory_space<vmem>>, %arg15: memref<2x8x32xf32, #tpu.memory_space<vmem>>, %arg16: memref<8x8x32xf32, #tpu.memory_space<vmem>>, %arg17: memref<8x8x32xf32, #tpu.memory_space<vmem>>, %arg18: memref<8x8x32xf32, #tpu.memory_space<vmem>>, %arg19: memref<8x8x32xf32, #tpu.memory_space<vmem>>) attributes {dimension_semantics = [#tpu.dimension_semantics<arbitrary>], iteration_bounds = array<i64: 1>, scalar_prefetch = 0 : i64, scratch_operands = 5 : i64, tpu.core_type = #tpu.core_type<tc>, window_params = [{transform_indices = @transform_0, window_bounds = array<i64: 8, 8, 16>}, {pipeline_mode = #tpu.pipeline_mode<synchronous>, transform_indices = @transform_1, window_bounds = array<i64: 8, 8>}, {pipeline_mode = #tpu.pipeline_mode<synchronous>, transform_indices = @transform_2, window_bounds = array<i64: 3, 16, 32>}, {pipeline_mode = #tpu.pipeline_mode<synchronous>, transform_indices = @transform_3, window_bounds = array<i64: 3, 1, 32>}, {pipeline_mode = #tpu.pipeline_mode<synchronous>, transform_indices = @transform_4, window_bounds = array<i64: 1, 3, 32, 32>}, {pipeline_mode = #tpu.pipeline_mode<synchronous>, transform_indices = @transform_5, window_bounds = array<i64: 1, 3, 1, 32>}, {pipeline_mode = #tpu.pipeline_mode<synchronous>, transform_indices = @transform_6, window_bounds = array<i64: 2, 3, 32, 32>}, {pipeline_mode = #tpu.pipeline_mode<synchronous>, transform_indices = @transform_7, window_bounds = array<i64: 2, 3, 1, 32>}, {pipeline_mode = #tpu.pipeline_mode<synchronous>, transform_indices = @transform_8, window_bounds = array<i64: 8, 16>}, {pipeline_mode = #tpu.pipeline_mode<synchronous>, transform_indices = @transform_9, window_bounds = array<i64: 1, 16>}, {pipeline_mode = #tpu.pipeline_mode<synchronous>, transform_indices = @transform_10, window_bounds = array<i64: 32, 4>}, {pipeline_mode = #tpu.pipeline_mode<synchronous>, transform_indices = @transform_11, window_bounds = array<i64: 16, 4>}, {pipeline_mode = #tpu.pipeline_mode<synchronous>, transform_indices = @transform_12, window_bounds = array<i64: 1, 4>}, {pipeline_mode = #tpu.pipeline_mode<synchronous>, transform_indices = @transform_13, window_bounds = array<i64: 8, 4>}]} {
    %c0_i32 = arith.constant 0 : i32
    %0 = arith.cmpi eq, %arg0, %c0_i32 : i32
    %1 = arith.extui %0 : i1 to i32
    %c0_i32_0 = arith.constant 0 : i32
    %2 = arith.cmpi ne, %1, %c0_i32_0 : i32
    scf.if %2 {
      %cst_349 = arith.constant 0.000000e+00 : f32
      %703 = vector.broadcast %cst_349 : f32 to vector<2x8x32xf32>
      %c0_350 = arith.constant 0 : index
      %c0_351 = arith.constant 0 : index
      %c0_352 = arith.constant 0 : index
      %704 = vector.load %arg15[%c0_350, %c0_351, %c0_352] : memref<2x8x32xf32, #tpu.memory_space<vmem>>, vector<2x8x32xf32>
      tpu.vector_store %arg15[%c0_350, %c0_351, %c0_352], %703 {strides = array<i32>} : memref<2x8x32xf32, #tpu.memory_space<vmem>>, vector<2x8x32xf32>,
    } else {
    }
    %c0 = arith.constant 0 : index
    %c0_1 = arith.constant 0 : index
    %c0_2 = arith.constant 0 : index
    %3 = vector.load %arg1[%c0, %c0_1, %c0_2] : memref<8x8x16xf32, #tpu.memory_space<vmem>>, vector<8x8x16xf32>
    %4 = tpu.transpose %3, [1, 0, 2] : vector<8x8x16xf32> -> vector<8x8x16xf32>
    %5 = vector.shape_cast %4 : vector<8x8x16xf32> to vector<64x16xf32>
    %c0_3 = arith.constant 0 : index
    %c0_4 = arith.constant 0 : index
    %c0_5 = arith.constant 0 : index
    %6 = vector.load %arg3[%c0_3, %c0_4, %c0_5] : memref<3x16x32xf32, #tpu.memory_space<vmem>>, vector<1x16x32xf32>
    %7 = vector.shape_cast %6 : vector<1x16x32xf32> to vector<16x32xf32>
    %cst = arith.constant dense<0.000000e+00> : vector<64x32xf32>
    %8 = tpu.matmul %5, %7, %cst {dimension_numbers = #tpu.dot_dimension_numbers<[1], [0], [0], [1], [0, 0, 1, 1], [], []>} : vector<64x16xf32>, vector<16x32xf32>, vector<64x32xf32> -> vector<64x32xf32>
    %c0_6 = arith.constant 0 : index
    %c0_7 = arith.constant 0 : index
    %c0_8 = arith.constant 0 : index
    %9 = vector.load %arg4[%c0_6, %c0_7, %c0_8] : memref<3x1x32xf32, #tpu.memory_space<vmem>>, vector<1x1x32xf32>
    %10 = vector.shape_cast %9 : vector<1x1x32xf32> to vector<1x32xf32>
    %11 = vector.broadcast %10 : vector<1x32xf32> to vector<64x32xf32>
    %12 = arith.addf %8, %11 : vector<64x32xf32>
    %13 = vector.shape_cast %12 : vector<64x32xf32> to vector<8x8x32xf32>
    %c0_9 = arith.constant 0 : index
    %c0_10 = arith.constant 0 : index
    %c0_11 = arith.constant 0 : index
    %14 = vector.load %arg17[%c0_9, %c0_10, %c0_11] : memref<8x8x32xf32, #tpu.memory_space<vmem>>, vector<8x8x32xf32>
    tpu.vector_store %arg17[%c0_9, %c0_10, %c0_11], %13 {strides = array<i32>} : memref<8x8x32xf32, #tpu.memory_space<vmem>>, vector<8x8x32xf32>,
    %c1 = arith.constant 1 : index
    %c0_12 = arith.constant 0 : index
    %c0_13 = arith.constant 0 : index
    %15 = vector.load %arg3[%c1, %c0_12, %c0_13] : memref<3x16x32xf32, #tpu.memory_space<vmem>>, vector<1x16x32xf32>
    %16 = vector.shape_cast %15 : vector<1x16x32xf32> to vector<16x32xf32>
    %cst_14 = arith.constant dense<0.000000e+00> : vector<64x32xf32>
    %17 = tpu.matmul %5, %16, %cst_14 {dimension_numbers = #tpu.dot_dimension_numbers<[1], [0], [0], [1], [0, 0, 1, 1], [], []>} : vector<64x16xf32>, vector<16x32xf32>, vector<64x32xf32> -> vector<64x32xf32>
    %c1_15 = arith.constant 1 : index
    %c0_16 = arith.constant 0 : index
    %c0_17 = arith.constant 0 : index
    %18 = vector.load %arg4[%c1_15, %c0_16, %c0_17] : memref<3x1x32xf32, #tpu.memory_space<vmem>>, vector<1x1x32xf32>
    %19 = vector.shape_cast %18 : vector<1x1x32xf32> to vector<1x32xf32>
    %20 = vector.broadcast %19 : vector<1x32xf32> to vector<64x32xf32>
    %21 = arith.addf %17, %20 : vector<64x32xf32>
    %22 = vector.shape_cast %21 : vector<64x32xf32> to vector<8x8x32xf32>
    %c0_18 = arith.constant 0 : index
    %c0_19 = arith.constant 0 : index
    %c0_20 = arith.constant 0 : index
    %23 = vector.load %arg18[%c0_18, %c0_19, %c0_20] : memref<8x8x32xf32, #tpu.memory_space<vmem>>, vector<8x8x32xf32>
    tpu.vector_store %arg18[%c0_18, %c0_19, %c0_20], %22 {strides = array<i32>} : memref<8x8x32xf32, #tpu.memory_space<vmem>>, vector<8x8x32xf32>,
    %c2 = arith.constant 2 : index
    %c0_21 = arith.constant 0 : index
    %c0_22 = arith.constant 0 : index
    %24 = vector.load %arg3[%c2, %c0_21, %c0_22] : memref<3x16x32xf32, #tpu.memory_space<vmem>>, vector<1x16x32xf32>
    %25 = vector.shape_cast %24 : vector<1x16x32xf32> to vector<16x32xf32>
    %cst_23 = arith.constant dense<0.000000e+00> : vector<64x32xf32>
    %26 = tpu.matmul %5, %25, %cst_23 {dimension_numbers = #tpu.dot_dimension_numbers<[1], [0], [0], [1], [0, 0, 1, 1], [], []>} : vector<64x16xf32>, vector<16x32xf32>, vector<64x32xf32> -> vector<64x32xf32>
    %c2_24 = arith.constant 2 : index
    %c0_25 = arith.constant 0 : index
    %c0_26 = arith.constant 0 : index
    %27 = vector.load %arg4[%c2_24, %c0_25, %c0_26] : memref<3x1x32xf32, #tpu.memory_space<vmem>>, vector<1x1x32xf32>
    %28 = vector.shape_cast %27 : vector<1x1x32xf32> to vector<1x32xf32>
    %29 = vector.broadcast %28 : vector<1x32xf32> to vector<64x32xf32>
    %30 = arith.addf %26, %29 : vector<64x32xf32>
    %31 = vector.shape_cast %30 : vector<64x32xf32> to vector<8x8x32xf32>
    %c0_27 = arith.constant 0 : index
    %c0_28 = arith.constant 0 : index
    %c0_29 = arith.constant 0 : index
    %32 = vector.load %arg19[%c0_27, %c0_28, %c0_29] : memref<8x8x32xf32, #tpu.memory_space<vmem>>, vector<8x8x32xf32>
    tpu.vector_store %arg19[%c0_27, %c0_28, %c0_29], %31 {strides = array<i32>} : memref<8x8x32xf32, #tpu.memory_space<vmem>>, vector<8x8x32xf32>,
    %c0_30 = arith.constant 0 : index
    %c0_31 = arith.constant 0 : index
    %c0_32 = arith.constant 0 : index
    %c0_33 = arith.constant 0 : index
    %33 = vector.load %arg7[%c0_30, %c0_31, %c0_32, %c0_33] : memref<2x3x32x32xf32, #tpu.memory_space<vmem>>, vector<1x1x32x32xf32>
    %34 = vector.shape_cast %33 : vector<1x1x32x32xf32> to vector<32x32xf32>
    %c0_34 = arith.constant 0 : index
    %c1_35 = arith.constant 1 : index
    %c0_36 = arith.constant 0 : index
    %c0_37 = arith.constant 0 : index
    %35 = vector.load %arg7[%c0_34, %c1_35, %c0_36, %c0_37] : memref<2x3x32x32xf32, #tpu.memory_space<vmem>>, vector<1x1x32x32xf32>
    %36 = vector.shape_cast %35 : vector<1x1x32x32xf32> to vector<32x32xf32>
    %c0_38 = arith.constant 0 : index
    %c2_39 = arith.constant 2 : index
    %c0_40 = arith.constant 0 : index
    %c0_41 = arith.constant 0 : index
    %37 = vector.load %arg7[%c0_38, %c2_39, %c0_40, %c0_41] : memref<2x3x32x32xf32, #tpu.memory_space<vmem>>, vector<1x1x32x32xf32>
    %38 = vector.shape_cast %37 : vector<1x1x32x32xf32> to vector<32x32xf32>
    %c0_42 = arith.constant 0 : index
    %c0_43 = arith.constant 0 : index
    %c0_44 = arith.constant 0 : index
    %c0_45 = arith.constant 0 : index
    %39 = vector.load %arg8[%c0_42, %c0_43, %c0_44, %c0_45] : memref<2x3x1x32xf32, #tpu.memory_space<vmem>>, vector<1x1x1x32xf32>
    %40 = vector.shape_cast %39 : vector<1x1x1x32xf32> to vector<1x32xf32>
    %41 = vector.shape_cast %40 : vector<1x32xf32> to vector<1x32xf32>
    %42 = vector.broadcast %41 : vector<1x32xf32> to vector<8x32xf32>
    %c0_46 = arith.constant 0 : index
    %c1_47 = arith.constant 1 : index
    %c0_48 = arith.constant 0 : index
    %c0_49 = arith.constant 0 : index
    %43 = vector.load %arg8[%c0_46, %c1_47, %c0_48, %c0_49] : memref<2x3x1x32xf32, #tpu.memory_space<vmem>>, vector<1x1x1x32xf32>
    %44 = vector.shape_cast %43 : vector<1x1x1x32xf32> to vector<1x32xf32>
    %45 = vector.shape_cast %44 : vector<1x32xf32> to vector<1x32xf32>
    %46 = vector.broadcast %45 : vector<1x32xf32> to vector<8x32xf32>
    %c0_50 = arith.constant 0 : index
    %c2_51 = arith.constant 2 : index
    %c0_52 = arith.constant 0 : index
    %c0_53 = arith.constant 0 : index
    %47 = vector.load %arg8[%c0_50, %c2_51, %c0_52, %c0_53] : memref<2x3x1x32xf32, #tpu.memory_space<vmem>>, vector<1x1x1x32xf32>
    %48 = vector.shape_cast %47 : vector<1x1x1x32xf32> to vector<1x32xf32>
    %49 = vector.shape_cast %48 : vector<1x32xf32> to vector<1x32xf32>
    %50 = vector.broadcast %49 : vector<1x32xf32> to vector<8x32xf32>
    %c0_54 = arith.constant 0 : index
    %c0_55 = arith.constant 0 : index
    %c0_56 = arith.constant 0 : index
    %51 = vector.load %arg15[%c0_54, %c0_55, %c0_56] : memref<2x8x32xf32, #tpu.memory_space<vmem>>, vector<1x8x32xf32>
    %52 = vector.shape_cast %51 : vector<1x8x32xf32> to vector<8x32xf32>
    %c0_i32_57 = arith.constant 0 : i32
    %cst_58 = arith.constant dense<0.000000e+00> : vector<8x32xf32>
    %53 = tpu.matmul %52, %34, %cst_58 {dimension_numbers = #tpu.dot_dimension_numbers<[1], [0], [0], [1], [0, 0, 1, 1], [], []>} : vector<8x32xf32>, vector<32x32xf32>, vector<8x32xf32> -> vector<8x32xf32>
    %54 = arith.addf %53, %42 : vector<8x32xf32>
    %cst_59 = arith.constant dense<0.000000e+00> : vector<8x32xf32>
    %55 = tpu.matmul %52, %36, %cst_59 {dimension_numbers = #tpu.dot_dimension_numbers<[1], [0], [0], [1], [0, 0, 1, 1], [], []>} : vector<8x32xf32>, vector<32x32xf32>, vector<8x32xf32> -> vector<8x32xf32>
    %56 = arith.addf %55, %46 : vector<8x32xf32>
    %cst_60 = arith.constant dense<0.000000e+00> : vector<8x32xf32>
    %57 = tpu.matmul %52, %38, %cst_60 {dimension_numbers = #tpu.dot_dimension_numbers<[1], [0], [0], [1], [0, 0, 1, 1], [], []>} : vector<8x32xf32>, vector<32x32xf32>, vector<8x32xf32> -> vector<8x32xf32>
    %58 = arith.addf %57, %50 : vector<8x32xf32>
    %59 = arith.index_cast %c0_i32_57 : i32 to index
    %c0_61 = arith.constant 0 : index
    %c0_62 = arith.constant 0 : index
    %60 = vector.load %arg17[%59, %c0_61, %c0_62] : memref<8x8x32xf32, #tpu.memory_space<vmem>>, vector<1x8x32xf32>
    %61 = vector.shape_cast %60 : vector<1x8x32xf32> to vector<8x32xf32>
    %62 = arith.addf %61, %54 : vector<8x32xf32>
    %63 = arith.negf %62 : vector<8x32xf32>
    %64 = math.exp %63 : vector<8x32xf32>
    %cst_63 = arith.constant 1.000000e+00 : f32
    %65 = vector.broadcast %cst_63 : f32 to vector<8x32xf32>
    %66 = arith.addf %65, %64 : vector<8x32xf32>
    %67 = arith.divf %65, %66 : vector<8x32xf32>
    %68 = arith.index_cast %c0_i32_57 : i32 to index
    %c0_64 = arith.constant 0 : index
    %c0_65 = arith.constant 0 : index
    %69 = vector.load %arg18[%68, %c0_64, %c0_65] : memref<8x8x32xf32, #tpu.memory_space<vmem>>, vector<1x8x32xf32>
    %70 = vector.shape_cast %69 : vector<1x8x32xf32> to vector<8x32xf32>
    %71 = arith.addf %70, %56 : vector<8x32xf32>
    %72 = arith.negf %71 : vector<8x32xf32>
    %73 = math.exp %72 : vector<8x32xf32>
    %cst_66 = arith.constant 1.000000e+00 : f32
    %74 = vector.broadcast %cst_66 : f32 to vector<8x32xf32>
    %75 = arith.addf %74, %73 : vector<8x32xf32>
    %76 = arith.divf %74, %75 : vector<8x32xf32>
    %77 = arith.index_cast %c0_i32_57 : i32 to index
    %c0_67 = arith.constant 0 : index
    %c0_68 = arith.constant 0 : index
    %78 = vector.load %arg19[%77, %c0_67, %c0_68] : memref<8x8x32xf32, #tpu.memory_space<vmem>>, vector<1x8x32xf32>
    %79 = vector.shape_cast %78 : vector<1x8x32xf32> to vector<8x32xf32>
    %80 = arith.mulf %67, %58 : vector<8x32xf32>
    %81 = arith.addf %79, %80 : vector<8x32xf32>
    %82 = math.tanh %81 : vector<8x32xf32>
    %cst_69 = arith.constant 1.000000e+00 : f32
    %83 = vector.broadcast %cst_69 : f32 to vector<8x32xf32>
    %84 = arith.subf %83, %76 : vector<8x32xf32>
    %85 = arith.mulf %84, %82 : vector<8x32xf32>
    %86 = arith.mulf %76, %52 : vector<8x32xf32>
    %87 = arith.addf %85, %86 : vector<8x32xf32>
    %88 = arith.index_cast %c0_i32_57 : i32 to index
    %c0_70 = arith.constant 0 : index
    %c0_71 = arith.constant 0 : index
    %89 = vector.load %arg16[%88, %c0_70, %c0_71] : memref<8x8x32xf32, #tpu.memory_space<vmem>>, vector<1x8x32xf32>
    %90 = vector.shape_cast %89 : vector<1x8x32xf32> to vector<8x32xf32>
    %91 = vector.shape_cast %87 : vector<8x32xf32> to vector<1x8x32xf32>
    tpu.vector_store %arg16[%88, %c0_70, %c0_71], %91 {strides = array<i32>} : memref<8x8x32xf32, #tpu.memory_space<vmem>>, vector<1x8x32xf32>,
    %c1_i32 = arith.constant 1 : i32
    %cst_72 = arith.constant dense<0.000000e+00> : vector<8x32xf32>
    %92 = tpu.matmul %87, %34, %cst_72 {dimension_numbers = #tpu.dot_dimension_numbers<[1], [0], [0], [1], [0, 0, 1, 1], [], []>} : vector<8x32xf32>, vector<32x32xf32>, vector<8x32xf32> -> vector<8x32xf32>
    %93 = arith.addf %92, %42 : vector<8x32xf32>
    %cst_73 = arith.constant dense<0.000000e+00> : vector<8x32xf32>
    %94 = tpu.matmul %87, %36, %cst_73 {dimension_numbers = #tpu.dot_dimension_numbers<[1], [0], [0], [1], [0, 0, 1, 1], [], []>} : vector<8x32xf32>, vector<32x32xf32>, vector<8x32xf32> -> vector<8x32xf32>
    %95 = arith.addf %94, %46 : vector<8x32xf32>
    %cst_74 = arith.constant dense<0.000000e+00> : vector<8x32xf32>
    %96 = tpu.matmul %87, %38, %cst_74 {dimension_numbers = #tpu.dot_dimension_numbers<[1], [0], [0], [1], [0, 0, 1, 1], [], []>} : vector<8x32xf32>, vector<32x32xf32>, vector<8x32xf32> -> vector<8x32xf32>
    %97 = arith.addf %96, %50 : vector<8x32xf32>
    %98 = arith.index_cast %c1_i32 : i32 to index
    %c0_75 = arith.constant 0 : index
    %c0_76 = arith.constant 0 : index
    %99 = vector.load %arg17[%98, %c0_75, %c0_76] : memref<8x8x32xf32, #tpu.memory_space<vmem>>, vector<1x8x32xf32>
    %100 = vector.shape_cast %99 : vector<1x8x32xf32> to vector<8x32xf32>
    %101 = arith.addf %100, %93 : vector<8x32xf32>
    %102 = arith.negf %101 : vector<8x32xf32>
    %103 = math.exp %102 : vector<8x32xf32>
    %cst_77 = arith.constant 1.000000e+00 : f32
    %104 = vector.broadcast %cst_77 : f32 to vector<8x32xf32>
    %105 = arith.addf %104, %103 : vector<8x32xf32>
    %106 = arith.divf %104, %105 : vector<8x32xf32>
    %107 = arith.index_cast %c1_i32 : i32 to index
    %c0_78 = arith.constant 0 : index
    %c0_79 = arith.constant 0 : index
    %108 = vector.load %arg18[%107, %c0_78, %c0_79] : memref<8x8x32xf32, #tpu.memory_space<vmem>>, vector<1x8x32xf32>
    %109 = vector.shape_cast %108 : vector<1x8x32xf32> to vector<8x32xf32>
    %110 = arith.addf %109, %95 : vector<8x32xf32>
    %111 = arith.negf %110 : vector<8x32xf32>
    %112 = math.exp %111 : vector<8x32xf32>
    %cst_80 = arith.constant 1.000000e+00 : f32
    %113 = vector.broadcast %cst_80 : f32 to vector<8x32xf32>
    %114 = arith.addf %113, %112 : vector<8x32xf32>
    %115 = arith.divf %113, %114 : vector<8x32xf32>
    %116 = arith.index_cast %c1_i32 : i32 to index
    %c0_81 = arith.constant 0 : index
    %c0_82 = arith.constant 0 : index
    %117 = vector.load %arg19[%116, %c0_81, %c0_82] : memref<8x8x32xf32, #tpu.memory_space<vmem>>, vector<1x8x32xf32>
    %118 = vector.shape_cast %117 : vector<1x8x32xf32> to vector<8x32xf32>
    %119 = arith.mulf %106, %97 : vector<8x32xf32>
    %120 = arith.addf %118, %119 : vector<8x32xf32>
    %121 = math.tanh %120 : vector<8x32xf32>
    %cst_83 = arith.constant 1.000000e+00 : f32
    %122 = vector.broadcast %cst_83 : f32 to vector<8x32xf32>
    %123 = arith.subf %122, %115 : vector<8x32xf32>
    %124 = arith.mulf %123, %121 : vector<8x32xf32>
    %125 = arith.mulf %115, %87 : vector<8x32xf32>
    %126 = arith.addf %124, %125 : vector<8x32xf32>
    %127 = arith.index_cast %c1_i32 : i32 to index
    %c0_84 = arith.constant 0 : index
    %c0_85 = arith.constant 0 : index
    %128 = vector.load %arg16[%127, %c0_84, %c0_85] : memref<8x8x32xf32, #tpu.memory_space<vmem>>, vector<1x8x32xf32>
    %129 = vector.shape_cast %128 : vector<1x8x32xf32> to vector<8x32xf32>
    %130 = vector.shape_cast %126 : vector<8x32xf32> to vector<1x8x32xf32>
    tpu.vector_store %arg16[%127, %c0_84, %c0_85], %130 {strides = array<i32>} : memref<8x8x32xf32, #tpu.memory_space<vmem>>, vector<1x8x32xf32>,
    %c2_i32 = arith.constant 2 : i32
    %cst_86 = arith.constant dense<0.000000e+00> : vector<8x32xf32>
    %131 = tpu.matmul %126, %34, %cst_86 {dimension_numbers = #tpu.dot_dimension_numbers<[1], [0], [0], [1], [0, 0, 1, 1], [], []>} : vector<8x32xf32>, vector<32x32xf32>, vector<8x32xf32> -> vector<8x32xf32>
    %132 = arith.addf %131, %42 : vector<8x32xf32>
    %cst_87 = arith.constant dense<0.000000e+00> : vector<8x32xf32>
    %133 = tpu.matmul %126, %36, %cst_87 {dimension_numbers = #tpu.dot_dimension_numbers<[1], [0], [0], [1], [0, 0, 1, 1], [], []>} : vector<8x32xf32>, vector<32x32xf32>, vector<8x32xf32> -> vector<8x32xf32>
    %134 = arith.addf %133, %46 : vector<8x32xf32>
    %cst_88 = arith.constant dense<0.000000e+00> : vector<8x32xf32>
    %135 = tpu.matmul %126, %38, %cst_88 {dimension_numbers = #tpu.dot_dimension_numbers<[1], [0], [0], [1], [0, 0, 1, 1], [], []>} : vector<8x32xf32>, vector<32x32xf32>, vector<8x32xf32> -> vector<8x32xf32>
    %136 = arith.addf %135, %50 : vector<8x32xf32>
    %137 = arith.index_cast %c2_i32 : i32 to index
    %c0_89 = arith.constant 0 : index
    %c0_90 = arith.constant 0 : index
    %138 = vector.load %arg17[%137, %c0_89, %c0_90] : memref<8x8x32xf32, #tpu.memory_space<vmem>>, vector<1x8x32xf32>
    %139 = vector.shape_cast %138 : vector<1x8x32xf32> to vector<8x32xf32>
    %140 = arith.addf %139, %132 : vector<8x32xf32>
    %141 = arith.negf %140 : vector<8x32xf32>
    %142 = math.exp %141 : vector<8x32xf32>
    %cst_91 = arith.constant 1.000000e+00 : f32
    %143 = vector.broadcast %cst_91 : f32 to vector<8x32xf32>
    %144 = arith.addf %143, %142 : vector<8x32xf32>
    %145 = arith.divf %143, %144 : vector<8x32xf32>
    %146 = arith.index_cast %c2_i32 : i32 to index
    %c0_92 = arith.constant 0 : index
    %c0_93 = arith.constant 0 : index
    %147 = vector.load %arg18[%146, %c0_92, %c0_93] : memref<8x8x32xf32, #tpu.memory_space<vmem>>, vector<1x8x32xf32>
    %148 = vector.shape_cast %147 : vector<1x8x32xf32> to vector<8x32xf32>
    %149 = arith.addf %148, %134 : vector<8x32xf32>
    %150 = arith.negf %149 : vector<8x32xf32>
    %151 = math.exp %150 : vector<8x32xf32>
    %cst_94 = arith.constant 1.000000e+00 : f32
    %152 = vector.broadcast %cst_94 : f32 to vector<8x32xf32>
    %153 = arith.addf %152, %151 : vector<8x32xf32>
    %154 = arith.divf %152, %153 : vector<8x32xf32>
    %155 = arith.index_cast %c2_i32 : i32 to index
    %c0_95 = arith.constant 0 : index
    %c0_96 = arith.constant 0 : index
    %156 = vector.load %arg19[%155, %c0_95, %c0_96] : memref<8x8x32xf32, #tpu.memory_space<vmem>>, vector<1x8x32xf32>
    %157 = vector.shape_cast %156 : vector<1x8x32xf32> to vector<8x32xf32>
    %158 = arith.mulf %145, %136 : vector<8x32xf32>
    %159 = arith.addf %157, %158 : vector<8x32xf32>
    %160 = math.tanh %159 : vector<8x32xf32>
    %cst_97 = arith.constant 1.000000e+00 : f32
    %161 = vector.broadcast %cst_97 : f32 to vector<8x32xf32>
    %162 = arith.subf %161, %154 : vector<8x32xf32>
    %163 = arith.mulf %162, %160 : vector<8x32xf32>
    %164 = arith.mulf %154, %126 : vector<8x32xf32>
    %165 = arith.addf %163, %164 : vector<8x32xf32>
    %166 = arith.index_cast %c2_i32 : i32 to index
    %c0_98 = arith.constant 0 : index
    %c0_99 = arith.constant 0 : index
    %167 = vector.load %arg16[%166, %c0_98, %c0_99] : memref<8x8x32xf32, #tpu.memory_space<vmem>>, vector<1x8x32xf32>
    %168 = vector.shape_cast %167 : vector<1x8x32xf32> to vector<8x32xf32>
    %169 = vector.shape_cast %165 : vector<8x32xf32> to vector<1x8x32xf32>
    tpu.vector_store %arg16[%166, %c0_98, %c0_99], %169 {strides = array<i32>} : memref<8x8x32xf32, #tpu.memory_space<vmem>>, vector<1x8x32xf32>,
    %c3_i32 = arith.constant 3 : i32
    %cst_100 = arith.constant dense<0.000000e+00> : vector<8x32xf32>
    %170 = tpu.matmul %165, %34, %cst_100 {dimension_numbers = #tpu.dot_dimension_numbers<[1], [0], [0], [1], [0, 0, 1, 1], [], []>} : vector<8x32xf32>, vector<32x32xf32>, vector<8x32xf32> -> vector<8x32xf32>
    %171 = arith.addf %170, %42 : vector<8x32xf32>
    %cst_101 = arith.constant dense<0.000000e+00> : vector<8x32xf32>
    %172 = tpu.matmul %165, %36, %cst_101 {dimension_numbers = #tpu.dot_dimension_numbers<[1], [0], [0], [1], [0, 0, 1, 1], [], []>} : vector<8x32xf32>, vector<32x32xf32>, vector<8x32xf32> -> vector<8x32xf32>
    %173 = arith.addf %172, %46 : vector<8x32xf32>
    %cst_102 = arith.constant dense<0.000000e+00> : vector<8x32xf32>
    %174 = tpu.matmul %165, %38, %cst_102 {dimension_numbers = #tpu.dot_dimension_numbers<[1], [0], [0], [1], [0, 0, 1, 1], [], []>} : vector<8x32xf32>, vector<32x32xf32>, vector<8x32xf32> -> vector<8x32xf32>
    %175 = arith.addf %174, %50 : vector<8x32xf32>
    %176 = arith.index_cast %c3_i32 : i32 to index
    %c0_103 = arith.constant 0 : index
    %c0_104 = arith.constant 0 : index
    %177 = vector.load %arg17[%176, %c0_103, %c0_104] : memref<8x8x32xf32, #tpu.memory_space<vmem>>, vector<1x8x32xf32>
    %178 = vector.shape_cast %177 : vector<1x8x32xf32> to vector<8x32xf32>
    %179 = arith.addf %178, %171 : vector<8x32xf32>
    %180 = arith.negf %179 : vector<8x32xf32>
    %181 = math.exp %180 : vector<8x32xf32>
    %cst_105 = arith.constant 1.000000e+00 : f32
    %182 = vector.broadcast %cst_105 : f32 to vector<8x32xf32>
    %183 = arith.addf %182, %181 : vector<8x32xf32>
    %184 = arith.divf %182, %183 : vector<8x32xf32>
    %185 = arith.index_cast %c3_i32 : i32 to index
    %c0_106 = arith.constant 0 : index
    %c0_107 = arith.constant 0 : index
    %186 = vector.load %arg18[%185, %c0_106, %c0_107] : memref<8x8x32xf32, #tpu.memory_space<vmem>>, vector<1x8x32xf32>
    %187 = vector.shape_cast %186 : vector<1x8x32xf32> to vector<8x32xf32>
    %188 = arith.addf %187, %173 : vector<8x32xf32>
    %189 = arith.negf %188 : vector<8x32xf32>
    %190 = math.exp %189 : vector<8x32xf32>
    %cst_108 = arith.constant 1.000000e+00 : f32
    %191 = vector.broadcast %cst_108 : f32 to vector<8x32xf32>
    %192 = arith.addf %191, %190 : vector<8x32xf32>
    %193 = arith.divf %191, %192 : vector<8x32xf32>
    %194 = arith.index_cast %c3_i32 : i32 to index
    %c0_109 = arith.constant 0 : index
    %c0_110 = arith.constant 0 : index
    %195 = vector.load %arg19[%194, %c0_109, %c0_110] : memref<8x8x32xf32, #tpu.memory_space<vmem>>, vector<1x8x32xf32>
    %196 = vector.shape_cast %195 : vector<1x8x32xf32> to vector<8x32xf32>
    %197 = arith.mulf %184, %175 : vector<8x32xf32>
    %198 = arith.addf %196, %197 : vector<8x32xf32>
    %199 = math.tanh %198 : vector<8x32xf32>
    %cst_111 = arith.constant 1.000000e+00 : f32
    %200 = vector.broadcast %cst_111 : f32 to vector<8x32xf32>
    %201 = arith.subf %200, %193 : vector<8x32xf32>
    %202 = arith.mulf %201, %199 : vector<8x32xf32>
    %203 = arith.mulf %193, %165 : vector<8x32xf32>
    %204 = arith.addf %202, %203 : vector<8x32xf32>
    %205 = arith.index_cast %c3_i32 : i32 to index
    %c0_112 = arith.constant 0 : index
    %c0_113 = arith.constant 0 : index
    %206 = vector.load %arg16[%205, %c0_112, %c0_113] : memref<8x8x32xf32, #tpu.memory_space<vmem>>, vector<1x8x32xf32>
    %207 = vector.shape_cast %206 : vector<1x8x32xf32> to vector<8x32xf32>
    %208 = vector.shape_cast %204 : vector<8x32xf32> to vector<1x8x32xf32>
    tpu.vector_store %arg16[%205, %c0_112, %c0_113], %208 {strides = array<i32>} : memref<8x8x32xf32, #tpu.memory_space<vmem>>, vector<1x8x32xf32>,
    %c4_i32 = arith.constant 4 : i32
    %cst_114 = arith.constant dense<0.000000e+00> : vector<8x32xf32>
    %209 = tpu.matmul %204, %34, %cst_114 {dimension_numbers = #tpu.dot_dimension_numbers<[1], [0], [0], [1], [0, 0, 1, 1], [], []>} : vector<8x32xf32>, vector<32x32xf32>, vector<8x32xf32> -> vector<8x32xf32>
    %210 = arith.addf %209, %42 : vector<8x32xf32>
    %cst_115 = arith.constant dense<0.000000e+00> : vector<8x32xf32>
    %211 = tpu.matmul %204, %36, %cst_115 {dimension_numbers = #tpu.dot_dimension_numbers<[1], [0], [0], [1], [0, 0, 1, 1], [], []>} : vector<8x32xf32>, vector<32x32xf32>, vector<8x32xf32> -> vector<8x32xf32>
    %212 = arith.addf %211, %46 : vector<8x32xf32>
    %cst_116 = arith.constant dense<0.000000e+00> : vector<8x32xf32>
    %213 = tpu.matmul %204, %38, %cst_116 {dimension_numbers = #tpu.dot_dimension_numbers<[1], [0], [0], [1], [0, 0, 1, 1], [], []>} : vector<8x32xf32>, vector<32x32xf32>, vector<8x32xf32> -> vector<8x32xf32>
    %214 = arith.addf %213, %50 : vector<8x32xf32>
    %215 = arith.index_cast %c4_i32 : i32 to index
    %c0_117 = arith.constant 0 : index
    %c0_118 = arith.constant 0 : index
    %216 = vector.load %arg17[%215, %c0_117, %c0_118] : memref<8x8x32xf32, #tpu.memory_space<vmem>>, vector<1x8x32xf32>
    %217 = vector.shape_cast %216 : vector<1x8x32xf32> to vector<8x32xf32>
    %218 = arith.addf %217, %210 : vector<8x32xf32>
    %219 = arith.negf %218 : vector<8x32xf32>
    %220 = math.exp %219 : vector<8x32xf32>
    %cst_119 = arith.constant 1.000000e+00 : f32
    %221 = vector.broadcast %cst_119 : f32 to vector<8x32xf32>
    %222 = arith.addf %221, %220 : vector<8x32xf32>
    %223 = arith.divf %221, %222 : vector<8x32xf32>
    %224 = arith.index_cast %c4_i32 : i32 to index
    %c0_120 = arith.constant 0 : index
    %c0_121 = arith.constant 0 : index
    %225 = vector.load %arg18[%224, %c0_120, %c0_121] : memref<8x8x32xf32, #tpu.memory_space<vmem>>, vector<1x8x32xf32>
    %226 = vector.shape_cast %225 : vector<1x8x32xf32> to vector<8x32xf32>
    %227 = arith.addf %226, %212 : vector<8x32xf32>
    %228 = arith.negf %227 : vector<8x32xf32>
    %229 = math.exp %228 : vector<8x32xf32>
    %cst_122 = arith.constant 1.000000e+00 : f32
    %230 = vector.broadcast %cst_122 : f32 to vector<8x32xf32>
    %231 = arith.addf %230, %229 : vector<8x32xf32>
    %232 = arith.divf %230, %231 : vector<8x32xf32>
    %233 = arith.index_cast %c4_i32 : i32 to index
    %c0_123 = arith.constant 0 : index
    %c0_124 = arith.constant 0 : index
    %234 = vector.load %arg19[%233, %c0_123, %c0_124] : memref<8x8x32xf32, #tpu.memory_space<vmem>>, vector<1x8x32xf32>
    %235 = vector.shape_cast %234 : vector<1x8x32xf32> to vector<8x32xf32>
    %236 = arith.mulf %223, %214 : vector<8x32xf32>
    %237 = arith.addf %235, %236 : vector<8x32xf32>
    %238 = math.tanh %237 : vector<8x32xf32>
    %cst_125 = arith.constant 1.000000e+00 : f32
    %239 = vector.broadcast %cst_125 : f32 to vector<8x32xf32>
    %240 = arith.subf %239, %232 : vector<8x32xf32>
    %241 = arith.mulf %240, %238 : vector<8x32xf32>
    %242 = arith.mulf %232, %204 : vector<8x32xf32>
    %243 = arith.addf %241, %242 : vector<8x32xf32>
    %244 = arith.index_cast %c4_i32 : i32 to index
    %c0_126 = arith.constant 0 : index
    %c0_127 = arith.constant 0 : index
    %245 = vector.load %arg16[%244, %c0_126, %c0_127] : memref<8x8x32xf32, #tpu.memory_space<vmem>>, vector<1x8x32xf32>
    %246 = vector.shape_cast %245 : vector<1x8x32xf32> to vector<8x32xf32>
    %247 = vector.shape_cast %243 : vector<8x32xf32> to vector<1x8x32xf32>
    tpu.vector_store %arg16[%244, %c0_126, %c0_127], %247 {strides = array<i32>} : memref<8x8x32xf32, #tpu.memory_space<vmem>>, vector<1x8x32xf32>,
    %c5_i32 = arith.constant 5 : i32
    %cst_128 = arith.constant dense<0.000000e+00> : vector<8x32xf32>
    %248 = tpu.matmul %243, %34, %cst_128 {dimension_numbers = #tpu.dot_dimension_numbers<[1], [0], [0], [1], [0, 0, 1, 1], [], []>} : vector<8x32xf32>, vector<32x32xf32>, vector<8x32xf32> -> vector<8x32xf32>
    %249 = arith.addf %248, %42 : vector<8x32xf32>
    %cst_129 = arith.constant dense<0.000000e+00> : vector<8x32xf32>
    %250 = tpu.matmul %243, %36, %cst_129 {dimension_numbers = #tpu.dot_dimension_numbers<[1], [0], [0], [1], [0, 0, 1, 1], [], []>} : vector<8x32xf32>, vector<32x32xf32>, vector<8x32xf32> -> vector<8x32xf32>
    %251 = arith.addf %250, %46 : vector<8x32xf32>
    %cst_130 = arith.constant dense<0.000000e+00> : vector<8x32xf32>
    %252 = tpu.matmul %243, %38, %cst_130 {dimension_numbers = #tpu.dot_dimension_numbers<[1], [0], [0], [1], [0, 0, 1, 1], [], []>} : vector<8x32xf32>, vector<32x32xf32>, vector<8x32xf32> -> vector<8x32xf32>
    %253 = arith.addf %252, %50 : vector<8x32xf32>
    %254 = arith.index_cast %c5_i32 : i32 to index
    %c0_131 = arith.constant 0 : index
    %c0_132 = arith.constant 0 : index
    %255 = vector.load %arg17[%254, %c0_131, %c0_132] : memref<8x8x32xf32, #tpu.memory_space<vmem>>, vector<1x8x32xf32>
    %256 = vector.shape_cast %255 : vector<1x8x32xf32> to vector<8x32xf32>
    %257 = arith.addf %256, %249 : vector<8x32xf32>
    %258 = arith.negf %257 : vector<8x32xf32>
    %259 = math.exp %258 : vector<8x32xf32>
    %cst_133 = arith.constant 1.000000e+00 : f32
    %260 = vector.broadcast %cst_133 : f32 to vector<8x32xf32>
    %261 = arith.addf %260, %259 : vector<8x32xf32>
    %262 = arith.divf %260, %261 : vector<8x32xf32>
    %263 = arith.index_cast %c5_i32 : i32 to index
    %c0_134 = arith.constant 0 : index
    %c0_135 = arith.constant 0 : index
    %264 = vector.load %arg18[%263, %c0_134, %c0_135] : memref<8x8x32xf32, #tpu.memory_space<vmem>>, vector<1x8x32xf32>
    %265 = vector.shape_cast %264 : vector<1x8x32xf32> to vector<8x32xf32>
    %266 = arith.addf %265, %251 : vector<8x32xf32>
    %267 = arith.negf %266 : vector<8x32xf32>
    %268 = math.exp %267 : vector<8x32xf32>
    %cst_136 = arith.constant 1.000000e+00 : f32
    %269 = vector.broadcast %cst_136 : f32 to vector<8x32xf32>
    %270 = arith.addf %269, %268 : vector<8x32xf32>
    %271 = arith.divf %269, %270 : vector<8x32xf32>
    %272 = arith.index_cast %c5_i32 : i32 to index
    %c0_137 = arith.constant 0 : index
    %c0_138 = arith.constant 0 : index
    %273 = vector.load %arg19[%272, %c0_137, %c0_138] : memref<8x8x32xf32, #tpu.memory_space<vmem>>, vector<1x8x32xf32>
    %274 = vector.shape_cast %273 : vector<1x8x32xf32> to vector<8x32xf32>
    %275 = arith.mulf %262, %253 : vector<8x32xf32>
    %276 = arith.addf %274, %275 : vector<8x32xf32>
    %277 = math.tanh %276 : vector<8x32xf32>
    %cst_139 = arith.constant 1.000000e+00 : f32
    %278 = vector.broadcast %cst_139 : f32 to vector<8x32xf32>
    %279 = arith.subf %278, %271 : vector<8x32xf32>
    %280 = arith.mulf %279, %277 : vector<8x32xf32>
    %281 = arith.mulf %271, %243 : vector<8x32xf32>
    %282 = arith.addf %280, %281 : vector<8x32xf32>
    %283 = arith.index_cast %c5_i32 : i32 to index
    %c0_140 = arith.constant 0 : index
    %c0_141 = arith.constant 0 : index
    %284 = vector.load %arg16[%283, %c0_140, %c0_141] : memref<8x8x32xf32, #tpu.memory_space<vmem>>, vector<1x8x32xf32>
    %285 = vector.shape_cast %284 : vector<1x8x32xf32> to vector<8x32xf32>
    %286 = vector.shape_cast %282 : vector<8x32xf32> to vector<1x8x32xf32>
    tpu.vector_store %arg16[%283, %c0_140, %c0_141], %286 {strides = array<i32>} : memref<8x8x32xf32, #tpu.memory_space<vmem>>, vector<1x8x32xf32>,
    %c6_i32 = arith.constant 6 : i32
    %cst_142 = arith.constant dense<0.000000e+00> : vector<8x32xf32>
    %287 = tpu.matmul %282, %34, %cst_142 {dimension_numbers = #tpu.dot_dimension_numbers<[1], [0], [0], [1], [0, 0, 1, 1], [], []>} : vector<8x32xf32>, vector<32x32xf32>, vector<8x32xf32> -> vector<8x32xf32>
    %288 = arith.addf %287, %42 : vector<8x32xf32>
    %cst_143 = arith.constant dense<0.000000e+00> : vector<8x32xf32>
    %289 = tpu.matmul %282, %36, %cst_143 {dimension_numbers = #tpu.dot_dimension_numbers<[1], [0], [0], [1], [0, 0, 1, 1], [], []>} : vector<8x32xf32>, vector<32x32xf32>, vector<8x32xf32> -> vector<8x32xf32>
    %290 = arith.addf %289, %46 : vector<8x32xf32>
    %cst_144 = arith.constant dense<0.000000e+00> : vector<8x32xf32>
    %291 = tpu.matmul %282, %38, %cst_144 {dimension_numbers = #tpu.dot_dimension_numbers<[1], [0], [0], [1], [0, 0, 1, 1], [], []>} : vector<8x32xf32>, vector<32x32xf32>, vector<8x32xf32> -> vector<8x32xf32>
    %292 = arith.addf %291, %50 : vector<8x32xf32>
    %293 = arith.index_cast %c6_i32 : i32 to index
    %c0_145 = arith.constant 0 : index
    %c0_146 = arith.constant 0 : index
    %294 = vector.load %arg17[%293, %c0_145, %c0_146] : memref<8x8x32xf32, #tpu.memory_space<vmem>>, vector<1x8x32xf32>
    %295 = vector.shape_cast %294 : vector<1x8x32xf32> to vector<8x32xf32>
    %296 = arith.addf %295, %288 : vector<8x32xf32>
    %297 = arith.negf %296 : vector<8x32xf32>
    %298 = math.exp %297 : vector<8x32xf32>
    %cst_147 = arith.constant 1.000000e+00 : f32
    %299 = vector.broadcast %cst_147 : f32 to vector<8x32xf32>
    %300 = arith.addf %299, %298 : vector<8x32xf32>
    %301 = arith.divf %299, %300 : vector<8x32xf32>
    %302 = arith.index_cast %c6_i32 : i32 to index
    %c0_148 = arith.constant 0 : index
    %c0_149 = arith.constant 0 : index
    %303 = vector.load %arg18[%302, %c0_148, %c0_149] : memref<8x8x32xf32, #tpu.memory_space<vmem>>, vector<1x8x32xf32>
    %304 = vector.shape_cast %303 : vector<1x8x32xf32> to vector<8x32xf32>
    %305 = arith.addf %304, %290 : vector<8x32xf32>
    %306 = arith.negf %305 : vector<8x32xf32>
    %307 = math.exp %306 : vector<8x32xf32>
    %cst_150 = arith.constant 1.000000e+00 : f32
    %308 = vector.broadcast %cst_150 : f32 to vector<8x32xf32>
    %309 = arith.addf %308, %307 : vector<8x32xf32>
    %310 = arith.divf %308, %309 : vector<8x32xf32>
    %311 = arith.index_cast %c6_i32 : i32 to index
    %c0_151 = arith.constant 0 : index
    %c0_152 = arith.constant 0 : index
    %312 = vector.load %arg19[%311, %c0_151, %c0_152] : memref<8x8x32xf32, #tpu.memory_space<vmem>>, vector<1x8x32xf32>
    %313 = vector.shape_cast %312 : vector<1x8x32xf32> to vector<8x32xf32>
    %314 = arith.mulf %301, %292 : vector<8x32xf32>
    %315 = arith.addf %313, %314 : vector<8x32xf32>
    %316 = math.tanh %315 : vector<8x32xf32>
    %cst_153 = arith.constant 1.000000e+00 : f32
    %317 = vector.broadcast %cst_153 : f32 to vector<8x32xf32>
    %318 = arith.subf %317, %310 : vector<8x32xf32>
    %319 = arith.mulf %318, %316 : vector<8x32xf32>
    %320 = arith.mulf %310, %282 : vector<8x32xf32>
    %321 = arith.addf %319, %320 : vector<8x32xf32>
    %322 = arith.index_cast %c6_i32 : i32 to index
    %c0_154 = arith.constant 0 : index
    %c0_155 = arith.constant 0 : index
    %323 = vector.load %arg16[%322, %c0_154, %c0_155] : memref<8x8x32xf32, #tpu.memory_space<vmem>>, vector<1x8x32xf32>
    %324 = vector.shape_cast %323 : vector<1x8x32xf32> to vector<8x32xf32>
    %325 = vector.shape_cast %321 : vector<8x32xf32> to vector<1x8x32xf32>
    tpu.vector_store %arg16[%322, %c0_154, %c0_155], %325 {strides = array<i32>} : memref<8x8x32xf32, #tpu.memory_space<vmem>>, vector<1x8x32xf32>,
    %c7_i32 = arith.constant 7 : i32
    %cst_156 = arith.constant dense<0.000000e+00> : vector<8x32xf32>
    %326 = tpu.matmul %321, %34, %cst_156 {dimension_numbers = #tpu.dot_dimension_numbers<[1], [0], [0], [1], [0, 0, 1, 1], [], []>} : vector<8x32xf32>, vector<32x32xf32>, vector<8x32xf32> -> vector<8x32xf32>
    %327 = arith.addf %326, %42 : vector<8x32xf32>
    %cst_157 = arith.constant dense<0.000000e+00> : vector<8x32xf32>
    %328 = tpu.matmul %321, %36, %cst_157 {dimension_numbers = #tpu.dot_dimension_numbers<[1], [0], [0], [1], [0, 0, 1, 1], [], []>} : vector<8x32xf32>, vector<32x32xf32>, vector<8x32xf32> -> vector<8x32xf32>
    %329 = arith.addf %328, %46 : vector<8x32xf32>
    %cst_158 = arith.constant dense<0.000000e+00> : vector<8x32xf32>
    %330 = tpu.matmul %321, %38, %cst_158 {dimension_numbers = #tpu.dot_dimension_numbers<[1], [0], [0], [1], [0, 0, 1, 1], [], []>} : vector<8x32xf32>, vector<32x32xf32>, vector<8x32xf32> -> vector<8x32xf32>
    %331 = arith.addf %330, %50 : vector<8x32xf32>
    %332 = arith.index_cast %c7_i32 : i32 to index
    %c0_159 = arith.constant 0 : index
    %c0_160 = arith.constant 0 : index
    %333 = vector.load %arg17[%332, %c0_159, %c0_160] : memref<8x8x32xf32, #tpu.memory_space<vmem>>, vector<1x8x32xf32>
    %334 = vector.shape_cast %333 : vector<1x8x32xf32> to vector<8x32xf32>
    %335 = arith.addf %334, %327 : vector<8x32xf32>
    %336 = arith.negf %335 : vector<8x32xf32>
    %337 = math.exp %336 : vector<8x32xf32>
    %cst_161 = arith.constant 1.000000e+00 : f32
    %338 = vector.broadcast %cst_161 : f32 to vector<8x32xf32>
    %339 = arith.addf %338, %337 : vector<8x32xf32>
    %340 = arith.divf %338, %339 : vector<8x32xf32>
    %341 = arith.index_cast %c7_i32 : i32 to index
    %c0_162 = arith.constant 0 : index
    %c0_163 = arith.constant 0 : index
    %342 = vector.load %arg18[%341, %c0_162, %c0_163] : memref<8x8x32xf32, #tpu.memory_space<vmem>>, vector<1x8x32xf32>
    %343 = vector.shape_cast %342 : vector<1x8x32xf32> to vector<8x32xf32>
    %344 = arith.addf %343, %329 : vector<8x32xf32>
    %345 = arith.negf %344 : vector<8x32xf32>
    %346 = math.exp %345 : vector<8x32xf32>
    %cst_164 = arith.constant 1.000000e+00 : f32
    %347 = vector.broadcast %cst_164 : f32 to vector<8x32xf32>
    %348 = arith.addf %347, %346 : vector<8x32xf32>
    %349 = arith.divf %347, %348 : vector<8x32xf32>
    %350 = arith.index_cast %c7_i32 : i32 to index
    %c0_165 = arith.constant 0 : index
    %c0_166 = arith.constant 0 : index
    %351 = vector.load %arg19[%350, %c0_165, %c0_166] : memref<8x8x32xf32, #tpu.memory_space<vmem>>, vector<1x8x32xf32>
    %352 = vector.shape_cast %351 : vector<1x8x32xf32> to vector<8x32xf32>
    %353 = arith.mulf %340, %331 : vector<8x32xf32>
    %354 = arith.addf %352, %353 : vector<8x32xf32>
    %355 = math.tanh %354 : vector<8x32xf32>
    %cst_167 = arith.constant 1.000000e+00 : f32
    %356 = vector.broadcast %cst_167 : f32 to vector<8x32xf32>
    %357 = arith.subf %356, %349 : vector<8x32xf32>
    %358 = arith.mulf %357, %355 : vector<8x32xf32>
    %359 = arith.mulf %349, %321 : vector<8x32xf32>
    %360 = arith.addf %358, %359 : vector<8x32xf32>
    %361 = arith.index_cast %c7_i32 : i32 to index
    %c0_168 = arith.constant 0 : index
    %c0_169 = arith.constant 0 : index
    %362 = vector.load %arg16[%361, %c0_168, %c0_169] : memref<8x8x32xf32, #tpu.memory_space<vmem>>, vector<1x8x32xf32>
    %363 = vector.shape_cast %362 : vector<1x8x32xf32> to vector<8x32xf32>
    %364 = vector.shape_cast %360 : vector<8x32xf32> to vector<1x8x32xf32>
    tpu.vector_store %arg16[%361, %c0_168, %c0_169], %364 {strides = array<i32>} : memref<8x8x32xf32, #tpu.memory_space<vmem>>, vector<1x8x32xf32>,
    %c8_i32 = arith.constant 8 : i32
    %c0_170 = arith.constant 0 : index
    %c0_171 = arith.constant 0 : index
    %c0_172 = arith.constant 0 : index
    %365 = vector.load %arg15[%c0_170, %c0_171, %c0_172] : memref<2x8x32xf32, #tpu.memory_space<vmem>>, vector<1x8x32xf32>
    %366 = vector.shape_cast %365 : vector<1x8x32xf32> to vector<8x32xf32>
    %367 = vector.shape_cast %360 : vector<8x32xf32> to vector<1x8x32xf32>
    tpu.vector_store %arg15[%c0_170, %c0_171, %c0_172], %367 {strides = array<i32>} : memref<2x8x32xf32, #tpu.memory_space<vmem>>, vector<1x8x32xf32>,
    %c0_173 = arith.constant 0 : index
    %c0_174 = arith.constant 0 : index
    %c0_175 = arith.constant 0 : index
    %368 = vector.load %arg16[%c0_173, %c0_174, %c0_175] : memref<8x8x32xf32, #tpu.memory_space<vmem>>, vector<8x8x32xf32>
    %369 = vector.shape_cast %368 : vector<8x8x32xf32> to vector<64x32xf32>
    %c0_176 = arith.constant 0 : index
    %c0_177 = arith.constant 0 : index
    %c0_178 = arith.constant 0 : index
    %c0_179 = arith.constant 0 : index
    %370 = vector.load %arg5[%c0_176, %c0_177, %c0_178, %c0_179] : memref<1x3x32x32xf32, #tpu.memory_space<vmem>>, vector<1x1x32x32xf32>
    %371 = vector.shape_cast %370 : vector<1x1x32x32xf32> to vector<32x32xf32>
    %cst_180 = arith.constant dense<0.000000e+00> : vector<64x32xf32>
    %372 = tpu.matmul %369, %371, %cst_180 {dimension_numbers = #tpu.dot_dimension_numbers<[1], [0], [0], [1], [0, 0, 1, 1], [], []>} : vector<64x32xf32>, vector<32x32xf32>, vector<64x32xf32> -> vector<64x32xf32>
    %c0_181 = arith.constant 0 : index
    %c0_182 = arith.constant 0 : index
    %c0_183 = arith.constant 0 : index
    %c0_184 = arith.constant 0 : index
    %373 = vector.load %arg6[%c0_181, %c0_182, %c0_183, %c0_184] : memref<1x3x1x32xf32, #tpu.memory_space<vmem>>, vector<1x1x1x32xf32>
    %374 = vector.shape_cast %373 : vector<1x1x1x32xf32> to vector<1x32xf32>
    %375 = vector.broadcast %374 : vector<1x32xf32> to vector<64x32xf32>
    %376 = arith.addf %372, %375 : vector<64x32xf32>
    %377 = vector.shape_cast %376 : vector<64x32xf32> to vector<8x8x32xf32>
    %c0_185 = arith.constant 0 : index
    %c0_186 = arith.constant 0 : index
    %c0_187 = arith.constant 0 : index
    %378 = vector.load %arg17[%c0_185, %c0_186, %c0_187] : memref<8x8x32xf32, #tpu.memory_space<vmem>>, vector<8x8x32xf32>
    tpu.vector_store %arg17[%c0_185, %c0_186, %c0_187], %377 {strides = array<i32>} : memref<8x8x32xf32, #tpu.memory_space<vmem>>, vector<8x8x32xf32>,
    %c0_188 = arith.constant 0 : index
    %c1_189 = arith.constant 1 : index
    %c0_190 = arith.constant 0 : index
    %c0_191 = arith.constant 0 : index
    %379 = vector.load %arg5[%c0_188, %c1_189, %c0_190, %c0_191] : memref<1x3x32x32xf32, #tpu.memory_space<vmem>>, vector<1x1x32x32xf32>
    %380 = vector.shape_cast %379 : vector<1x1x32x32xf32> to vector<32x32xf32>
    %cst_192 = arith.constant dense<0.000000e+00> : vector<64x32xf32>
    %381 = tpu.matmul %369, %380, %cst_192 {dimension_numbers = #tpu.dot_dimension_numbers<[1], [0], [0], [1], [0, 0, 1, 1], [], []>} : vector<64x32xf32>, vector<32x32xf32>, vector<64x32xf32> -> vector<64x32xf32>
    %c0_193 = arith.constant 0 : index
    %c1_194 = arith.constant 1 : index
    %c0_195 = arith.constant 0 : index
    %c0_196 = arith.constant 0 : index
    %382 = vector.load %arg6[%c0_193, %c1_194, %c0_195, %c0_196] : memref<1x3x1x32xf32, #tpu.memory_space<vmem>>, vector<1x1x1x32xf32>
    %383 = vector.shape_cast %382 : vector<1x1x1x32xf32> to vector<1x32xf32>
    %384 = vector.broadcast %383 : vector<1x32xf32> to vector<64x32xf32>
    %385 = arith.addf %381, %384 : vector<64x32xf32>
    %386 = vector.shape_cast %385 : vector<64x32xf32> to vector<8x8x32xf32>
    %c0_197 = arith.constant 0 : index
    %c0_198 = arith.constant 0 : index
    %c0_199 = arith.constant 0 : index
    %387 = vector.load %arg18[%c0_197, %c0_198, %c0_199] : memref<8x8x32xf32, #tpu.memory_space<vmem>>, vector<8x8x32xf32>
    tpu.vector_store %arg18[%c0_197, %c0_198, %c0_199], %386 {strides = array<i32>} : memref<8x8x32xf32, #tpu.memory_space<vmem>>, vector<8x8x32xf32>,
    %c0_200 = arith.constant 0 : index
    %c2_201 = arith.constant 2 : index
    %c0_202 = arith.constant 0 : index
    %c0_203 = arith.constant 0 : index
    %388 = vector.load %arg5[%c0_200, %c2_201, %c0_202, %c0_203] : memref<1x3x32x32xf32, #tpu.memory_space<vmem>>, vector<1x1x32x32xf32>
    %389 = vector.shape_cast %388 : vector<1x1x32x32xf32> to vector<32x32xf32>
    %cst_204 = arith.constant dense<0.000000e+00> : vector<64x32xf32>
    %390 = tpu.matmul %369, %389, %cst_204 {dimension_numbers = #tpu.dot_dimension_numbers<[1], [0], [0], [1], [0, 0, 1, 1], [], []>} : vector<64x32xf32>, vector<32x32xf32>, vector<64x32xf32> -> vector<64x32xf32>
    %c0_205 = arith.constant 0 : index
    %c2_206 = arith.constant 2 : index
    %c0_207 = arith.constant 0 : index
    %c0_208 = arith.constant 0 : index
    %391 = vector.load %arg6[%c0_205, %c2_206, %c0_207, %c0_208] : memref<1x3x1x32xf32, #tpu.memory_space<vmem>>, vector<1x1x1x32xf32>
    %392 = vector.shape_cast %391 : vector<1x1x1x32xf32> to vector<1x32xf32>
    %393 = vector.broadcast %392 : vector<1x32xf32> to vector<64x32xf32>
    %394 = arith.addf %390, %393 : vector<64x32xf32>
    %395 = vector.shape_cast %394 : vector<64x32xf32> to vector<8x8x32xf32>
    %c0_209 = arith.constant 0 : index
    %c0_210 = arith.constant 0 : index
    %c0_211 = arith.constant 0 : index
    %396 = vector.load %arg19[%c0_209, %c0_210, %c0_211] : memref<8x8x32xf32, #tpu.memory_space<vmem>>, vector<8x8x32xf32>
    tpu.vector_store %arg19[%c0_209, %c0_210, %c0_211], %395 {strides = array<i32>} : memref<8x8x32xf32, #tpu.memory_space<vmem>>, vector<8x8x32xf32>,
    %c1_212 = arith.constant 1 : index
    %c0_213 = arith.constant 0 : index
    %c0_214 = arith.constant 0 : index
    %c0_215 = arith.constant 0 : index
    %397 = vector.load %arg7[%c1_212, %c0_213, %c0_214, %c0_215] : memref<2x3x32x32xf32, #tpu.memory_space<vmem>>, vector<1x1x32x32xf32>
    %398 = vector.shape_cast %397 : vector<1x1x32x32xf32> to vector<32x32xf32>
    %c1_216 = arith.constant 1 : index
    %c1_217 = arith.constant 1 : index
    %c0_218 = arith.constant 0 : index
    %c0_219 = arith.constant 0 : index
    %399 = vector.load %arg7[%c1_216, %c1_217, %c0_218, %c0_219] : memref<2x3x32x32xf32, #tpu.memory_space<vmem>>, vector<1x1x32x32xf32>
    %400 = vector.shape_cast %399 : vector<1x1x32x32xf32> to vector<32x32xf32>
    %c1_220 = arith.constant 1 : index
    %c2_221 = arith.constant 2 : index
    %c0_222 = arith.constant 0 : index
    %c0_223 = arith.constant 0 : index
    %401 = vector.load %arg7[%c1_220, %c2_221, %c0_222, %c0_223] : memref<2x3x32x32xf32, #tpu.memory_space<vmem>>, vector<1x1x32x32xf32>
    %402 = vector.shape_cast %401 : vector<1x1x32x32xf32> to vector<32x32xf32>
    %c1_224 = arith.constant 1 : index
    %c0_225 = arith.constant 0 : index
    %c0_226 = arith.constant 0 : index
    %c0_227 = arith.constant 0 : index
    %403 = vector.load %arg8[%c1_224, %c0_225, %c0_226, %c0_227] : memref<2x3x1x32xf32, #tpu.memory_space<vmem>>, vector<1x1x1x32xf32>
    %404 = vector.shape_cast %403 : vector<1x1x1x32xf32> to vector<1x32xf32>
    %405 = vector.shape_cast %404 : vector<1x32xf32> to vector<1x32xf32>
    %406 = vector.broadcast %405 : vector<1x32xf32> to vector<8x32xf32>
    %c1_228 = arith.constant 1 : index
    %c1_229 = arith.constant 1 : index
    %c0_230 = arith.constant 0 : index
    %c0_231 = arith.constant 0 : index
    %407 = vector.load %arg8[%c1_228, %c1_229, %c0_230, %c0_231] : memref<2x3x1x32xf32, #tpu.memory_space<vmem>>, vector<1x1x1x32xf32>
    %408 = vector.shape_cast %407 : vector<1x1x1x32xf32> to vector<1x32xf32>
    %409 = vector.shape_cast %408 : vector<1x32xf32> to vector<1x32xf32>
    %410 = vector.broadcast %409 : vector<1x32xf32> to vector<8x32xf32>
    %c1_232 = arith.constant 1 : index
    %c2_233 = arith.constant 2 : index
    %c0_234 = arith.constant 0 : index
    %c0_235 = arith.constant 0 : index
    %411 = vector.load %arg8[%c1_232, %c2_233, %c0_234, %c0_235] : memref<2x3x1x32xf32, #tpu.memory_space<vmem>>, vector<1x1x1x32xf32>
    %412 = vector.shape_cast %411 : vector<1x1x1x32xf32> to vector<1x32xf32>
    %413 = vector.shape_cast %412 : vector<1x32xf32> to vector<1x32xf32>
    %414 = vector.broadcast %413 : vector<1x32xf32> to vector<8x32xf32>
    %c1_236 = arith.constant 1 : index
    %c0_237 = arith.constant 0 : index
    %c0_238 = arith.constant 0 : index
    %415 = vector.load %arg15[%c1_236, %c0_237, %c0_238] : memref<2x8x32xf32, #tpu.memory_space<vmem>>, vector<1x8x32xf32>
    %416 = vector.shape_cast %415 : vector<1x8x32xf32> to vector<8x32xf32>
    %c0_i32_239 = arith.constant 0 : i32
    %cst_240 = arith.constant dense<0.000000e+00> : vector<8x32xf32>
    %417 = tpu.matmul %416, %398, %cst_240 {dimension_numbers = #tpu.dot_dimension_numbers<[1], [0], [0], [1], [0, 0, 1, 1], [], []>} : vector<8x32xf32>, vector<32x32xf32>, vector<8x32xf32> -> vector<8x32xf32>
    %418 = arith.addf %417, %406 : vector<8x32xf32>
    %cst_241 = arith.constant dense<0.000000e+00> : vector<8x32xf32>
    %419 = tpu.matmul %416, %400, %cst_241 {dimension_numbers = #tpu.dot_dimension_numbers<[1], [0], [0], [1], [0, 0, 1, 1], [], []>} : vector<8x32xf32>, vector<32x32xf32>, vector<8x32xf32> -> vector<8x32xf32>
    %420 = arith.addf %419, %410 : vector<8x32xf32>
    %cst_242 = arith.constant dense<0.000000e+00> : vector<8x32xf32>
    %421 = tpu.matmul %416, %402, %cst_242 {dimension_numbers = #tpu.dot_dimension_numbers<[1], [0], [0], [1], [0, 0, 1, 1], [], []>} : vector<8x32xf32>, vector<32x32xf32>, vector<8x32xf32> -> vector<8x32xf32>
    %422 = arith.addf %421, %414 : vector<8x32xf32>
    %423 = arith.index_cast %c0_i32_239 : i32 to index
    %c0_243 = arith.constant 0 : index
    %c0_244 = arith.constant 0 : index
    %424 = vector.load %arg17[%423, %c0_243, %c0_244] : memref<8x8x32xf32, #tpu.memory_space<vmem>>, vector<1x8x32xf32>
    %425 = vector.shape_cast %424 : vector<1x8x32xf32> to vector<8x32xf32>
    %426 = arith.addf %425, %418 : vector<8x32xf32>
    %427 = arith.negf %426 : vector<8x32xf32>
    %428 = math.exp %427 : vector<8x32xf32>
    %cst_245 = arith.constant 1.000000e+00 : f32
    %429 = vector.broadcast %cst_245 : f32 to vector<8x32xf32>
    %430 = arith.addf %429, %428 : vector<8x32xf32>
    %431 = arith.divf %429, %430 : vector<8x32xf32>
    %432 = arith.index_cast %c0_i32_239 : i32 to index
    %c0_246 = arith.constant 0 : index
    %c0_247 = arith.constant 0 : index
    %433 = vector.load %arg18[%432, %c0_246, %c0_247] : memref<8x8x32xf32, #tpu.memory_space<vmem>>, vector<1x8x32xf32>
    %434 = vector.shape_cast %433 : vector<1x8x32xf32> to vector<8x32xf32>
    %435 = arith.addf %434, %420 : vector<8x32xf32>
    %436 = arith.negf %435 : vector<8x32xf32>
    %437 = math.exp %436 : vector<8x32xf32>
    %cst_248 = arith.constant 1.000000e+00 : f32
    %438 = vector.broadcast %cst_248 : f32 to vector<8x32xf32>
    %439 = arith.addf %438, %437 : vector<8x32xf32>
    %440 = arith.divf %438, %439 : vector<8x32xf32>
    %441 = arith.index_cast %c0_i32_239 : i32 to index
    %c0_249 = arith.constant 0 : index
    %c0_250 = arith.constant 0 : index
    %442 = vector.load %arg19[%441, %c0_249, %c0_250] : memref<8x8x32xf32, #tpu.memory_space<vmem>>, vector<1x8x32xf32>
    %443 = vector.shape_cast %442 : vector<1x8x32xf32> to vector<8x32xf32>
    %444 = arith.mulf %431, %422 : vector<8x32xf32>
    %445 = arith.addf %443, %444 : vector<8x32xf32>
    %446 = math.tanh %445 : vector<8x32xf32>
    %cst_251 = arith.constant 1.000000e+00 : f32
    %447 = vector.broadcast %cst_251 : f32 to vector<8x32xf32>
    %448 = arith.subf %447, %440 : vector<8x32xf32>
    %449 = arith.mulf %448, %446 : vector<8x32xf32>
    %450 = arith.mulf %440, %416 : vector<8x32xf32>
    %451 = arith.addf %449, %450 : vector<8x32xf32>
    %c1_i32_252 = arith.constant 1 : i32
    %cst_253 = arith.constant dense<0.000000e+00> : vector<8x32xf32>
    %452 = tpu.matmul %451, %398, %cst_253 {dimension_numbers = #tpu.dot_dimension_numbers<[1], [0], [0], [1], [0, 0, 1, 1], [], []>} : vector<8x32xf32>, vector<32x32xf32>, vector<8x32xf32> -> vector<8x32xf32>
    %453 = arith.addf %452, %406 : vector<8x32xf32>
    %cst_254 = arith.constant dense<0.000000e+00> : vector<8x32xf32>
    %454 = tpu.matmul %451, %400, %cst_254 {dimension_numbers = #tpu.dot_dimension_numbers<[1], [0], [0], [1], [0, 0, 1, 1], [], []>} : vector<8x32xf32>, vector<32x32xf32>, vector<8x32xf32> -> vector<8x32xf32>
    %455 = arith.addf %454, %410 : vector<8x32xf32>
    %cst_255 = arith.constant dense<0.000000e+00> : vector<8x32xf32>
    %456 = tpu.matmul %451, %402, %cst_255 {dimension_numbers = #tpu.dot_dimension_numbers<[1], [0], [0], [1], [0, 0, 1, 1], [], []>} : vector<8x32xf32>, vector<32x32xf32>, vector<8x32xf32> -> vector<8x32xf32>
    %457 = arith.addf %456, %414 : vector<8x32xf32>
    %458 = arith.index_cast %c1_i32_252 : i32 to index
    %c0_256 = arith.constant 0 : index
    %c0_257 = arith.constant 0 : index
    %459 = vector.load %arg17[%458, %c0_256, %c0_257] : memref<8x8x32xf32, #tpu.memory_space<vmem>>, vector<1x8x32xf32>
    %460 = vector.shape_cast %459 : vector<1x8x32xf32> to vector<8x32xf32>
    %461 = arith.addf %460, %453 : vector<8x32xf32>
    %462 = arith.negf %461 : vector<8x32xf32>
    %463 = math.exp %462 : vector<8x32xf32>
    %cst_258 = arith.constant 1.000000e+00 : f32
    %464 = vector.broadcast %cst_258 : f32 to vector<8x32xf32>
    %465 = arith.addf %464, %463 : vector<8x32xf32>
    %466 = arith.divf %464, %465 : vector<8x32xf32>
    %467 = arith.index_cast %c1_i32_252 : i32 to index
    %c0_259 = arith.constant 0 : index
    %c0_260 = arith.constant 0 : index
    %468 = vector.load %arg18[%467, %c0_259, %c0_260] : memref<8x8x32xf32, #tpu.memory_space<vmem>>, vector<1x8x32xf32>
    %469 = vector.shape_cast %468 : vector<1x8x32xf32> to vector<8x32xf32>
    %470 = arith.addf %469, %455 : vector<8x32xf32>
    %471 = arith.negf %470 : vector<8x32xf32>
    %472 = math.exp %471 : vector<8x32xf32>
    %cst_261 = arith.constant 1.000000e+00 : f32
    %473 = vector.broadcast %cst_261 : f32 to vector<8x32xf32>
    %474 = arith.addf %473, %472 : vector<8x32xf32>
    %475 = arith.divf %473, %474 : vector<8x32xf32>
    %476 = arith.index_cast %c1_i32_252 : i32 to index
    %c0_262 = arith.constant 0 : index
    %c0_263 = arith.constant 0 : index
    %477 = vector.load %arg19[%476, %c0_262, %c0_263] : memref<8x8x32xf32, #tpu.memory_space<vmem>>, vector<1x8x32xf32>
    %478 = vector.shape_cast %477 : vector<1x8x32xf32> to vector<8x32xf32>
    %479 = arith.mulf %466, %457 : vector<8x32xf32>
    %480 = arith.addf %478, %479 : vector<8x32xf32>
    %481 = math.tanh %480 : vector<8x32xf32>
    %cst_264 = arith.constant 1.000000e+00 : f32
    %482 = vector.broadcast %cst_264 : f32 to vector<8x32xf32>
    %483 = arith.subf %482, %475 : vector<8x32xf32>
    %484 = arith.mulf %483, %481 : vector<8x32xf32>
    %485 = arith.mulf %475, %451 : vector<8x32xf32>
    %486 = arith.addf %484, %485 : vector<8x32xf32>
    %c2_i32_265 = arith.constant 2 : i32
    %cst_266 = arith.constant dense<0.000000e+00> : vector<8x32xf32>
    %487 = tpu.matmul %486, %398, %cst_266 {dimension_numbers = #tpu.dot_dimension_numbers<[1], [0], [0], [1], [0, 0, 1, 1], [], []>} : vector<8x32xf32>, vector<32x32xf32>, vector<8x32xf32> -> vector<8x32xf32>
    %488 = arith.addf %487, %406 : vector<8x32xf32>
    %cst_267 = arith.constant dense<0.000000e+00> : vector<8x32xf32>
    %489 = tpu.matmul %486, %400, %cst_267 {dimension_numbers = #tpu.dot_dimension_numbers<[1], [0], [0], [1], [0, 0, 1, 1], [], []>} : vector<8x32xf32>, vector<32x32xf32>, vector<8x32xf32> -> vector<8x32xf32>
    %490 = arith.addf %489, %410 : vector<8x32xf32>
    %cst_268 = arith.constant dense<0.000000e+00> : vector<8x32xf32>
    %491 = tpu.matmul %486, %402, %cst_268 {dimension_numbers = #tpu.dot_dimension_numbers<[1], [0], [0], [1], [0, 0, 1, 1], [], []>} : vector<8x32xf32>, vector<32x32xf32>, vector<8x32xf32> -> vector<8x32xf32>
    %492 = arith.addf %491, %414 : vector<8x32xf32>
    %493 = arith.index_cast %c2_i32_265 : i32 to index
    %c0_269 = arith.constant 0 : index
    %c0_270 = arith.constant 0 : index
    %494 = vector.load %arg17[%493, %c0_269, %c0_270] : memref<8x8x32xf32, #tpu.memory_space<vmem>>, vector<1x8x32xf32>
    %495 = vector.shape_cast %494 : vector<1x8x32xf32> to vector<8x32xf32>
    %496 = arith.addf %495, %488 : vector<8x32xf32>
    %497 = arith.negf %496 : vector<8x32xf32>
    %498 = math.exp %497 : vector<8x32xf32>
    %cst_271 = arith.constant 1.000000e+00 : f32
    %499 = vector.broadcast %cst_271 : f32 to vector<8x32xf32>
    %500 = arith.addf %499, %498 : vector<8x32xf32>
    %501 = arith.divf %499, %500 : vector<8x32xf32>
    %502 = arith.index_cast %c2_i32_265 : i32 to index
    %c0_272 = arith.constant 0 : index
    %c0_273 = arith.constant 0 : index
    %503 = vector.load %arg18[%502, %c0_272, %c0_273] : memref<8x8x32xf32, #tpu.memory_space<vmem>>, vector<1x8x32xf32>
    %504 = vector.shape_cast %503 : vector<1x8x32xf32> to vector<8x32xf32>
    %505 = arith.addf %504, %490 : vector<8x32xf32>
    %506 = arith.negf %505 : vector<8x32xf32>
    %507 = math.exp %506 : vector<8x32xf32>
    %cst_274 = arith.constant 1.000000e+00 : f32
    %508 = vector.broadcast %cst_274 : f32 to vector<8x32xf32>
    %509 = arith.addf %508, %507 : vector<8x32xf32>
    %510 = arith.divf %508, %509 : vector<8x32xf32>
    %511 = arith.index_cast %c2_i32_265 : i32 to index
    %c0_275 = arith.constant 0 : index
    %c0_276 = arith.constant 0 : index
    %512 = vector.load %arg19[%511, %c0_275, %c0_276] : memref<8x8x32xf32, #tpu.memory_space<vmem>>, vector<1x8x32xf32>
    %513 = vector.shape_cast %512 : vector<1x8x32xf32> to vector<8x32xf32>
    %514 = arith.mulf %501, %492 : vector<8x32xf32>
    %515 = arith.addf %513, %514 : vector<8x32xf32>
    %516 = math.tanh %515 : vector<8x32xf32>
    %cst_277 = arith.constant 1.000000e+00 : f32
    %517 = vector.broadcast %cst_277 : f32 to vector<8x32xf32>
    %518 = arith.subf %517, %510 : vector<8x32xf32>
    %519 = arith.mulf %518, %516 : vector<8x32xf32>
    %520 = arith.mulf %510, %486 : vector<8x32xf32>
    %521 = arith.addf %519, %520 : vector<8x32xf32>
    %c3_i32_278 = arith.constant 3 : i32
    %cst_279 = arith.constant dense<0.000000e+00> : vector<8x32xf32>
    %522 = tpu.matmul %521, %398, %cst_279 {dimension_numbers = #tpu.dot_dimension_numbers<[1], [0], [0], [1], [0, 0, 1, 1], [], []>} : vector<8x32xf32>, vector<32x32xf32>, vector<8x32xf32> -> vector<8x32xf32>
    %523 = arith.addf %522, %406 : vector<8x32xf32>
    %cst_280 = arith.constant dense<0.000000e+00> : vector<8x32xf32>
    %524 = tpu.matmul %521, %400, %cst_280 {dimension_numbers = #tpu.dot_dimension_numbers<[1], [0], [0], [1], [0, 0, 1, 1], [], []>} : vector<8x32xf32>, vector<32x32xf32>, vector<8x32xf32> -> vector<8x32xf32>
    %525 = arith.addf %524, %410 : vector<8x32xf32>
    %cst_281 = arith.constant dense<0.000000e+00> : vector<8x32xf32>
    %526 = tpu.matmul %521, %402, %cst_281 {dimension_numbers = #tpu.dot_dimension_numbers<[1], [0], [0], [1], [0, 0, 1, 1], [], []>} : vector<8x32xf32>, vector<32x32xf32>, vector<8x32xf32> -> vector<8x32xf32>
    %527 = arith.addf %526, %414 : vector<8x32xf32>
    %528 = arith.index_cast %c3_i32_278 : i32 to index
    %c0_282 = arith.constant 0 : index
    %c0_283 = arith.constant 0 : index
    %529 = vector.load %arg17[%528, %c0_282, %c0_283] : memref<8x8x32xf32, #tpu.memory_space<vmem>>, vector<1x8x32xf32>
    %530 = vector.shape_cast %529 : vector<1x8x32xf32> to vector<8x32xf32>
    %531 = arith.addf %530, %523 : vector<8x32xf32>
    %532 = arith.negf %531 : vector<8x32xf32>
    %533 = math.exp %532 : vector<8x32xf32>
    %cst_284 = arith.constant 1.000000e+00 : f32
    %534 = vector.broadcast %cst_284 : f32 to vector<8x32xf32>
    %535 = arith.addf %534, %533 : vector<8x32xf32>
    %536 = arith.divf %534, %535 : vector<8x32xf32>
    %537 = arith.index_cast %c3_i32_278 : i32 to index
    %c0_285 = arith.constant 0 : index
    %c0_286 = arith.constant 0 : index
    %538 = vector.load %arg18[%537, %c0_285, %c0_286] : memref<8x8x32xf32, #tpu.memory_space<vmem>>, vector<1x8x32xf32>
    %539 = vector.shape_cast %538 : vector<1x8x32xf32> to vector<8x32xf32>
    %540 = arith.addf %539, %525 : vector<8x32xf32>
    %541 = arith.negf %540 : vector<8x32xf32>
    %542 = math.exp %541 : vector<8x32xf32>
    %cst_287 = arith.constant 1.000000e+00 : f32
    %543 = vector.broadcast %cst_287 : f32 to vector<8x32xf32>
    %544 = arith.addf %543, %542 : vector<8x32xf32>
    %545 = arith.divf %543, %544 : vector<8x32xf32>
    %546 = arith.index_cast %c3_i32_278 : i32 to index
    %c0_288 = arith.constant 0 : index
    %c0_289 = arith.constant 0 : index
    %547 = vector.load %arg19[%546, %c0_288, %c0_289] : memref<8x8x32xf32, #tpu.memory_space<vmem>>, vector<1x8x32xf32>
    %548 = vector.shape_cast %547 : vector<1x8x32xf32> to vector<8x32xf32>
    %549 = arith.mulf %536, %527 : vector<8x32xf32>
    %550 = arith.addf %548, %549 : vector<8x32xf32>
    %551 = math.tanh %550 : vector<8x32xf32>
    %cst_290 = arith.constant 1.000000e+00 : f32
    %552 = vector.broadcast %cst_290 : f32 to vector<8x32xf32>
    %553 = arith.subf %552, %545 : vector<8x32xf32>
    %554 = arith.mulf %553, %551 : vector<8x32xf32>
    %555 = arith.mulf %545, %521 : vector<8x32xf32>
    %556 = arith.addf %554, %555 : vector<8x32xf32>
    %c4_i32_291 = arith.constant 4 : i32
    %cst_292 = arith.constant dense<0.000000e+00> : vector<8x32xf32>
    %557 = tpu.matmul %556, %398, %cst_292 {dimension_numbers = #tpu.dot_dimension_numbers<[1], [0], [0], [1], [0, 0, 1, 1], [], []>} : vector<8x32xf32>, vector<32x32xf32>, vector<8x32xf32> -> vector<8x32xf32>
    %558 = arith.addf %557, %406 : vector<8x32xf32>
    %cst_293 = arith.constant dense<0.000000e+00> : vector<8x32xf32>
    %559 = tpu.matmul %556, %400, %cst_293 {dimension_numbers = #tpu.dot_dimension_numbers<[1], [0], [0], [1], [0, 0, 1, 1], [], []>} : vector<8x32xf32>, vector<32x32xf32>, vector<8x32xf32> -> vector<8x32xf32>
    %560 = arith.addf %559, %410 : vector<8x32xf32>
    %cst_294 = arith.constant dense<0.000000e+00> : vector<8x32xf32>
    %561 = tpu.matmul %556, %402, %cst_294 {dimension_numbers = #tpu.dot_dimension_numbers<[1], [0], [0], [1], [0, 0, 1, 1], [], []>} : vector<8x32xf32>, vector<32x32xf32>, vector<8x32xf32> -> vector<8x32xf32>
    %562 = arith.addf %561, %414 : vector<8x32xf32>
    %563 = arith.index_cast %c4_i32_291 : i32 to index
    %c0_295 = arith.constant 0 : index
    %c0_296 = arith.constant 0 : index
    %564 = vector.load %arg17[%563, %c0_295, %c0_296] : memref<8x8x32xf32, #tpu.memory_space<vmem>>, vector<1x8x32xf32>
    %565 = vector.shape_cast %564 : vector<1x8x32xf32> to vector<8x32xf32>
    %566 = arith.addf %565, %558 : vector<8x32xf32>
    %567 = arith.negf %566 : vector<8x32xf32>
    %568 = math.exp %567 : vector<8x32xf32>
    %cst_297 = arith.constant 1.000000e+00 : f32
    %569 = vector.broadcast %cst_297 : f32 to vector<8x32xf32>
    %570 = arith.addf %569, %568 : vector<8x32xf32>
    %571 = arith.divf %569, %570 : vector<8x32xf32>
    %572 = arith.index_cast %c4_i32_291 : i32 to index
    %c0_298 = arith.constant 0 : index
    %c0_299 = arith.constant 0 : index
    %573 = vector.load %arg18[%572, %c0_298, %c0_299] : memref<8x8x32xf32, #tpu.memory_space<vmem>>, vector<1x8x32xf32>
    %574 = vector.shape_cast %573 : vector<1x8x32xf32> to vector<8x32xf32>
    %575 = arith.addf %574, %560 : vector<8x32xf32>
    %576 = arith.negf %575 : vector<8x32xf32>
    %577 = math.exp %576 : vector<8x32xf32>
    %cst_300 = arith.constant 1.000000e+00 : f32
    %578 = vector.broadcast %cst_300 : f32 to vector<8x32xf32>
    %579 = arith.addf %578, %577 : vector<8x32xf32>
    %580 = arith.divf %578, %579 : vector<8x32xf32>
    %581 = arith.index_cast %c4_i32_291 : i32 to index
    %c0_301 = arith.constant 0 : index
    %c0_302 = arith.constant 0 : index
    %582 = vector.load %arg19[%581, %c0_301, %c0_302] : memref<8x8x32xf32, #tpu.memory_space<vmem>>, vector<1x8x32xf32>
    %583 = vector.shape_cast %582 : vector<1x8x32xf32> to vector<8x32xf32>
    %584 = arith.mulf %571, %562 : vector<8x32xf32>
    %585 = arith.addf %583, %584 : vector<8x32xf32>
    %586 = math.tanh %585 : vector<8x32xf32>
    %cst_303 = arith.constant 1.000000e+00 : f32
    %587 = vector.broadcast %cst_303 : f32 to vector<8x32xf32>
    %588 = arith.subf %587, %580 : vector<8x32xf32>
    %589 = arith.mulf %588, %586 : vector<8x32xf32>
    %590 = arith.mulf %580, %556 : vector<8x32xf32>
    %591 = arith.addf %589, %590 : vector<8x32xf32>
    %c5_i32_304 = arith.constant 5 : i32
    %cst_305 = arith.constant dense<0.000000e+00> : vector<8x32xf32>
    %592 = tpu.matmul %591, %398, %cst_305 {dimension_numbers = #tpu.dot_dimension_numbers<[1], [0], [0], [1], [0, 0, 1, 1], [], []>} : vector<8x32xf32>, vector<32x32xf32>, vector<8x32xf32> -> vector<8x32xf32>
    %593 = arith.addf %592, %406 : vector<8x32xf32>
    %cst_306 = arith.constant dense<0.000000e+00> : vector<8x32xf32>
    %594 = tpu.matmul %591, %400, %cst_306 {dimension_numbers = #tpu.dot_dimension_numbers<[1], [0], [0], [1], [0, 0, 1, 1], [], []>} : vector<8x32xf32>, vector<32x32xf32>, vector<8x32xf32> -> vector<8x32xf32>
    %595 = arith.addf %594, %410 : vector<8x32xf32>
    %cst_307 = arith.constant dense<0.000000e+00> : vector<8x32xf32>
    %596 = tpu.matmul %591, %402, %cst_307 {dimension_numbers = #tpu.dot_dimension_numbers<[1], [0], [0], [1], [0, 0, 1, 1], [], []>} : vector<8x32xf32>, vector<32x32xf32>, vector<8x32xf32> -> vector<8x32xf32>
    %597 = arith.addf %596, %414 : vector<8x32xf32>
    %598 = arith.index_cast %c5_i32_304 : i32 to index
    %c0_308 = arith.constant 0 : index
    %c0_309 = arith.constant 0 : index
    %599 = vector.load %arg17[%598, %c0_308, %c0_309] : memref<8x8x32xf32, #tpu.memory_space<vmem>>, vector<1x8x32xf32>
    %600 = vector.shape_cast %599 : vector<1x8x32xf32> to vector<8x32xf32>
    %601 = arith.addf %600, %593 : vector<8x32xf32>
    %602 = arith.negf %601 : vector<8x32xf32>
    %603 = math.exp %602 : vector<8x32xf32>
    %cst_310 = arith.constant 1.000000e+00 : f32
    %604 = vector.broadcast %cst_310 : f32 to vector<8x32xf32>
    %605 = arith.addf %604, %603 : vector<8x32xf32>
    %606 = arith.divf %604, %605 : vector<8x32xf32>
    %607 = arith.index_cast %c5_i32_304 : i32 to index
    %c0_311 = arith.constant 0 : index
    %c0_312 = arith.constant 0 : index
    %608 = vector.load %arg18[%607, %c0_311, %c0_312] : memref<8x8x32xf32, #tpu.memory_space<vmem>>, vector<1x8x32xf32>
    %609 = vector.shape_cast %608 : vector<1x8x32xf32> to vector<8x32xf32>
    %610 = arith.addf %609, %595 : vector<8x32xf32>
    %611 = arith.negf %610 : vector<8x32xf32>
    %612 = math.exp %611 : vector<8x32xf32>
    %cst_313 = arith.constant 1.000000e+00 : f32
    %613 = vector.broadcast %cst_313 : f32 to vector<8x32xf32>
    %614 = arith.addf %613, %612 : vector<8x32xf32>
    %615 = arith.divf %613, %614 : vector<8x32xf32>
    %616 = arith.index_cast %c5_i32_304 : i32 to index
    %c0_314 = arith.constant 0 : index
    %c0_315 = arith.constant 0 : index
    %617 = vector.load %arg19[%616, %c0_314, %c0_315] : memref<8x8x32xf32, #tpu.memory_space<vmem>>, vector<1x8x32xf32>
    %618 = vector.shape_cast %617 : vector<1x8x32xf32> to vector<8x32xf32>
    %619 = arith.mulf %606, %597 : vector<8x32xf32>
    %620 = arith.addf %618, %619 : vector<8x32xf32>
    %621 = math.tanh %620 : vector<8x32xf32>
    %cst_316 = arith.constant 1.000000e+00 : f32
    %622 = vector.broadcast %cst_316 : f32 to vector<8x32xf32>
    %623 = arith.subf %622, %615 : vector<8x32xf32>
    %624 = arith.mulf %623, %621 : vector<8x32xf32>
    %625 = arith.mulf %615, %591 : vector<8x32xf32>
    %626 = arith.addf %624, %625 : vector<8x32xf32>
    %c6_i32_317 = arith.constant 6 : i32
    %cst_318 = arith.constant dense<0.000000e+00> : vector<8x32xf32>
    %627 = tpu.matmul %626, %398, %cst_318 {dimension_numbers = #tpu.dot_dimension_numbers<[1], [0], [0], [1], [0, 0, 1, 1], [], []>} : vector<8x32xf32>, vector<32x32xf32>, vector<8x32xf32> -> vector<8x32xf32>
    %628 = arith.addf %627, %406 : vector<8x32xf32>
    %cst_319 = arith.constant dense<0.000000e+00> : vector<8x32xf32>
    %629 = tpu.matmul %626, %400, %cst_319 {dimension_numbers = #tpu.dot_dimension_numbers<[1], [0], [0], [1], [0, 0, 1, 1], [], []>} : vector<8x32xf32>, vector<32x32xf32>, vector<8x32xf32> -> vector<8x32xf32>
    %630 = arith.addf %629, %410 : vector<8x32xf32>
    %cst_320 = arith.constant dense<0.000000e+00> : vector<8x32xf32>
    %631 = tpu.matmul %626, %402, %cst_320 {dimension_numbers = #tpu.dot_dimension_numbers<[1], [0], [0], [1], [0, 0, 1, 1], [], []>} : vector<8x32xf32>, vector<32x32xf32>, vector<8x32xf32> -> vector<8x32xf32>
    %632 = arith.addf %631, %414 : vector<8x32xf32>
    %633 = arith.index_cast %c6_i32_317 : i32 to index
    %c0_321 = arith.constant 0 : index
    %c0_322 = arith.constant 0 : index
    %634 = vector.load %arg17[%633, %c0_321, %c0_322] : memref<8x8x32xf32, #tpu.memory_space<vmem>>, vector<1x8x32xf32>
    %635 = vector.shape_cast %634 : vector<1x8x32xf32> to vector<8x32xf32>
    %636 = arith.addf %635, %628 : vector<8x32xf32>
    %637 = arith.negf %636 : vector<8x32xf32>
    %638 = math.exp %637 : vector<8x32xf32>
    %cst_323 = arith.constant 1.000000e+00 : f32
    %639 = vector.broadcast %cst_323 : f32 to vector<8x32xf32>
    %640 = arith.addf %639, %638 : vector<8x32xf32>
    %641 = arith.divf %639, %640 : vector<8x32xf32>
    %642 = arith.index_cast %c6_i32_317 : i32 to index
    %c0_324 = arith.constant 0 : index
    %c0_325 = arith.constant 0 : index
    %643 = vector.load %arg18[%642, %c0_324, %c0_325] : memref<8x8x32xf32, #tpu.memory_space<vmem>>, vector<1x8x32xf32>
    %644 = vector.shape_cast %643 : vector<1x8x32xf32> to vector<8x32xf32>
    %645 = arith.addf %644, %630 : vector<8x32xf32>
    %646 = arith.negf %645 : vector<8x32xf32>
    %647 = math.exp %646 : vector<8x32xf32>
    %cst_326 = arith.constant 1.000000e+00 : f32
    %648 = vector.broadcast %cst_326 : f32 to vector<8x32xf32>
    %649 = arith.addf %648, %647 : vector<8x32xf32>
    %650 = arith.divf %648, %649 : vector<8x32xf32>
    %651 = arith.index_cast %c6_i32_317 : i32 to index
    %c0_327 = arith.constant 0 : index
    %c0_328 = arith.constant 0 : index
    %652 = vector.load %arg19[%651, %c0_327, %c0_328] : memref<8x8x32xf32, #tpu.memory_space<vmem>>, vector<1x8x32xf32>
    %653 = vector.shape_cast %652 : vector<1x8x32xf32> to vector<8x32xf32>
    %654 = arith.mulf %641, %632 : vector<8x32xf32>
    %655 = arith.addf %653, %654 : vector<8x32xf32>
    %656 = math.tanh %655 : vector<8x32xf32>
    %cst_329 = arith.constant 1.000000e+00 : f32
    %657 = vector.broadcast %cst_329 : f32 to vector<8x32xf32>
    %658 = arith.subf %657, %650 : vector<8x32xf32>
    %659 = arith.mulf %658, %656 : vector<8x32xf32>
    %660 = arith.mulf %650, %626 : vector<8x32xf32>
    %661 = arith.addf %659, %660 : vector<8x32xf32>
    %c7_i32_330 = arith.constant 7 : i32
    %cst_331 = arith.constant dense<0.000000e+00> : vector<8x32xf32>
    %662 = tpu.matmul %661, %398, %cst_331 {dimension_numbers = #tpu.dot_dimension_numbers<[1], [0], [0], [1], [0, 0, 1, 1], [], []>} : vector<8x32xf32>, vector<32x32xf32>, vector<8x32xf32> -> vector<8x32xf32>
    %663 = arith.addf %662, %406 : vector<8x32xf32>
    %cst_332 = arith.constant dense<0.000000e+00> : vector<8x32xf32>
    %664 = tpu.matmul %661, %400, %cst_332 {dimension_numbers = #tpu.dot_dimension_numbers<[1], [0], [0], [1], [0, 0, 1, 1], [], []>} : vector<8x32xf32>, vector<32x32xf32>, vector<8x32xf32> -> vector<8x32xf32>
    %665 = arith.addf %664, %410 : vector<8x32xf32>
    %cst_333 = arith.constant dense<0.000000e+00> : vector<8x32xf32>
    %666 = tpu.matmul %661, %402, %cst_333 {dimension_numbers = #tpu.dot_dimension_numbers<[1], [0], [0], [1], [0, 0, 1, 1], [], []>} : vector<8x32xf32>, vector<32x32xf32>, vector<8x32xf32> -> vector<8x32xf32>
    %667 = arith.addf %666, %414 : vector<8x32xf32>
    %668 = arith.index_cast %c7_i32_330 : i32 to index
    %c0_334 = arith.constant 0 : index
    %c0_335 = arith.constant 0 : index
    %669 = vector.load %arg17[%668, %c0_334, %c0_335] : memref<8x8x32xf32, #tpu.memory_space<vmem>>, vector<1x8x32xf32>
    %670 = vector.shape_cast %669 : vector<1x8x32xf32> to vector<8x32xf32>
    %671 = arith.addf %670, %663 : vector<8x32xf32>
    %672 = arith.negf %671 : vector<8x32xf32>
    %673 = math.exp %672 : vector<8x32xf32>
    %cst_336 = arith.constant 1.000000e+00 : f32
    %674 = vector.broadcast %cst_336 : f32 to vector<8x32xf32>
    %675 = arith.addf %674, %673 : vector<8x32xf32>
    %676 = arith.divf %674, %675 : vector<8x32xf32>
    %677 = arith.index_cast %c7_i32_330 : i32 to index
    %c0_337 = arith.constant 0 : index
    %c0_338 = arith.constant 0 : index
    %678 = vector.load %arg18[%677, %c0_337, %c0_338] : memref<8x8x32xf32, #tpu.memory_space<vmem>>, vector<1x8x32xf32>
    %679 = vector.shape_cast %678 : vector<1x8x32xf32> to vector<8x32xf32>
    %680 = arith.addf %679, %665 : vector<8x32xf32>
    %681 = arith.negf %680 : vector<8x32xf32>
    %682 = math.exp %681 : vector<8x32xf32>
    %cst_339 = arith.constant 1.000000e+00 : f32
    %683 = vector.broadcast %cst_339 : f32 to vector<8x32xf32>
    %684 = arith.addf %683, %682 : vector<8x32xf32>
    %685 = arith.divf %683, %684 : vector<8x32xf32>
    %686 = arith.index_cast %c7_i32_330 : i32 to index
    %c0_340 = arith.constant 0 : index
    %c0_341 = arith.constant 0 : index
    %687 = vector.load %arg19[%686, %c0_340, %c0_341] : memref<8x8x32xf32, #tpu.memory_space<vmem>>, vector<1x8x32xf32>
    %688 = vector.shape_cast %687 : vector<1x8x32xf32> to vector<8x32xf32>
    %689 = arith.mulf %676, %667 : vector<8x32xf32>
    %690 = arith.addf %688, %689 : vector<8x32xf32>
    %691 = math.tanh %690 : vector<8x32xf32>
    %cst_342 = arith.constant 1.000000e+00 : f32
    %692 = vector.broadcast %cst_342 : f32 to vector<8x32xf32>
    %693 = arith.subf %692, %685 : vector<8x32xf32>
    %694 = arith.mulf %693, %691 : vector<8x32xf32>
    %695 = arith.mulf %685, %661 : vector<8x32xf32>
    %696 = arith.addf %694, %695 : vector<8x32xf32>
    %c8_i32_343 = arith.constant 8 : i32
    %c1_344 = arith.constant 1 : index
    %c0_345 = arith.constant 0 : index
    %c0_346 = arith.constant 0 : index
    %697 = vector.load %arg15[%c1_344, %c0_345, %c0_346] : memref<2x8x32xf32, #tpu.memory_space<vmem>>, vector<1x8x32xf32>
    %698 = vector.shape_cast %697 : vector<1x8x32xf32> to vector<8x32xf32>
    %699 = vector.shape_cast %696 : vector<8x32xf32> to vector<1x8x32xf32>
    tpu.vector_store %arg15[%c1_344, %c0_345, %c0_346], %699 {strides = array<i32>} : memref<2x8x32xf32, #tpu.memory_space<vmem>>, vector<1x8x32xf32>,
    %c0_i32_347 = arith.constant 0 : i32
    %700 = arith.cmpi eq, %arg0, %c0_i32_347 : i32
    %701 = arith.extui %700 : i1 to i32
    %c0_i32_348 = arith.constant 0 : i32
    %702 = arith.cmpi ne, %701, %c0_i32_348 : i32
    scf.if %702 {
      %c1_349 = arith.constant 1 : index
      %c0_350 = arith.constant 0 : index
      %c0_351 = arith.constant 0 : index
      %703 = vector.load %arg15[%c1_349, %c0_350, %c0_351] : memref<2x8x32xf32, #tpu.memory_space<vmem>>, vector<1x8x32xf32>
      %704 = vector.shape_cast %703 : vector<1x8x32xf32> to vector<8x32xf32>
      %c0_352 = arith.constant 0 : index
      %c0_353 = arith.constant 0 : index
      %705 = vector.load %arg2[%c0_352, %c0_353] : memref<8x8xf32, #tpu.memory_space<vmem>>, vector<8x8xf32>
      %c0_354 = arith.constant 0 : index
      %c0_355 = arith.constant 0 : index
      %706 = vector.load %arg9[%c0_354, %c0_355] : memref<8x16xf32, #tpu.memory_space<vmem>>, vector<8x16xf32>
      %cst_356 = arith.constant dense<0.000000e+00> : vector<8x16xf32>
      %707 = tpu.matmul %705, %706, %cst_356 {dimension_numbers = #tpu.dot_dimension_numbers<[1], [0], [0], [1], [0, 0, 1, 1], [], []>} : vector<8x8xf32>, vector<8x16xf32>, vector<8x16xf32> -> vector<8x16xf32>
      %c0_357 = arith.constant 0 : index
      %c0_358 = arith.constant 0 : index
      %708 = vector.load %arg10[%c0_357, %c0_358] : memref<1x16xf32, #tpu.memory_space<vmem>>, vector<1x16xf32>
      %709 = vector.broadcast %708 : vector<1x16xf32> to vector<8x16xf32>
      %710 = arith.addf %707, %709 : vector<8x16xf32>
      %c0_359 = arith.constant 0 : index
      %c0_360 = arith.constant 0 : index
      %711 = vector.load %arg11[%c0_359, %c0_360] : memref<32x4xf32, #tpu.memory_space<vmem>>, vector<32x4xf32>
      %cst_361 = arith.constant dense<0.000000e+00> : vector<8x4xf32>
      %712 = tpu.matmul %704, %711, %cst_361 {dimension_numbers = #tpu.dot_dimension_numbers<[1], [0], [0], [1], [0, 0, 1, 1], [], []>} : vector<8x32xf32>, vector<32x4xf32>, vector<8x4xf32> -> vector<8x4xf32>
      %c0_362 = arith.constant 0 : index
      %c0_363 = arith.constant 0 : index
      %713 = vector.load %arg12[%c0_362, %c0_363] : memref<16x4xf32, #tpu.memory_space<vmem>>, vector<16x4xf32>
      %cst_364 = arith.constant dense<0.000000e+00> : vector<8x4xf32>
      %714 = tpu.matmul %710, %713, %cst_364 {dimension_numbers = #tpu.dot_dimension_numbers<[1], [0], [0], [1], [0, 0, 1, 1], [], []>} : vector<8x16xf32>, vector<16x4xf32>, vector<8x4xf32> -> vector<8x4xf32>
      %715 = arith.addf %712, %714 : vector<8x4xf32>
      %c0_365 = arith.constant 0 : index
      %c0_366 = arith.constant 0 : index
      %716 = vector.load %arg13[%c0_365, %c0_366] : memref<1x4xf32, #tpu.memory_space<vmem>>, vector<1x4xf32>
      %717 = vector.broadcast %716 : vector<1x4xf32> to vector<8x4xf32>
      %718 = arith.addf %715, %717 : vector<8x4xf32>
      %c0_367 = arith.constant 0 : index
      %c0_368 = arith.constant 0 : index
      %719 = vector.load %arg14[%c0_367, %c0_368] : memref<8x4xf32, #tpu.memory_space<vmem>>, vector<8x4xf32>
      tpu.vector_store %arg14[%c0_367, %c0_368], %718 {strides = array<i32>} : memref<8x4xf32, #tpu.memory_space<vmem>>, vector<8x4xf32>,
    } else {
    }
    return
  }
  func.func @transform_0(%arg0: i32) -> (i32, i32, i32) {
    %c0_i32 = arith.constant 0 : i32
    %c0_i32_0 = arith.constant 0 : i32
    %c0_i32_1 = arith.constant 0 : i32
    return %c0_i32, %arg0, %c0_i32_0 : i32, i32, i32
  }
  func.func @transform_1(%arg0: i32) -> (i32, i32) {
    %c0_i32 = arith.constant 0 : i32
    %c0_i32_0 = arith.constant 0 : i32
    %c0_i32_1 = arith.constant 0 : i32
    return %c0_i32, %c0_i32_0 : i32, i32
  }
  func.func @transform_2(%arg0: i32) -> (i32, i32, i32) {
    %c0_i32 = arith.constant 0 : i32
    %c0_i32_0 = arith.constant 0 : i32
    %c0_i32_1 = arith.constant 0 : i32
    %c0_i32_2 = arith.constant 0 : i32
    return %c0_i32, %c0_i32_0, %c0_i32_1 : i32, i32, i32
  }
  func.func @transform_3(%arg0: i32) -> (i32, i32, i32) {
    %c0_i32 = arith.constant 0 : i32
    %c0_i32_0 = arith.constant 0 : i32
    %c0_i32_1 = arith.constant 0 : i32
    %c0_i32_2 = arith.constant 0 : i32
    return %c0_i32, %c0_i32_0, %c0_i32_1 : i32, i32, i32
  }
  func.func @transform_4(%arg0: i32) -> (i32, i32, i32, i32) {
    %c0_i32 = arith.constant 0 : i32
    %c0_i32_0 = arith.constant 0 : i32
    %c0_i32_1 = arith.constant 0 : i32
    %c0_i32_2 = arith.constant 0 : i32
    %c0_i32_3 = arith.constant 0 : i32
    return %c0_i32, %c0_i32_0, %c0_i32_1, %c0_i32_2 : i32, i32, i32, i32
  }
  func.func @transform_5(%arg0: i32) -> (i32, i32, i32, i32) {
    %c0_i32 = arith.constant 0 : i32
    %c0_i32_0 = arith.constant 0 : i32
    %c0_i32_1 = arith.constant 0 : i32
    %c0_i32_2 = arith.constant 0 : i32
    %c0_i32_3 = arith.constant 0 : i32
    return %c0_i32, %c0_i32_0, %c0_i32_1, %c0_i32_2 : i32, i32, i32, i32
  }
  func.func @transform_6(%arg0: i32) -> (i32, i32, i32, i32) {
    %c0_i32 = arith.constant 0 : i32
    %c0_i32_0 = arith.constant 0 : i32
    %c0_i32_1 = arith.constant 0 : i32
    %c0_i32_2 = arith.constant 0 : i32
    %c0_i32_3 = arith.constant 0 : i32
    return %c0_i32, %c0_i32_0, %c0_i32_1, %c0_i32_2 : i32, i32, i32, i32
  }
  func.func @transform_7(%arg0: i32) -> (i32, i32, i32, i32) {
    %c0_i32 = arith.constant 0 : i32
    %c0_i32_0 = arith.constant 0 : i32
    %c0_i32_1 = arith.constant 0 : i32
    %c0_i32_2 = arith.constant 0 : i32
    %c0_i32_3 = arith.constant 0 : i32
    return %c0_i32, %c0_i32_0, %c0_i32_1, %c0_i32_2 : i32, i32, i32, i32
  }
  func.func @transform_8(%arg0: i32) -> (i32, i32) {
    %c0_i32 = arith.constant 0 : i32
    %c0_i32_0 = arith.constant 0 : i32
    %c0_i32_1 = arith.constant 0 : i32
    return %c0_i32, %c0_i32_0 : i32, i32
  }
  func.func @transform_9(%arg0: i32) -> (i32, i32) {
    %c0_i32 = arith.constant 0 : i32
    %c0_i32_0 = arith.constant 0 : i32
    %c0_i32_1 = arith.constant 0 : i32
    return %c0_i32, %c0_i32_0 : i32, i32
  }
  func.func @transform_10(%arg0: i32) -> (i32, i32) {
    %c0_i32 = arith.constant 0 : i32
    %c0_i32_0 = arith.constant 0 : i32
    %c0_i32_1 = arith.constant 0 : i32
    return %c0_i32, %c0_i32_0 : i32, i32
  }
  func.func @transform_11(%arg0: i32) -> (i32, i32) {
    %c0_i32 = arith.constant 0 : i32
    %c0_i32_0 = arith.constant 0 : i32
    %c0_i32_1 = arith.constant 0 : i32
    return %c0_i32, %c0_i32_0 : i32, i32
  }
  func.func @transform_12(%arg0: i32) -> (i32, i32) {
    %c0_i32 = arith.constant 0 : i32
    %c0_i32_0 = arith.constant 0 : i32
    %c0_i32_1 = arith.constant 0 : i32
    return %c0_i32, %c0_i32_0 : i32, i32
  }
  func.func @transform_13(%arg0: i32) -> (i32, i32) {
    %c0_i32 = arith.constant 0 : i32
    %c0_i32_0 = arith.constant 0 : i32
    %c0_i32_1 = arith.constant 0 : i32
    return %c0_i32, %c0_i32_0 : i32, i32
  }
}

</mosaic_0001>

<bundles_post_ra>
// kernel: _fused_forward.1
= control target key start
LH: loop header
LB: loop body
LE: loop exit
PB: predicated region body
PF: predicated region fallthrough
CT: control target
= control target key end

     0   :  { %18 = vsyncpa [#allocation8], 0  ;;  %s7804_s0 = inlined_call_operand.hbm [shape: f32[8,8,16], index: 0, kind: input, shape index: {}]   ;;  %s7805_s1 = inlined_call_operand.vmem [shape: f32[8,8], index: 1, kind: input, shape index: {}]   ;;  %s7806_s2 = inlined_call_operand.vmem [shape: f32[3,16,32], index: 2, kind: input, shape index: {}]   ;;  %s7807_s3 = inlined_call_operand.hbm [shape: f32[3,1,32], index: 3, kind: input, shape index: {}]   ;;  %s7808_s4 = inlined_call_operand.hbm [shape: f32[1,3,32,32], index: 4, kind: input, shape index: {}]   ;;  %s7809_s5 = inlined_call_operand.hbm [shape: f32[1,3,1,32], index: 5, kind: input, shape index: {}]   ;;  %s7810_s6 = inlined_call_operand.hbm [shape: f32[2,3,32,32], index: 6, kind: input, shape index: {}]   ;;  %s7811_s7 = inlined_call_operand.hbm [shape: f32[2,3,1,32], index: 7, kind: input, shape index: {}]   ;;  %s7812_s8 = inlined_call_operand.vmem [shape: f32[8,16], index: 8, kind: input, shape index: {}]   ;;  %s7813_s9 = inlined_call_operand.hbm [shape: f32[1,16], index: 9, kind: input, shape index: {}]   ;;  %s7814_s10 = inlined_call_operand.vmem [shape: f32[32,4], index: 10, kind: input, shape index: {}]   ;;  %s7815_s11 = inlined_call_operand.vmem [shape: f32[16,4], index: 11, kind: input, shape index: {}]   ;;  %s7816_s12 = inlined_call_operand.vmem [shape: f32[1,4], index: 12, kind: input, shape index: {}]   ;;  %s7817_s13 = inlined_call_operand.vmem [shape: f32[8,4], index: 13, kind: output, shape index: {}]  }
   0x1   :  { %19 = vsyncpa [#allocation10], 0 }
   0x2   :  { %20 = vsyncpa [#allocation13], 0 }
   0x3   :  { %21 = vsyncpa [#allocation16], 0  ;;  %s6736_s25 = smov [#allocation9]  }
   0x4   :  { %s43_s26 = sshll.u32 %s6736_s25, 4  ;;  %s44_s26 = int_to_ptr.vmem [resolvable:$true] %s43_s26 }
   0x5   :  { %s6596_s27 = scalar_lea.vmem %s44_s26, 48  ;;  %s6600_s28 = scalar_lea.vmem %s44_s26, 64 }
   0x6   :  { %p6597_p0 = scmp.ne.s32.totalorder %s44_s26, %s6596_s27  ;;  %p6601_p1 = scmp.lt.s32.totalorder %s44_s26, %s44_s26 }
   0x7   :  { %p6602_p2 = scmp.lt.s32.totalorder %s6600_s28, %s6596_s27 }
   0x9   :  { %p6603_p3 = por %p6602_p2, %p6601_p1 }
   0xb   :  { %p6604_p4 = pnand %p6603_p3, %p6597_p0 }
   0xd   :  { %6607 = shalt.err (!%p6604_p4)
}
   0xe   :  { %s6737_s29 = smov 16   ;;  %s6738_s30 = smov 1  }
   0xf   :  { %49 = dma.hbm_to_vmem [thread:$0]  %s7807_s3, 48, %s44_s26, [#allocation10], %s6737_s29, %s6737_s29, %s6738_s30  }
  0x10   :  { %s6739_s16 = smov [#allocation12]   ;;  %s6740_s18 = smov [#allocation15]  }
  0x11   :  { %s67_s17 = sshll.u32 %s6739_s16, 4  ;;  %s91_s19 = sshll.u32 %s6740_s18, 4  ;;  %s68_s17 = int_to_ptr.vmem [resolvable:$true] %s67_s17  ;;  %s92_s19 = int_to_ptr.vmem [resolvable:$true] %s91_s19 }
  0x12   :  { %s6616_s20 = scalar_lea.vmem %s68_s17, 48  ;;  %s6620_s21 = scalar_lea.vmem %s68_s17, 64 }
  0x13   :  { %p6617_p5 = scmp.ne.s32.totalorder %s68_s17, %s6616_s20  ;;  %p6621_p6 = scmp.lt.s32.totalorder %s68_s17, %s68_s17 }
  0x14   :  { %p6622_p7 = scmp.lt.s32.totalorder %s6620_s21, %s6616_s20 }
  0x16   :  { %p6623_p8 = por %p6622_p7, %p6621_p6 }
  0x18   :  { %p6624_p9 = pnand %p6623_p8, %p6617_p5 }
  0x1a   :  { %6627 = shalt.err (!%p6624_p9)
}
  0x1b   :  { %73 = dma.hbm_to_vmem [thread:$0]  %s7809_s5, 48, %s68_s17, [#allocation13], %s6737_s29, %s6737_s29, %s6738_s30  }
  0x1c   :  { %s6636_s24 = scalar_lea.vmem %s92_s19, 96  ;;  %p6641_p11 = scmp.lt.s32.totalorder %s92_s19, %s92_s19 }
  0x1d   :  { %p6637_p10 = scmp.ne.s32.totalorder %s92_s19, %s6636_s24  ;;  %p6642_p12 = scmp.lt.s32.totalorder %s6636_s24, %s6636_s24 }
  0x1f   :  { %p6643_p13 = por %p6642_p12, %p6641_p11 }
  0x21   :  { %p6644_p0 = pnand %p6643_p13, %p6637_p10 }
  0x23   :  { %6647 = shalt.err (!%p6644_p0)
}
  0x24   :  { %97 = dma.hbm_to_vmem [thread:$0]  %s7811_s7, 96, %s92_s19, [#allocation16], %s6737_s29, %s6737_s29, %s6738_s30  }
  0x25   :  { %s6741_s26 = smov [#allocation7]  }
  0x26   :  { %s27_s27 = sshll.u32 %s6741_s26, 4  ;;  %s28_s27 = int_to_ptr.vmem [resolvable:$true] %s27_s27 }
  0x27   :  { %s6656_s28 = scalar_lea.vmem %s28_s27, 1024  ;;  %p6661_p2 = scmp.lt.s32.totalorder %s28_s27, %s28_s27 }
  0x28   :  { %p6657_p1 = scmp.ne.s32.totalorder %s28_s27, %s6656_s28  ;;  %p6662_p3 = scmp.lt.s32.totalorder %s6656_s28, %s6656_s28 }
  0x2a   :  { %p6663_p4 = por %p6662_p3, %p6661_p2 }
  0x2c   :  { %p6664_p5 = pnand %p6663_p4, %p6657_p1 }
  0x2e   :  { %6667 = shalt.err (!%p6664_p5)
}
  0x2f   :  { %s6742_s5 = smov 128   ;;  %s6743_s14 = smov 8  }
  0x30   :  { %33 = dma.hbm_to_vmem [thread:$0]  %s7804_s0, 1024, %s28_s27, [#allocation8], %s6742_s5, %s6742_s5, %s6743_s14  }
  0x31   :  { %s6744_s17 = smov [#allocation11]   ;;  %s6745_s20 = smov [#allocation14]  }
  0x32   :  { %s55_s18 = sshll.u32 %s6744_s17, 4  ;;  %s79_s7 = sshll.u32 %s6745_s20, 4  ;;  %s56_s18 = int_to_ptr.vmem [resolvable:$true] %s55_s18  ;;  %s80_s7 = int_to_ptr.vmem [resolvable:$true] %s79_s7 }
  0x33   :  { %s6676_s29 = scalar_lea.vmem %s56_s18, 1536  ;;  %p6681_p7 = scmp.lt.s32.totalorder %s56_s18, %s56_s18 }
  0x34   :  { %p6677_p6 = scmp.ne.s32.totalorder %s56_s18, %s6676_s29  ;;  %p6682_p8 = scmp.lt.s32.totalorder %s6676_s29, %s6676_s29 }
  0x36   :  { %p6683_p9 = por %p6682_p8, %p6681_p7 }
  0x38   :  { %p6684_p10 = pnand %p6683_p9, %p6677_p6 }
  0x3a   :  { %6687 = shalt.err (!%p6684_p10)
}
  0x3b   :  { %61 = dma.hbm_to_vmem [thread:$0]  %s7808_s4, 1536, %s56_s18, [#allocation10], %s6742_s5, %s6742_s5, %s6743_s14  }
  0x3c   :  { %s6696_s21 = scalar_lea.vmem %s80_s7, 3072  ;;  %p6701_p12 = scmp.lt.s32.totalorder %s80_s7, %s80_s7 }
  0x3d   :  { %p6697_p11 = scmp.ne.s32.totalorder %s80_s7, %s6696_s21  ;;  %p6702_p13 = scmp.lt.s32.totalorder %s6696_s21, %s6696_s21 }
  0x3f   :  { %p6703_p0 = por %p6702_p13, %p6701_p12 }
  0x41   :  { %p6704_p1 = pnand %p6703_p0, %p6697_p11 }
  0x43   :  { %6707 = shalt.err (!%p6704_p1)
}
  0x44   :  { %85 = dma.hbm_to_vmem [thread:$0]  %s7810_s6, 3072, %s80_s7, [#allocation13], %s6742_s5, %s6742_s5, %s6743_s14  }
  0x45   :  { %s6746_s23 = smov [#allocation17]  }
  0x46   :  { %s106_s24 = sshll.u32 %s6746_s23, 4  ;;  %s107_s24 = int_to_ptr.vmem [resolvable:$true] %s106_s24 }
  0x47   :  { %s6716_s3 = scalar_lea.vmem %s107_s24, 16  ;;  %s6720_s25 = scalar_lea.vmem %s107_s24, 32 }
  0x48   :  { %p6717_p2 = scmp.ne.s32.totalorder %s107_s24, %s6716_s3  ;;  %p6721_p3 = scmp.lt.s32.totalorder %s107_s24, %s107_s24 }
  0x49   :  { %p6722_p4 = scmp.lt.s32.totalorder %s6720_s25, %s6716_s3 }
  0x4b   :  { %p6723_p5 = por %p6722_p4, %p6721_p3 }
  0x4d   :  { %p6724_p6 = pnand %p6723_p5, %p6717_p2 }
  0x4f   :  { %6727 = shalt.err (!%p6724_p6)
}
  0x50   :  { %109 = dma.hbm_to_vmem [thread:$0]  %s7813_s9, 16, %s107_s24, [#allocation16]  }
  0x51   :  { %6728 = dma.done.wait [#allocation8], 1024  }
  0x52   :  { %6729 = vsyncadd [#allocation8], 4294966272 }
  0x53   :  { %6730 = dma.done.wait [#allocation10], 1584  }
  0x54   :  { %6731 = vsyncadd [#allocation10], 4294965712 }
  0x55   :  { %6732 = dma.done.wait [#allocation13], 3120  }
  0x56   :  { %6733 = vsyncadd [#allocation13], 4294964176 }
  0x57   :  { %6734 = dma.done.wait [#allocation16], 112  }
  0x58   :  { %6735 = vsyncadd [#allocation16], 4294967184  ;;  %v157_v0 = vlaneseq  ;;  %v6747_v1 = vmov 1983009808   ;;  %vm141_vm0 = vcmask 261120   ;;  %v6748_v3 = vmov 0.0  }
  0x59   :  { %v155_v2 = vunpack.c.l.s4 %v6747_v1  ;;  %142 = vst.msk [vmem:[#allocation2] sm:$0xff] %vm141_vm0, %v6748_v3  ;;  %143 = vst.msk [vmem:[#allocation2 + $0x8] sm:$0xff] %vm141_vm0, %v6748_v3  ;;  %v6749_v6 = vmov 1934713408   ;;  %v289_v8 = vld [vmem:[%s7806_s2 + $0x8] sm:$0xff]  ;;  %v288_v9 = vld [vmem:[%s7806_s2] sm:$0xff] }
  0x5a   :  { %v158_v5 = vshrl.u32 %v157_v0, 7  ;;  %v219_v7 = vunpack.c.l.s4 %v6749_v6  ;;  %6382 = vmatprep.subr.mxu1 %v289_v8  ;;  %5723 = vmatprep.subr.mxu0 %v289_v8  ;;  %v6401_v12 = vld [vmem:[#allocation7] ss:$16 sps:$4 sm:$0xff]   ;;  %v6403_v13 = vld [vmem:[#allocation7 + $0x4] ss:$16 sps:$4 sm:$0xff]   ;;  %v5268_v24 = vld [vmem:[%s7806_s2 + $0x18] sm:$0xff] }
  0x5b   :  { %v156_v4 = vunpack.c.0.s8 %v155_v2  ;;  %6384 = vmatpush3.msra.mxu1 %v289_v8  ;;  %5724 = vmatpush3.msra.mxu0 %v289_v8  ;;  %v6404_v14 = vld [vmem:[#allocation7 + $0x8] ss:$16 sps:$4 sm:$0xff]   ;;  %v6406_v15 = vld [vmem:[#allocation7 + $0xc] ss:$16 sps:$4 sm:$0xff]   ;;  %v6407_v16 = vld [vmem:[#allocation7 + $0x20] ss:$16 sps:$4 sm:$0xff]  }
  0x5c   :  { %v220_v11 = vunpack.c.0.s8 %v219_v7  ;;  %6383 = vmatprep.subr.mxu1 %v288_v9  ;;  %5725 = vmatprep.subr.mxu0 %v288_v9  ;;  %v6409_v18 = vld [vmem:[#allocation7 + $0x24] ss:$16 sps:$4 sm:$0xff]   ;;  %v6410_v19 = vld [vmem:[#allocation7 + $0x28] ss:$16 sps:$4 sm:$0xff]   ;;  %v6412_v20 = vld [vmem:[#allocation7 + $0x2c] ss:$16 sps:$4 sm:$0xff]  }
  0x5d   :  { %v159_v10 = vsub.s32 %v156_v4, %v158_v5  ;;  %6385 = vmatpush3.msra.mxu1 %v288_v9  ;;  %5726 = vmatpush3.msra.mxu0 %v288_v9  ;;  %v5279_v36 = vld [vmem:[%s7806_s2 + $0x28] sm:$0xff]  ;;  %vm297_vm1 = vcmask 130048   ;;  %v5267_v49 = vld [vmem:[%s7806_s2 + $0x10] sm:$0xff]  ;;  %v6882_v57 = vld [vmem:[#allocation14 + $0x8] sm:$0xff]  ;;  %vm6750_vm2 = vmmov 0   ;;  %vm5014_vm3 = vcmask 64512  }
  0x5e   :  { %v223_v23 = vsub.s32 %v220_v11, %v158_v5  ;;  %5739 = vmatprep.subr.mxu1 %v5268_v24  ;;  %5755 = vmatprep.subr.mxu0 %v5279_v36  ;;  %v6872_v53 = vld [vmem:[#allocation14 + $0x18] sm:$0xff]  ;;  %v6877_v55 = vld [vmem:[#allocation14 + $0x10] sm:$0xff]  ;;  %v5278_v58 = vld [vmem:[%s7806_s2 + $0x20] sm:$0xff]  ;;  %vm5248_vm4 = vcmask 31744  }
  0x5f   :  { %v167_v17 = vrot.slane %v6403_v13, %v159_v10  ;;  %v160_v21 = vrot.slane %v6401_v12, %v159_v10  ;;  %v183_v22 = vrot.slane %v6406_v15, %v159_v10  ;;  %v176_v25 = vrot.slane %v6404_v14, %v159_v10  ;;  %v6892_v60 = vld [vmem:[#allocation14] sm:$0xff]  ;;  %v6903_v61 = vld [vmem:[#allocation14 + $0x58] sm:$0xff]  ;;  %v6916_v63 = vld [vmem:[#allocation14 + $0x50] sm:$0xff] }
  0x60   :  { %v192_v26 = vrot.slane %v6407_v16, %v159_v10  ;;  %v199_v27 = vrot.slane %v6409_v18, %v159_v10  ;;  %v215_v28 = vrot.slane %v6412_v20, %v159_v10  ;;  %v208_v29 = vrot.slane %v6410_v19, %v159_v10  ;;  %v6913_v62 = vld [vmem:[#allocation2] sm:$0xff]  ;;  %v6918_v0 = vld [vmem:[#allocation14 + $0x38] sm:$0xff]  ;;  %v6924_v1 = vld [vmem:[#allocation14 + $0x30] sm:$0xff] }
  0x61   :  { %v233_v30 = vcombine.high %v167_v17, %v183_v22  ;;  %v216_v31 = vcombine.low %v160_v21, %v176_v25  ;;  %v217_v32 = vcombine.high %v160_v21, %v176_v25  ;;  %v232_v42 = vcombine.low %v167_v17, %v183_v22  ;;  %v6931_v2 = vld [vmem:[#allocation14 + $0x28] sm:$0xff]  ;;  %v6939_v5 = vld [vmem:[#allocation14 + $0x20] sm:$0xff]  ;;  %v5258_v7 = vld [vmem:[#allocation9] ss:$0 sm:$0xff] }
  0x62   :  { %v265_v33 = vcombine.high %v199_v27, %v215_v28  ;;  %v248_v34 = vcombine.low %v192_v26, %v208_v29  ;;  %v249_v35 = vcombine.high %v192_v26, %v208_v29  ;;  %v264_v43 = vcombine.low %v199_v27, %v215_v28  ;;  %v6934_v4 = vld [vmem:[#allocation14 + $0x48] sm:$0xff]  ;;  %v6947_v6 = vld [vmem:[#allocation14 + $0x40] sm:$0xff]  ;;  %v5269_v13 = vld [vmem:[#allocation9 + $0x1] ss:$0 sm:$0xff] }
  0x63   :  { %v247_v37 = vrot.slane %v233_v30, %v223_v23  ;;  %v224_v38 = vrot.slane %v216_v31, %v223_v23  ;;  %v231_v41 = vrot.slane %v217_v32, %v223_v23  ;;  %v240_v51 = vrot.slane %v232_v42, %v223_v23 }
  0x64   :  { %v279_v39 = vrot.slane %v265_v33, %v223_v23  ;;  %v256_v40 = vrot.slane %v248_v34, %v223_v23  ;;  %v263_v47 = vrot.slane %v249_v35, %v223_v23  ;;  %v272_v52 = vrot.slane %v264_v43, %v223_v23  ;;  %v5280_v34 = vld [vmem:[#allocation9 + $0x2] ss:$0 sm:$0xff] }
  0x66   :  { %v6858_v44 = vcombine.low %v247_v37, %v279_v39  ;;  %v6860_v45 = vcombine.high %v247_v37, %v279_v39  ;;  %v280_v46 = vcombine.low %v224_v38, %v256_v40  ;;  %v281_v48 = vcombine.high %v224_v38, %v256_v40 }
  0x67   :  { %v282_v50 = vcombine.low %v231_v41, %v263_v47  ;;  %v283_v54 = vcombine.high %v231_v41, %v263_v47  ;;  %v284_v56 = vcombine.low %v240_v51, %v272_v52  ;;  %v285_v59 = vcombine.high %v240_v51, %v272_v52 }
  0x68   :  { %5736 = vmatprep.mubr.msk.f32.mxu1 %vm297_vm1, %v6858_v44  ;;  %5727 = vmatprep.mubr.msk.f32.mxu0 %vm297_vm1, %v280_v46 }
  0x69   :  { %5737 = vmatmul.mubr.msk.f32.vlgmr.msra.gmra.mxu1 %vm297_vm1, %v6860_v45  ;;  %5728 = vmatmul.mubr.msk.f32.vlgmr.msra.gmra.mxu0 %vm297_vm1, %v281_v48 }
  0x6a   :  { %5740 = vmatpush3.msra.mxu1 %v5268_v24  ;;  %5743 = vmatprep.mubr.msk.f32.mxu1 %vm297_vm1, %v280_v46 }
  0x6b   :  { %5741 = vmatprep.subr.mxu1 %v5267_v49  ;;  %5756 = vmatpush3.msra.mxu0 %v5279_v36 }
  0x6c   :  { %5742 = vmatpush3.msra.mxu1 %v5267_v49  ;;  %5730 = vmatprep.mubr.msk.f32.mxu0 %vm297_vm1, %v282_v50 }
  0x6d   :  { %5771 = vmatprep.subr.mxu1 %v6748_v3  ;;  %5744 = vmatmul.mubr.msk.f32.vlgmr.msra.gmra.mxu1 %vm297_vm1, %v281_v48 }
  0x6e   :  { %5772 = vmatpush3.msra.mxu1 %v6872_v53  ;;  %5746 = vmatprep.mubr.msk.f32.mxu1 %vm297_vm1, %v282_v50 }
  0x6f   :  { %5773 = vmatprep.subr.mxu1 %v6748_v3  ;;  %5731 = vmatmul.mubr.msk.f32.gmra.mxu0 %vm297_vm1, %v283_v54 }
  0x70   :  { %5774 = vmatpush3.msra.mxu1 %v6877_v55  ;;  %5733 = vmatprep.mubr.msk.f32.mxu0 %vm297_vm1, %v284_v56 }
  0x71   :  { %5747 = vmatmul.mubr.msk.f32.gmra.mxu1 %vm297_vm1, %v283_v54  ;;  %5775 = vmatprep.subr.mxu1 %v6748_v3 }
  0x72   :  { %5749 = vmatprep.mubr.msk.f32.mxu1 %vm297_vm1, %v284_v56  ;;  %5776 = vmatpush3.msra.mxu1 %v6882_v57 }
  0x73   :  { %5777 = vmatprep.subr.mxu1 %v6748_v3  ;;  %5757 = vmatprep.subr.mxu0 %v5278_v58 }
  0x74   :  { %5778 = vmatpush3.msra.mxu1 %v6892_v60  ;;  %5734 = vmatmul.mubr.msk.f32.gmra.mxu0 %vm297_vm1, %v285_v59 }
  0x75   :  { %5750 = vmatmul.mubr.msk.f32.gmra.mxu1 %vm297_vm1, %v285_v59  ;;  %5782 = vmatprep.subr.mxu1 %v6748_v3 }
  0x76   :  { %5752 = vmatprep.mubr.msk.f32.mxu1 %vm297_vm1, %v6858_v44  ;;  %5758 = vmatpush3.msra.mxu0 %v5278_v58 }
  0x77   :  { %5759 = vmatprep.mubr.msk.f32.mxu0 %vm297_vm1, %v280_v46  ;;  %5793 = vmatprep.subr.mxu0 %v6748_v3 }
  0x78   :  { %5760 = vmatmul.mubr.msk.f32.vlgmr.msra.gmra.mxu0 %vm297_vm1, %v281_v48 }
  0x79   :  { %5753 = vmatmul.mubr.msk.f32.gmra.mxu1 %vm297_vm1, %v6860_v45  ;;  %5794 = vmatpush3.msra.mxu0 %v6903_v61 }
  0x7a   :  { %5779 = vmatprep.mubr.msk.f32.mxu1 %vm6750_vm2, %v6748_v3  ;;  %5762 = vmatprep.mubr.msk.f32.mxu0 %vm297_vm1, %v282_v50 }
  0x7b   :  { %5795 = vmatprep.subr.mxu0 %v6748_v3 }
  0x7c   :  { %5763 = vmatmul.mubr.msk.f32.gmra.mxu0 %vm297_vm1, %v283_v54 }
  0x7d   :  { %5780 = vmatmul.mubr.msk.f32.vlgmr.msra.gmra.mxu1 %vm141_vm0, %v6913_v62  ;;  %5796 = vmatpush3.msra.mxu0 %v6916_v63 }
  0x7e   :  { %5783 = vmatpush3.msra.mxu1 %v6918_v0  ;;  %5790 = vmatprep.mubr.msk.f32.mxu1 %vm6750_vm2, %v6748_v3 }
  0x7f   :  { %5784 = vmatprep.subr.mxu1 %v6748_v3  ;;  %5765 = vmatprep.mubr.msk.f32.mxu0 %vm297_vm1, %v284_v56 }
  0x80   :  { %5785 = vmatpush3.msra.mxu1 %v6924_v1  ;;  %5766 = vmatmul.mubr.msk.f32.gmra.mxu0 %vm297_vm1, %v285_v59 }
  0x81   :  { %5786 = vmatprep.subr.mxu1 %v6748_v3  ;;  %5797 = vmatprep.subr.mxu0 %v6748_v3 }
  0x82   :  { %5787 = vmatpush3.msra.mxu1 %v6931_v2  ;;  %5798 = vmatpush3.msra.mxu0 %v6934_v4 }
  0x83   :  { %5788 = vmatprep.subr.mxu1 %v6748_v3  ;;  %5768 = vmatprep.mubr.msk.f32.mxu0 %vm297_vm1, %v6858_v44  ;;  %v6996_v44 = vld [vmem:[#allocation15] ss:$0 sm:$0xff] }
  0x84   :  { %5789 = vmatpush3.msra.mxu1 %v6939_v5  ;;  %5769 = vmatmul.mubr.msk.f32.gmra.mxu0 %vm297_vm1, %v6860_v45 }
  0x85   :  { %5791 = vmatmul.mubr.msk.f32.vlgmr.msra.gmra.mxu1 %vm141_vm0, %v6913_v62  ;;  %5799 = vmatprep.subr.mxu0 %v6748_v3 }
  0x86   :  { %5800 = vmatpush3.msra.mxu0 %v6947_v6  ;;  %5801 = vmatprep.mubr.msk.f32.mxu0 %vm6750_vm2, %v6748_v3 }
  0x87   :  { %5804 = vmatprep.subr.mxu1 %v6748_v3  ;;  %5815 = vmatprep.subr.mxu0 %v6748_v3 }
  0x88   :  { %5802 = vmatmul.mubr.msk.f32.vlgmr.msra.gmra.mxu0 %vm141_vm0, %v6913_v62  ;;  %5805 = vmatpush3.msra.mxu1 %v6872_v53 }
  0x89   :  { %5806 = vmatprep.subr.mxu1 %v6748_v3  ;;  %5816 = vmatpush3.msra.mxu0 %v6918_v0 }
  0x8a   :  { %5807 = vmatpush3.msra.mxu1 %v6877_v55  ;;  %5817 = vmatprep.subr.mxu0 %v6748_v3 }
  0x8b   :  { %5808 = vmatprep.subr.mxu1 %v6748_v3  ;;  %5818 = vmatpush3.msra.mxu0 %v6924_v1 }
  0x8c   :  { %5809 = vmatpush3.msra.mxu1 %v6882_v57  ;;  %5819 = vmatprep.subr.mxu0 %v6748_v3 }
  0x8d   :  { %5810 = vmatprep.subr.mxu1 %v6748_v3  ;;  %5820 = vmatpush3.msra.mxu0 %v6931_v2 }
  0x8e   :  { %5811 = vmatpush3.msra.mxu1 %v6892_v60  ;;  %5821 = vmatprep.subr.mxu0 %v6748_v3 }
  0x8f   :  { %5812 = vmatprep.mubr.msk.f32.mxu1 %vm6750_vm2, %v6748_v3  ;;  %5822 = vmatpush3.msra.mxu0 %v6939_v5 }
  0x90   :  { %5823 = vmatprep.mubr.msk.f32.mxu0 %vm6750_vm2, %v6748_v3  ;;  %5826 = vmatprep.subr.mxu1 %v6748_v3 }
  0x91   :  { %5837 = vmatprep.subr.mxu0 %v6748_v3 }
 0x129   :  { %v5738_v8 = vpop.f32.mrf.mxu1  ;;  %v5729_v9 = vpop.f32.mrf.mxu0 }
 0x12a   :  { %v424_v10 = vadd.f32 %v5738_v8, %v5258_v7  ;;  %v394_v11 = vadd.f32 %v5729_v9, %v5258_v7 }
 0x12b   :  { %v418_v12 = vpop.f32.mrf.mxu1  ;;  %v388_v14 = vpop.f32.mrf.mxu0 }
 0x12c   :  { %435 = vst.msk [vmem:[#allocation4 + $0x38] sm:$0xff] %vm141_vm0, %v424_v10  ;;  %v419_v15 = vadd.f32 %v5258_v7, %v418_v12  ;;  %429 = vst.msk [vmem:[#allocation4 + $0x8] sm:$0xff] %vm141_vm0, %v394_v11  ;;  %v389_v16 = vadd.f32 %v5258_v7, %v388_v14  ;;  %v7005_v10 = vld [vmem:[#allocation15 + $0x1] ss:$0 sm:$0xff] }
 0x12d   :  { %v5745_v17 = vpop.f32.mrf.mxu1 }
 0x12e   :  { %434 = vst.msk [vmem:[#allocation4 + $0x30] sm:$0xff] %vm141_vm0, %v419_v15  ;;  %v519_v18 = vadd.f32 %v5745_v17, %v5269_v13  ;;  %428 = vst.msk [vmem:[#allocation4] sm:$0xff] %vm141_vm0, %v389_v16 }
 0x12f   :  { %v513_v19 = vpop.f32.mrf.mxu1  ;;  %v5732_v20 = vpop.f32.mrf.mxu0 }
 0x130   :  { %553 = vst.msk [vmem:[#allocation5 + $0x8] sm:$0xff] %vm141_vm0, %v519_v18  ;;  %v514_v21 = vadd.f32 %v5269_v13, %v513_v19  ;;  %v404_v22 = vadd.f32 %v5732_v20, %v5258_v7 }
 0x131   :  { %v5748_v23 = vpop.f32.mrf.mxu1  ;;  %v398_v24 = vpop.f32.mrf.mxu0 }
 0x132   :  { %552 = vst.msk [vmem:[#allocation5] sm:$0xff] %vm141_vm0, %v514_v21  ;;  %v529_v25 = vadd.f32 %v5748_v23, %v5269_v13  ;;  %431 = vst.msk [vmem:[#allocation4 + $0x18] sm:$0xff] %vm141_vm0, %v404_v22  ;;  %v399_v26 = vadd.f32 %v5258_v7, %v398_v24 }
 0x133   :  { %v523_v27 = vpop.f32.mrf.mxu1 }
 0x134   :  { %555 = vst.msk [vmem:[#allocation5 + $0x18] sm:$0xff] %vm141_vm0, %v529_v25  ;;  %v524_v28 = vadd.f32 %v5269_v13, %v523_v27  ;;  %430 = vst.msk [vmem:[#allocation4 + $0x10] sm:$0xff] %vm141_vm0, %v399_v26  ;;  %v5735_v29 = vpop.f32.mrf.mxu0  ;;  %v7012_v27 = vld [vmem:[#allocation15 + $0x2] ss:$0 sm:$0xff] }
 0x135   :  { %v5751_v30 = vpop.f32.mrf.mxu1  ;;  %v414_v31 = vadd.f32 %v5735_v29, %v5258_v7  ;;  %v935_v52 = vld [vmem:[#allocation4] sm:$0xff] }
 0x136   :  { %554 = vst.msk [vmem:[#allocation5 + $0x10] sm:$0xff] %vm141_vm0, %v524_v28  ;;  %v539_v32 = vadd.f32 %v5751_v30, %v5269_v13  ;;  %v408_v33 = vpop.f32.mrf.mxu0 }
 0x137   :  { %v533_v35 = vpop.f32.mrf.mxu1  ;;  %433 = vst.msk [vmem:[#allocation4 + $0x28] sm:$0xff] %vm141_vm0, %v414_v31  ;;  %v409_v36 = vadd.f32 %v5258_v7, %v408_v33 }
 0x138   :  { %557 = vst.msk [vmem:[#allocation5 + $0x28] sm:$0xff] %vm141_vm0, %v539_v32  ;;  %v534_v37 = vadd.f32 %v5269_v13, %v533_v35  ;;  %v5761_v38 = vpop.f32.mrf.mxu0 }
 0x139   :  { %v5754_v39 = vpop.f32.mrf.mxu1  ;;  %432 = vst.msk [vmem:[#allocation4 + $0x20] sm:$0xff] %vm141_vm0, %v409_v36  ;;  %v643_v40 = vadd.f32 %v5761_v38, %v5280_v34  ;;  %v943_v17 = vld [vmem:[#allocation5] sm:$0xff] }
 0x13a   :  { %556 = vst.msk [vmem:[#allocation5 + $0x20] sm:$0xff] %vm141_vm0, %v534_v37  ;;  %v549_v41 = vadd.f32 %v5754_v39, %v5269_v13  ;;  %v637_v42 = vpop.f32.mrf.mxu0 }
 0x13b   :  { %v543_v43 = vpop.f32.mrf.mxu1  ;;  %677 = vst.msk [vmem:[#allocation6 + $0x8] sm:$0xff] %vm141_vm0, %v643_v40  ;;  %v638_v45 = vadd.f32 %v5280_v34, %v637_v42  ;;  %v1174_v42 = vld [vmem:[#allocation4 + $0x8] sm:$0xff] }
 0x13c   :  { %559 = vst.msk [vmem:[#allocation5 + $0x38] sm:$0xff] %vm141_vm0, %v549_v41  ;;  %v544_v46 = vadd.f32 %v5269_v13, %v543_v43  ;;  %v5764_v47 = vpop.f32.mrf.mxu0 }
 0x13d   :  { %v791_v48 = vpop.f32.mrf.mxu1  ;;  %676 = vst.msk [vmem:[#allocation6] sm:$0xff] %vm141_vm0, %v638_v45  ;;  %v653_v49 = vadd.f32 %v5764_v47, %v5280_v34 }
 0x13e   :  { %558 = vst.msk [vmem:[#allocation5 + $0x30] sm:$0xff] %vm141_vm0, %v544_v46  ;;  %v792_v50 = vadd.f32 %v6996_v44, %v791_v48  ;;  %v647_v51 = vpop.f32.mrf.mxu0 }
 0x13f   :  { %v5781_v54 = vpop.f32.mrf.mxu1  ;;  %679 = vst.msk [vmem:[#allocation6 + $0x18] sm:$0xff] %vm141_vm0, %v653_v49  ;;  %v648_v56 = vadd.f32 %v5280_v34, %v647_v51  ;;  %v1183_v49 = vld [vmem:[#allocation5 + $0x8] sm:$0xff] }
 0x140   :  { %v936_v58 = vadd.f32 %v935_v52, %v792_v50  ;;  %v5767_v59 = vpop.f32.mrf.mxu0 }
 0x141   :  { %678 = vst.msk [vmem:[#allocation6 + $0x10] sm:$0xff] %vm141_vm0, %v648_v56  ;;  %v663_v7 = vadd.f32 %v5767_v59, %v5280_v34 }
 0x142   :  { %v5295_v8 = vmul.f32 -1.442695, %v936_v58  ;;  %v657_v9 = vpop.f32.mrf.mxu0 }
 0x143   :  { %681 = vst.msk [vmem:[#allocation6 + $0x28] sm:$0xff] %vm141_vm0, %v663_v7  ;;  %v658_v11 = vadd.f32 %v5280_v34, %v657_v9 }
 0x144   :  { %6413 = vpow2.f32 %v5295_v8  ;;  %v5770_v12 = vpop.f32.mrf.mxu0  ;;  %v951_v32 = vld [vmem:[#allocation6] sm:$0xff] }
 0x145   :  { %v861_v13 = vpop.f32.mrf.mxu1  ;;  %680 = vst.msk [vmem:[#allocation6 + $0x20] sm:$0xff] %vm141_vm0, %v658_v11  ;;  %v673_v14 = vadd.f32 %v5770_v12, %v5280_v34  ;;  %v1192_v12 = vld [vmem:[#allocation6 + $0x8] sm:$0xff] }
 0x146   :  { %v862_v15 = vadd.f32 %v7005_v10, %v861_v13  ;;  %v667_v16 = vpop.f32.mrf.mxu0 }
 0x147   :  { %v5792_v18 = vpop.f32.mrf.mxu1  ;;  %683 = vst.msk [vmem:[#allocation6 + $0x38] sm:$0xff] %vm141_vm0, %v673_v14  ;;  %v668_v19 = vadd.f32 %v5280_v34, %v667_v16 }
 0x148   :  { %v944_v20 = vadd.f32 %v943_v17, %v862_v15  ;;  %v931_v21 = vpop.f32.mrf.mxu0 }
 0x149   :  { %682 = vst.msk [vmem:[#allocation6 + $0x30] sm:$0xff] %vm141_vm0, %v668_v19  ;;  %v932_v29 = vadd.f32 %v7012_v27, %v931_v21 }
 0x14a   :  { %v5296_v22 = vmul.f32 -1.442695, %v944_v20  ;;  %v5803_v23 = vpop.f32.mrf.mxu0 }
 0x14b   :  { %v1416_v23 = vld [vmem:[#allocation4 + $0x10] sm:$0xff] }
 0x14c   :  { %6415 = vpow2.f32 %v5296_v22 }
 0x151   :  { %v6414_v24 = vpop.eup %6413 }
 0x152   :  { %v940_v25 = vadd.f32 1.0, %v6414_v24 }
 0x154   :  { %6417 = vrcp.f32 %v940_v25 }
 0x159   :  { %v6416_v26 = vpop.eup %6415 }
 0x15a   :  { %v948_v28 = vadd.f32 1.0, %v6416_v26 }
 0x15c   :  { %6419 = vrcp.f32 %v948_v28 }
 0x161   :  { %v6418_v30 = vpop.eup %6417 }
 0x162   :  { %v952_v31 = vmul.f32 %v6418_v30, %v932_v29  ;;  %v1425_v30 = vld [vmem:[#allocation5 + $0x10] sm:$0xff] }
 0x164   :  { %v953_v33 = vadd.f32 %v952_v31, %v951_v32 }
 0x166   :  { %6421 = vtanh.f32 %v953_v33 }
 0x169   :  { %v6420_v34 = vpop.eup %6419 }
 0x16a   :  { %v955_v35 = vsub.f32 1.0, %v6420_v34  ;;  %v957_v38 = vmul.f32 %v6420_v34, %v6913_v62 }
 0x173   :  { %v6422_v36 = vpop.eup %6421 }
 0x174   :  { %v956_v37 = vmul.f32 %v6422_v36, %v955_v35 }
 0x176   :  { %v7016_v39 = vadd.f32 %v957_v38, %v956_v37 }
 0x178   :  { %959 = vst.msk [vmem:[#allocation3] sm:$0xff] %vm141_vm0, %v7016_v39  ;;  %5813 = vmatmul.mubr.msk.f32.vlgmr.msra.gmra.mxu1 %vm141_vm0, %v7016_v39  ;;  %5824 = vmatmul.mubr.msk.f32.vlgmr.msra.gmra.mxu0 %vm141_vm0, %v7016_v39 }
 0x179   :  { %5827 = vmatpush3.msra.mxu1 %v6903_v61  ;;  %5834 = vmatprep.mubr.msk.f32.mxu1 %vm6750_vm2, %v6748_v3 }
 0x17a   :  { %5828 = vmatprep.subr.mxu1 %v6748_v3  ;;  %5838 = vmatpush3.msra.mxu0 %v6872_v53 }
 0x17b   :  { %5829 = vmatpush3.msra.mxu1 %v6916_v63  ;;  %5839 = vmatprep.subr.mxu0 %v6748_v3 }
 0x17c   :  { %5830 = vmatprep.subr.mxu1 %v6748_v3  ;;  %5840 = vmatpush3.msra.mxu0 %v6877_v55 }
 0x17d   :  { %5831 = vmatpush3.msra.mxu1 %v6934_v4  ;;  %5841 = vmatprep.subr.mxu0 %v6748_v3 }
 0x17e   :  { %5832 = vmatprep.subr.mxu1 %v6748_v3  ;;  %5842 = vmatpush3.msra.mxu0 %v6882_v57 }
 0x17f   :  { %5833 = vmatpush3.msra.mxu1 %v6947_v6  ;;  %5843 = vmatprep.subr.mxu0 %v6748_v3 }
 0x180   :  { %5835 = vmatmul.mubr.msk.f32.vlgmr.msra.gmra.mxu1 %vm141_vm0, %v7016_v39  ;;  %5848 = vmatprep.subr.mxu1 %v6748_v3 }
 0x181   :  { %5849 = vmatpush3.msra.mxu1 %v6918_v0  ;;  %5844 = vmatpush3.msra.mxu0 %v6892_v60 }
 0x182   :  { %5850 = vmatprep.subr.mxu1 %v6748_v3  ;;  %5845 = vmatprep.mubr.msk.f32.mxu0 %vm6750_vm2, %v6748_v3 }
 0x183   :  { %5851 = vmatpush3.msra.mxu1 %v6924_v1  ;;  %5856 = vmatprep.mubr.msk.f32.mxu1 %vm6750_vm2, %v6748_v3 }
 0x184   :  { %5852 = vmatprep.subr.mxu1 %v6748_v3  ;;  %5859 = vmatprep.subr.mxu0 %v6748_v3 }
 0x185   :  { %5853 = vmatpush3.msra.mxu1 %v6931_v2 }
 0x186   :  { %5854 = vmatprep.subr.mxu1 %v6748_v3 }
 0x187   :  { %5855 = vmatpush3.msra.mxu1 %v6939_v5 }
 0x188   :  { %5870 = vmatprep.subr.mxu1 %v6748_v3 }
 0x238   :  { %v1029_v62 = vpop.f32.mrf.mxu1  ;;  %v1099_v40 = vpop.f32.mrf.mxu0 }
 0x239   :  { %v1030_v41 = vadd.f32 %v6996_v44, %v1029_v62  ;;  %v1100_v48 = vadd.f32 %v7005_v10, %v1099_v40 }
 0x23a   :  { %v5814_v43 = vpop.f32.mrf.mxu1  ;;  %v5825_v45 = vpop.f32.mrf.mxu0 }
 0x23b   :  { %v1175_v46 = vadd.f32 %v1174_v42, %v1030_v41  ;;  %v1184_v51 = vadd.f32 %v1183_v49, %v1100_v48  ;;  %v1434_v41 = vld [vmem:[#allocation6 + $0x10] sm:$0xff] }
 0x23d   :  { %v5300_v47 = vmul.f32 -1.442695, %v1175_v46  ;;  %v5301_v54 = vmul.f32 -1.442695, %v1184_v51 }
 0x23f   :  { %6423 = vpow2.f32 %v5300_v47 }
 0x240   :  { %v1169_v50 = vpop.f32.mrf.mxu1  ;;  %6425 = vpow2.f32 %v5301_v54  ;;  %v1658_v54 = vld [vmem:[#allocation4 + $0x18] sm:$0xff] }
 0x241   :  { %v1170_v8 = vadd.f32 %v7012_v27, %v1169_v50 }
 0x242   :  { %v5836_v52 = vpop.f32.mrf.mxu1 }
 0x24c   :  { %v6424_v56 = vpop.eup %6423 }
 0x24d   :  { %v1179_v58 = vadd.f32 1.0, %v6424_v56  ;;  %v6426_v59 = vpop.eup %6425 }
 0x24e   :  { %v1188_v7 = vadd.f32 1.0, %v6426_v59 }
 0x24f   :  { %6427 = vrcp.f32 %v1179_v58 }
 0x250   :  { %6429 = vrcp.f32 %v1188_v7 }
 0x25c   :  { %v6428_v9 = vpop.eup %6427 }
 0x25d   :  { %v1193_v11 = vmul.f32 %v6428_v9, %v1170_v8  ;;  %v6430_v14 = vpop.eup %6429  ;;  %v1667_v9 = vld [vmem:[#allocation5 + $0x18] sm:$0xff] }
 0x25e   :  { %v1196_v15 = vsub.f32 1.0, %v6430_v14  ;;  %v1198_v18 = vmul.f32 %v6430_v14, %v7016_v39 }
 0x25f   :  { %v1194_v13 = vadd.f32 %v1193_v11, %v1192_v12 }
 0x261   :  { %6431 = vtanh.f32 %v1194_v13 }
 0x26e   :  { %v6432_v16 = vpop.eup %6431 }
 0x26f   :  { %v1197_v17 = vmul.f32 %v6432_v16, %v1196_v15 }
 0x271   :  { %v7060_v19 = vadd.f32 %v1198_v18, %v1197_v17 }
 0x273   :  { %1201 = vst.msk [vmem:[#allocation3 + $0x8] sm:$0xff] %vm141_vm0, %v7060_v19  ;;  %5846 = vmatmul.mubr.msk.f32.vlgmr.msra.gmra.mxu0 %vm141_vm0, %v7060_v19  ;;  %5857 = vmatmul.mubr.msk.f32.vlgmr.msra.gmra.mxu1 %vm141_vm0, %v7060_v19 }
 0x274   :  { %5860 = vmatpush3.msra.mxu0 %v6903_v61  ;;  %5867 = vmatprep.mubr.msk.f32.mxu0 %vm6750_vm2, %v6748_v3 }
 0x275   :  { %5861 = vmatprep.subr.mxu0 %v6748_v3  ;;  %5871 = vmatpush3.msra.mxu1 %v6872_v53 }
 0x276   :  { %5862 = vmatpush3.msra.mxu0 %v6916_v63  ;;  %5872 = vmatprep.subr.mxu1 %v6748_v3 }
 0x277   :  { %5863 = vmatprep.subr.mxu0 %v6748_v3  ;;  %5873 = vmatpush3.msra.mxu1 %v6877_v55 }
 0x278   :  { %5864 = vmatpush3.msra.mxu0 %v6934_v4  ;;  %5874 = vmatprep.subr.mxu1 %v6748_v3 }
 0x279   :  { %5865 = vmatprep.subr.mxu0 %v6748_v3  ;;  %5875 = vmatpush3.msra.mxu1 %v6882_v57 }
 0x27a   :  { %5866 = vmatpush3.msra.mxu0 %v6947_v6  ;;  %5876 = vmatprep.subr.mxu1 %v6748_v3 }
 0x27b   :  { %5868 = vmatmul.mubr.msk.f32.vlgmr.msra.gmra.mxu0 %vm141_vm0, %v7060_v19  ;;  %5881 = vmatprep.subr.mxu0 %v6748_v3 }
 0x27c   :  { %5882 = vmatpush3.msra.mxu0 %v6918_v0  ;;  %5877 = vmatpush3.msra.mxu1 %v6892_v60 }
 0x27d   :  { %5883 = vmatprep.subr.mxu0 %v6748_v3  ;;  %5878 = vmatprep.mubr.msk.f32.mxu1 %vm6750_vm2, %v6748_v3 }
 0x27e   :  { %5884 = vmatpush3.msra.mxu0 %v6924_v1  ;;  %5889 = vmatprep.mubr.msk.f32.mxu0 %vm6750_vm2, %v6748_v3 }
 0x27f   :  { %5885 = vmatprep.subr.mxu0 %v6748_v3  ;;  %5892 = vmatprep.subr.mxu1 %v6748_v3 }
 0x280   :  { %5886 = vmatpush3.msra.mxu0 %v6931_v2 }
 0x281   :  { %5887 = vmatprep.subr.mxu0 %v6748_v3 }
 0x282   :  { %5888 = vmatpush3.msra.mxu0 %v6939_v5 }
 0x283   :  { %5903 = vmatprep.subr.mxu0 %v6748_v3 }
 0x333   :  { %v1271_v20 = vpop.f32.mrf.mxu0  ;;  %v1341_v21 = vpop.f32.mrf.mxu1 }
 0x334   :  { %v1272_v22 = vadd.f32 %v6996_v44, %v1271_v20  ;;  %v1342_v29 = vadd.f32 %v7005_v10, %v1341_v21 }
 0x335   :  { %v5847_v24 = vpop.f32.mrf.mxu0  ;;  %v5858_v25 = vpop.f32.mrf.mxu1 }
 0x336   :  { %v1417_v26 = vadd.f32 %v1416_v23, %v1272_v22  ;;  %v1426_v32 = vadd.f32 %v1425_v30, %v1342_v29  ;;  %v1676_v22 = vld [vmem:[#allocation6 + $0x18] sm:$0xff] }
 0x338   :  { %v5305_v28 = vmul.f32 -1.442695, %v1417_v26  ;;  %v5306_v34 = vmul.f32 -1.442695, %v1426_v32 }
 0x33a   :  { %6433 = vpow2.f32 %v5305_v28 }
 0x33b   :  { %v1411_v31 = vpop.f32.mrf.mxu0  ;;  %6435 = vpow2.f32 %v5306_v34  ;;  %v1900_v34 = vld [vmem:[#allocation4 + $0x20] sm:$0xff] }
 0x33c   :  { %v1412_v39 = vadd.f32 %v7012_v27, %v1411_v31 }
 0x33d   :  { %v5869_v33 = vpop.f32.mrf.mxu0 }
 0x347   :  { %v6434_v35 = vpop.eup %6433 }
 0x348   :  { %v1421_v36 = vadd.f32 1.0, %v6434_v35  ;;  %v6436_v37 = vpop.eup %6435 }
 0x349   :  { %v1430_v38 = vadd.f32 1.0, %v6436_v37 }
 0x34a   :  { %6437 = vrcp.f32 %v1421_v36 }
 0x34b   :  { %6439 = vrcp.f32 %v1430_v38 }
 0x357   :  { %v6438_v62 = vpop.eup %6437 }
 0x358   :  { %v1435_v40 = vmul.f32 %v6438_v62, %v1412_v39  ;;  %v6440_v43 = vpop.eup %6439  ;;  %v1909_v62 = vld [vmem:[#allocation5 + $0x20] sm:$0xff] }
 0x359   :  { %v1438_v45 = vsub.f32 1.0, %v6440_v43  ;;  %v1440_v48 = vmul.f32 %v6440_v43, %v7060_v19 }
 0x35a   :  { %v1436_v42 = vadd.f32 %v1435_v40, %v1434_v41 }
 0x35c   :  { %6441 = vtanh.f32 %v1436_v42 }
 0x369   :  { %v6442_v46 = vpop.eup %6441 }
 0x36a   :  { %v1439_v47 = vmul.f32 %v6442_v46, %v1438_v45 }
 0x36c   :  { %v7104_v49 = vadd.f32 %v1440_v48, %v1439_v47 }
 0x36e   :  { %1443 = vst.msk [vmem:[#allocation3 + $0x10] sm:$0xff] %vm141_vm0, %v7104_v49  ;;  %5879 = vmatmul.mubr.msk.f32.vlgmr.msra.gmra.mxu1 %vm141_vm0, %v7104_v49  ;;  %5890 = vmatmul.mubr.msk.f32.vlgmr.msra.gmra.mxu0 %vm141_vm0, %v7104_v49 }
 0x36f   :  { %5893 = vmatpush3.msra.mxu1 %v6903_v61  ;;  %5900 = vmatprep.mubr.msk.f32.mxu1 %vm6750_vm2, %v6748_v3 }
 0x370   :  { %5894 = vmatprep.subr.mxu1 %v6748_v3  ;;  %5904 = vmatpush3.msra.mxu0 %v6872_v53 }
 0x371   :  { %5895 = vmatpush3.msra.mxu1 %v6916_v63  ;;  %5905 = vmatprep.subr.mxu0 %v6748_v3 }
 0x372   :  { %5896 = vmatprep.subr.mxu1 %v6748_v3  ;;  %5906 = vmatpush3.msra.mxu0 %v6877_v55 }
 0x373   :  { %5897 = vmatpush3.msra.mxu1 %v6934_v4  ;;  %5907 = vmatprep.subr.mxu0 %v6748_v3 }
 0x374   :  { %5898 = vmatprep.subr.mxu1 %v6748_v3  ;;  %5908 = vmatpush3.msra.mxu0 %v6882_v57 }
 0x375   :  { %5899 = vmatpush3.msra.mxu1 %v6947_v6  ;;  %5909 = vmatprep.subr.mxu0 %v6748_v3 }
 0x376   :  { %5901 = vmatmul.mubr.msk.f32.vlgmr.msra.gmra.mxu1 %vm141_vm0, %v7104_v49  ;;  %5914 = vmatprep.subr.mxu1 %v6748_v3 }
 0x377   :  { %5915 = vmatpush3.msra.mxu1 %v6918_v0  ;;  %5910 = vmatpush3.msra.mxu0 %v6892_v60 }
 0x378   :  { %5916 = vmatprep.subr.mxu1 %v6748_v3  ;;  %5911 = vmatprep.mubr.msk.f32.mxu0 %vm6750_vm2, %v6748_v3 }
 0x379   :  { %5917 = vmatpush3.msra.mxu1 %v6924_v1  ;;  %5922 = vmatprep.mubr.msk.f32.mxu1 %vm6750_vm2, %v6748_v3 }
 0x37a   :  { %5918 = vmatprep.subr.mxu1 %v6748_v3  ;;  %5925 = vmatprep.subr.mxu0 %v6748_v3 }
 0x37b   :  { %5919 = vmatpush3.msra.mxu1 %v6931_v2 }
 0x37c   :  { %5920 = vmatprep.subr.mxu1 %v6748_v3 }
 0x37d   :  { %5921 = vmatpush3.msra.mxu1 %v6939_v5 }
 0x37e   :  { %5936 = vmatprep.subr.mxu1 %v6748_v3 }
 0x42e   :  { %v1513_v50 = vpop.f32.mrf.mxu1  ;;  %v1583_v51 = vpop.f32.mrf.mxu0 }
 0x42f   :  { %v1514_v52 = vadd.f32 %v6996_v44, %v1513_v50  ;;  %v1584_v8 = vadd.f32 %v7005_v10, %v1583_v51 }
 0x430   :  { %v5880_v56 = vpop.f32.mrf.mxu1  ;;  %v5891_v58 = vpop.f32.mrf.mxu0 }
 0x431   :  { %v1659_v59 = vadd.f32 %v1658_v54, %v1514_v52  ;;  %v1668_v12 = vadd.f32 %v1667_v9, %v1584_v8  ;;  %v1918_v52 = vld [vmem:[#allocation6 + $0x20] sm:$0xff] }
 0x433   :  { %v5310_v7 = vmul.f32 -1.442695, %v1659_v59  ;;  %v5311_v14 = vmul.f32 -1.442695, %v1668_v12 }
 0x435   :  { %6443 = vpow2.f32 %v5310_v7 }
 0x436   :  { %v1653_v11 = vpop.f32.mrf.mxu1  ;;  %6445 = vpow2.f32 %v5311_v14 }
 0x437   :  { %v1654_v19 = vadd.f32 %v7012_v27, %v1653_v11 }
 0x438   :  { %v5902_v13 = vpop.f32.mrf.mxu1 }
 0x442   :  { %v6444_v15 = vpop.eup %6443 }
 0x443   :  { %v1663_v16 = vadd.f32 1.0, %v6444_v15  ;;  %v6446_v17 = vpop.eup %6445 }
 0x444   :  { %v1672_v18 = vadd.f32 1.0, %v6446_v17 }
 0x445   :  { %6447 = vrcp.f32 %v1663_v16  ;;  %v2151_v16 = vld [vmem:[#allocation5 + $0x28] sm:$0xff] }
 0x446   :  { %6449 = vrcp.f32 %v1672_v18 }
 0x452   :  { %v6448_v20 = vpop.eup %6447 }
 0x453   :  { %v1677_v21 = vmul.f32 %v6448_v20, %v1654_v19  ;;  %v6450_v24 = vpop.eup %6449 }
 0x454   :  { %v1680_v25 = vsub.f32 1.0, %v6450_v24  ;;  %v1682_v29 = vmul.f32 %v6450_v24, %v7104_v49 }
 0x455   :  { %v1678_v23 = vadd.f32 %v1677_v21, %v1676_v22 }
 0x457   :  { %6451 = vtanh.f32 %v1678_v23 }
 0x464   :  { %v6452_v26 = vpop.eup %6451 }
 0x465   :  { %v1681_v28 = vmul.f32 %v6452_v26, %v1680_v25 }
 0x467   :  { %v7148_v30 = vadd.f32 %v1682_v29, %v1681_v28  ;;  %v2160_v29 = vld [vmem:[#allocation6 + $0x28] sm:$0xff] }
 0x469   :  { %1685 = vst.msk [vmem:[#allocation3 + $0x18] sm:$0xff] %vm141_vm0, %v7148_v30  ;;  %5912 = vmatmul.mubr.msk.f32.vlgmr.msra.gmra.mxu0 %vm141_vm0, %v7148_v30  ;;  %5923 = vmatmul.mubr.msk.f32.vlgmr.msra.gmra.mxu1 %vm141_vm0, %v7148_v30 }
 0x46a   :  { %5926 = vmatpush3.msra.mxu0 %v6903_v61  ;;  %5933 = vmatprep.mubr.msk.f32.mxu0 %vm6750_vm2, %v6748_v3 }
 0x46b   :  { %5927 = vmatprep.subr.mxu0 %v6748_v3  ;;  %5937 = vmatpush3.msra.mxu1 %v6872_v53 }
 0x46c   :  { %5928 = vmatpush3.msra.mxu0 %v6916_v63  ;;  %5938 = vmatprep.subr.mxu1 %v6748_v3 }
 0x46d   :  { %5929 = vmatprep.subr.mxu0 %v6748_v3  ;;  %5939 = vmatpush3.msra.mxu1 %v6877_v55 }
 0x46e   :  { %5930 = vmatpush3.msra.mxu0 %v6934_v4  ;;  %5940 = vmatprep.subr.mxu1 %v6748_v3 }
 0x46f   :  { %5931 = vmatprep.subr.mxu0 %v6748_v3  ;;  %5941 = vmatpush3.msra.mxu1 %v6882_v57 }
 0x470   :  { %5932 = vmatpush3.msra.mxu0 %v6947_v6  ;;  %5942 = vmatprep.subr.mxu1 %v6748_v3 }
 0x471   :  { %5934 = vmatmul.mubr.msk.f32.vlgmr.msra.gmra.mxu0 %vm141_vm0, %v7148_v30  ;;  %5947 = vmatprep.subr.mxu0 %v6748_v3 }
 0x472   :  { %5948 = vmatpush3.msra.mxu0 %v6918_v0  ;;  %5943 = vmatpush3.msra.mxu1 %v6892_v60 }
 0x473   :  { %5949 = vmatprep.subr.mxu0 %v6748_v3  ;;  %5944 = vmatprep.mubr.msk.f32.mxu1 %vm6750_vm2, %v6748_v3 }
 0x474   :  { %5950 = vmatpush3.msra.mxu0 %v6924_v1  ;;  %5955 = vmatprep.mubr.msk.f32.mxu0 %vm6750_vm2, %v6748_v3 }
 0x475   :  { %5951 = vmatprep.subr.mxu0 %v6748_v3  ;;  %5958 = vmatprep.subr.mxu1 %v6748_v3 }
 0x476   :  { %5952 = vmatpush3.msra.mxu0 %v6931_v2 }
 0x477   :  { %5953 = vmatprep.subr.mxu0 %v6748_v3 }
 0x478   :  { %5954 = vmatpush3.msra.mxu0 %v6939_v5 }
 0x479   :  { %5969 = vmatprep.subr.mxu0 %v6748_v3 }
 0x529   :  { %v1755_v31 = vpop.f32.mrf.mxu0  ;;  %v1825_v32 = vpop.f32.mrf.mxu1 }
 0x52a   :  { %v1756_v33 = vadd.f32 %v6996_v44, %v1755_v31  ;;  %v1826_v39 = vadd.f32 %v7005_v10, %v1825_v32 }
 0x52b   :  { %v5913_v35 = vpop.f32.mrf.mxu0  ;;  %v5924_v36 = vpop.f32.mrf.mxu1 }
 0x52c   :  { %v1901_v37 = vadd.f32 %v1900_v34, %v1756_v33  ;;  %v1910_v41 = vadd.f32 %v1909_v62, %v1826_v39 }
 0x52e   :  { %v5315_v38 = vmul.f32 -1.442695, %v1901_v37  ;;  %v5316_v43 = vmul.f32 -1.442695, %v1910_v41  ;;  %v6573_v37 = vld [vmem:[#allocation14 + $0x18] sm:$0xff] }
 0x530   :  { %6453 = vpow2.f32 %v5315_v38  ;;  %v6574_v38 = vld [vmem:[#allocation14 + $0x10] sm:$0xff] }
 0x531   :  { %v1895_v40 = vpop.f32.mrf.mxu0  ;;  %6455 = vpow2.f32 %v5316_v43 }
 0x532   :  { %v1896_v49 = vadd.f32 %v7012_v27, %v1895_v40 }
 0x533   :  { %v5935_v42 = vpop.f32.mrf.mxu0 }
 0x53d   :  { %v6454_v45 = vpop.eup %6453 }
 0x53e   :  { %v1905_v46 = vadd.f32 1.0, %v6454_v45  ;;  %v6456_v47 = vpop.eup %6455  ;;  %v2393_v45 = vld [vmem:[#allocation5 + $0x30] sm:$0xff] }
 0x53f   :  { %v1914_v48 = vadd.f32 1.0, %v6456_v47 }
 0x540   :  { %6457 = vrcp.f32 %v1905_v46 }
 0x541   :  { %6459 = vrcp.f32 %v1914_v48 }
 0x54d   :  { %v6458_v50 = vpop.eup %6457 }
 0x54e   :  { %v1919_v51 = vmul.f32 %v6458_v50, %v1896_v49  ;;  %v6460_v56 = vpop.eup %6459 }
 0x54f   :  { %v1922_v58 = vsub.f32 1.0, %v6460_v56  ;;  %v1924_v8 = vmul.f32 %v6460_v56, %v7148_v30  ;;  %v2402_v56 = vld [vmem:[#allocation6 + $0x30] sm:$0xff] }
 0x550   :  { %v1920_v54 = vadd.f32 %v1919_v51, %v1918_v52 }
 0x552   :  { %6461 = vtanh.f32 %v1920_v54 }
 0x55f   :  { %v6462_v59 = vpop.eup %6461 }
 0x560   :  { %v1923_v7 = vmul.f32 %v6462_v59, %v1922_v58 }
 0x562   :  { %v7192_v9 = vadd.f32 %v1924_v8, %v1923_v7 }
 0x564   :  { %1927 = vst.msk [vmem:[#allocation3 + $0x20] sm:$0xff] %vm141_vm0, %v7192_v9  ;;  %5945 = vmatmul.mubr.msk.f32.vlgmr.msra.gmra.mxu1 %vm141_vm0, %v7192_v9  ;;  %5956 = vmatmul.mubr.msk.f32.vlgmr.msra.gmra.mxu0 %vm141_vm0, %v7192_v9 }
 0x565   :  { %5959 = vmatpush3.msra.mxu1 %v6903_v61  ;;  %5966 = vmatprep.mubr.msk.f32.mxu1 %vm6750_vm2, %v6748_v3 }
 0x566   :  { %5960 = vmatprep.subr.mxu1 %v6748_v3  ;;  %5970 = vmatpush3.msra.mxu0 %v6872_v53 }
 0x567   :  { %5961 = vmatpush3.msra.mxu1 %v6916_v63  ;;  %5971 = vmatprep.subr.mxu0 %v6748_v3 }
 0x568   :  { %5962 = vmatprep.subr.mxu1 %v6748_v3  ;;  %5972 = vmatpush3.msra.mxu0 %v6877_v55 }
 0x569   :  { %5963 = vmatpush3.msra.mxu1 %v6934_v4  ;;  %5973 = vmatprep.subr.mxu0 %v6748_v3 }
 0x56a   :  { %5964 = vmatprep.subr.mxu1 %v6748_v3  ;;  %5974 = vmatpush3.msra.mxu0 %v6882_v57 }
 0x56b   :  { %5965 = vmatpush3.msra.mxu1 %v6947_v6  ;;  %5975 = vmatprep.subr.mxu0 %v6748_v3 }
 0x56c   :  { %5967 = vmatmul.mubr.msk.f32.vlgmr.msra.gmra.mxu1 %vm141_vm0, %v7192_v9  ;;  %5980 = vmatprep.subr.mxu1 %v6748_v3 }
 0x56d   :  { %5981 = vmatpush3.msra.mxu1 %v6918_v0  ;;  %5976 = vmatpush3.msra.mxu0 %v6892_v60  ;;  %v2142_v60 = vld [vmem:[#allocation4 + $0x28] sm:$0xff] }
 0x56e   :  { %5982 = vmatprep.subr.mxu1 %v6748_v3  ;;  %5977 = vmatprep.mubr.msk.f32.mxu0 %vm6750_vm2, %v6748_v3 }
 0x56f   :  { %5983 = vmatpush3.msra.mxu1 %v6924_v1  ;;  %5988 = vmatprep.mubr.msk.f32.mxu1 %vm6750_vm2, %v6748_v3 }
 0x570   :  { %5984 = vmatprep.subr.mxu1 %v6748_v3  ;;  %5991 = vmatprep.subr.mxu0 %v6748_v3 }
 0x571   :  { %5985 = vmatpush3.msra.mxu1 %v6931_v2 }
 0x572   :  { %5986 = vmatprep.subr.mxu1 %v6748_v3 }
 0x573   :  { %5987 = vmatpush3.msra.mxu1 %v6939_v5 }
 0x574   :  { %6002 = vmatprep.subr.mxu1 %v6748_v3 }
 0x624   :  { %v1997_v53 = vpop.f32.mrf.mxu1  ;;  %v2067_v55 = vpop.f32.mrf.mxu0 }
 0x625   :  { %v1998_v57 = vadd.f32 %v6996_v44, %v1997_v53  ;;  %v2068_v15 = vadd.f32 %v7005_v10, %v2067_v55  ;;  %v2665_v55 = vld [vmem:[#allocation11 + $0x10] sm:$0xff] }
 0x626   :  { %v5946_v11 = vpop.f32.mrf.mxu1  ;;  %v5957_v12 = vpop.f32.mrf.mxu0 }
 0x627   :  { %v2143_v13 = vadd.f32 %v2142_v60, %v1998_v57  ;;  %v2152_v18 = vadd.f32 %v2151_v16, %v2068_v15  ;;  %v7284_v57 = vld [vmem:[#allocation3] sm:$0xff]  ;;  %v2664_v60 = vld [vmem:[#allocation11 + $0x8] sm:$0xff]  ;;  %v6578_v11 = vld [vmem:[#allocation14 + $0x50] sm:$0xff] }
 0x628   :  { %v2663_v12 = vld [vmem:[#allocation11] sm:$0xff]  ;;  %v2815_v15 = vld [vmem:[#allocation11 + $0x38] sm:$0xff] }
 0x629   :  { %v5320_v14 = vmul.f32 -1.442695, %v2143_v13  ;;  %v5321_v20 = vmul.f32 -1.442695, %v2152_v18  ;;  %v6579_v13 = vld [vmem:[#allocation14 + $0x48] sm:$0xff]  ;;  %v7292_v16 = vld [vmem:[#allocation3 + $0x8] sm:$0xff] }
 0x62a   :  { %v2814_v18 = vld [vmem:[#allocation11 + $0x30] sm:$0xff] }
 0x62b   :  { %6463 = vpow2.f32 %v5320_v14  ;;  %v6580_v14 = vld [vmem:[#allocation14 + $0x40] sm:$0xff] }
 0x62c   :  { %v2137_v17 = vpop.f32.mrf.mxu1  ;;  %6465 = vpow2.f32 %v5321_v20  ;;  %v7304_v20 = vld [vmem:[#allocation3 + $0x18] sm:$0xff] }
 0x62d   :  { %v2138_v25 = vadd.f32 %v7012_v27, %v2137_v17  ;;  %v7298_v17 = vld [vmem:[#allocation3 + $0x10] sm:$0xff] }
 0x62e   :  { %v5968_v19 = vpop.f32.mrf.mxu1 }
 0x62f   :  { %v2813_v19 = vld [vmem:[#allocation11 + $0x28] sm:$0xff] }
 0x638   :  { %v6464_v21 = vpop.eup %6463 }
 0x639   :  { %v2147_v22 = vadd.f32 1.0, %v6464_v21  ;;  %v6466_v23 = vpop.eup %6465  ;;  %v7308_v21 = vld [vmem:[#allocation3 + $0x20] sm:$0xff] }
 0x63a   :  { %v2156_v24 = vadd.f32 1.0, %v6466_v23 }
 0x63b   :  { %6467 = vrcp.f32 %v2147_v22  ;;  %v2812_v22 = vld [vmem:[#allocation11 + $0x20] sm:$0xff] }
 0x63c   :  { %6469 = vrcp.f32 %v2156_v24 }
 0x648   :  { %v6468_v26 = vpop.eup %6467 }
 0x649   :  { %v2161_v28 = vmul.f32 %v6468_v26, %v2138_v25  ;;  %v6470_v31 = vpop.eup %6469  ;;  %v7333_v25 = vld [vmem:[#allocation14 + $0x78] sm:$0xff]  ;;  %v7335_v26 = vld [vmem:[#allocation14 + $0x70] sm:$0xff] }
 0x64a   :  { %v2164_v32 = vsub.f32 1.0, %v6470_v31  ;;  %v2166_v35 = vmul.f32 %v6470_v31, %v7192_v9  ;;  %v2939_v31 = vld [vmem:[#allocation11 + $0x48] sm:$0xff] }
 0x64b   :  { %v2162_v30 = vadd.f32 %v2161_v28, %v2160_v29  ;;  %v2941_v28 = vld [vmem:[#allocation11 + $0x58] sm:$0xff]  ;;  %v2940_v29 = vld [vmem:[#allocation11 + $0x50] sm:$0xff] }
 0x64d   :  { %6471 = vtanh.f32 %v2162_v30  ;;  %v7339_v30 = vld [vmem:[#allocation14 + $0x68] sm:$0xff] }
 0x65a   :  { %v6472_v33 = vpop.eup %6471 }
 0x65b   :  { %v2165_v34 = vmul.f32 %v6472_v33, %v2164_v32  ;;  %v7345_v32 = vld [vmem:[#allocation14 + $0x60] sm:$0xff] }
 0x65c   :  { %v2938_v33 = vld [vmem:[#allocation11 + $0x40] sm:$0xff] }
 0x65d   :  { %v7236_v36 = vadd.f32 %v2166_v35, %v2165_v34 }
 0x65f   :  { %2169 = vst.msk [vmem:[#allocation3 + $0x28] sm:$0xff] %vm141_vm0, %v7236_v36  ;;  %5978 = vmatmul.mubr.msk.f32.vlgmr.msra.gmra.mxu0 %vm141_vm0, %v7236_v36  ;;  %5989 = vmatmul.mubr.msk.f32.vlgmr.msra.gmra.mxu1 %vm141_vm0, %v7236_v36 }
 0x660   :  { %5992 = vmatpush3.msra.mxu0 %v6903_v61  ;;  %5999 = vmatprep.mubr.msk.f32.mxu0 %vm6750_vm2, %v6748_v3  ;;  %v6575_v61 = vld [vmem:[#allocation14 + $0x8] sm:$0xff] }
 0x661   :  { %5993 = vmatprep.subr.mxu0 %v6748_v3  ;;  %6003 = vmatpush3.msra.mxu1 %v6573_v37 }
 0x662   :  { %5994 = vmatpush3.msra.mxu0 %v6916_v63  ;;  %6004 = vmatprep.subr.mxu1 %v6748_v3  ;;  %v6576_v63 = vld [vmem:[#allocation14] sm:$0xff] }
 0x663   :  { %5995 = vmatprep.subr.mxu0 %v6748_v3  ;;  %6005 = vmatpush3.msra.mxu1 %v6574_v38  ;;  %v2626_v38 = vld [vmem:[#allocation4 + $0x38] sm:$0xff] }
 0x664   :  { %5996 = vmatpush3.msra.mxu0 %v6934_v4  ;;  %6006 = vmatprep.subr.mxu1 %v6748_v3 }
 0x665   :  { %5997 = vmatprep.subr.mxu0 %v6748_v3  ;;  %6007 = vmatpush3.msra.mxu1 %v6575_v61 }
 0x666   :  { %5998 = vmatpush3.msra.mxu0 %v6947_v6  ;;  %6008 = vmatprep.subr.mxu1 %v6748_v3  ;;  %v7312_v23 = vld [vmem:[#allocation3 + $0x28] sm:$0xff] }
 0x667   :  { %6000 = vmatmul.mubr.msk.f32.vlgmr.msra.gmra.mxu0 %vm141_vm0, %v7236_v36  ;;  %6013 = vmatprep.subr.mxu0 %v6748_v3 }
 0x668   :  { %6014 = vmatpush3.msra.mxu0 %v6918_v0  ;;  %6009 = vmatpush3.msra.mxu1 %v6576_v63  ;;  %v2666_v0 = vld [vmem:[#allocation11 + $0x18] sm:$0xff] }
 0x669   :  { %6015 = vmatprep.subr.mxu0 %v6748_v3  ;;  %6010 = vmatprep.mubr.msk.f32.mxu1 %vm6750_vm2, %v6748_v3 }
 0x66a   :  { %6016 = vmatpush3.msra.mxu0 %v6924_v1  ;;  %6021 = vmatprep.mubr.msk.f32.mxu0 %vm6750_vm2, %v6748_v3  ;;  %v2384_v1 = vld [vmem:[#allocation4 + $0x30] sm:$0xff] }
 0x66b   :  { %6017 = vmatprep.subr.mxu0 %v6748_v3  ;;  %6024 = vmatprep.subr.mxu1 %v6748_v3 }
 0x66c   :  { %6018 = vmatpush3.msra.mxu0 %v6931_v2 }
 0x66d   :  { %6019 = vmatprep.subr.mxu0 %v6748_v3 }
 0x66e   :  { %6020 = vmatpush3.msra.mxu0 %v6939_v5 }
 0x66f   :  { %6035 = vmatprep.subr.mxu0 %v2666_v0 }
 0x71f   :  { %v2239_v4 = vpop.f32.mrf.mxu0  ;;  %v2309_v6 = vpop.f32.mrf.mxu1 }
 0x720   :  { %v2240_v39 = vadd.f32 %v6996_v44, %v2239_v4  ;;  %v2310_v43 = vadd.f32 %v7005_v10, %v2309_v6  ;;  %v6582_v6 = vld [vmem:[#allocation15 + $0x1] ss:$0 sm:$0xff] }
 0x721   :  { %v5979_v62 = vpop.f32.mrf.mxu0  ;;  %v5990_v40 = vpop.f32.mrf.mxu1 }
 0x722   :  { %v2385_v41 = vadd.f32 %v2384_v1, %v2240_v39  ;;  %v2394_v46 = vadd.f32 %v2393_v45, %v2310_v43  ;;  %v7350_v1 = vld [vmem:[#allocation12] ss:$0 sm:$0xff]  ;;  %v2635_v62 = vld [vmem:[#allocation5 + $0x38] sm:$0xff] }
 0x724   :  { %v5325_v42 = vmul.f32 -1.442695, %v2385_v41  ;;  %v5326_v48 = vmul.f32 -1.442695, %v2394_v46 }
 0x726   :  { %6473 = vpow2.f32 %v5325_v42 }
 0x727   :  { %v2379_v2 = vpop.f32.mrf.mxu0  ;;  %6475 = vpow2.f32 %v5326_v48 }
 0x728   :  { %v2380_v44 = vadd.f32 %v7012_v27, %v2379_v2  ;;  %v6577_v27 = vld [vmem:[#allocation14 + $0x58] sm:$0xff] }
 0x729   :  { %v6001_v47 = vpop.f32.mrf.mxu0 }
 0x733   :  { %v6474_v5 = vpop.eup %6473 }
 0x734   :  { %v2389_v49 = vadd.f32 1.0, %v6474_v5  ;;  %v6476_v50 = vpop.eup %6475 }
 0x735   :  { %v2398_v51 = vadd.f32 1.0, %v6476_v50 }
 0x736   :  { %6477 = vrcp.f32 %v2389_v49 }
 0x737   :  { %6479 = vrcp.f32 %v2398_v51  ;;  %v7359_v51 = vld [vmem:[#allocation12 + $0x1] ss:$0 sm:$0xff] }
 0x743   :  { %v6478_v52 = vpop.eup %6477 }
 0x744   :  { %v2403_v54 = vmul.f32 %v6478_v52, %v2380_v44  ;;  %v6480_v10 = vpop.eup %6479 }
 0x745   :  { %v2406_v59 = vsub.f32 1.0, %v6480_v10  ;;  %v2408_v9 = vmul.f32 %v6480_v10, %v7236_v36  ;;  %v6581_v36 = vld [vmem:[#allocation15] ss:$0 sm:$0xff] }
 0x746   :  { %v2404_v58 = vadd.f32 %v2403_v54, %v2402_v56 }
 0x748   :  { %6481 = vtanh.f32 %v2404_v58 }
 0x755   :  { %v6482_v7 = vpop.eup %6481 }
 0x756   :  { %v2407_v8 = vmul.f32 %v6482_v7, %v2406_v59 }
 0x758   :  { %v7275_v53 = vadd.f32 %v2408_v9, %v2407_v8 }
 0x75a   :  { %2411 = vst.msk [vmem:[#allocation3 + $0x30] sm:$0xff] %vm141_vm0, %v7275_v53  ;;  %6011 = vmatmul.mubr.msk.f32.vlgmr.msra.gmra.mxu1 %vm141_vm0, %v7275_v53  ;;  %6022 = vmatmul.mubr.msk.f32.vlgmr.msra.gmra.mxu0 %vm141_vm0, %v7275_v53 }
 0x75b   :  { %6025 = vmatpush3.msra.mxu1 %v6577_v27  ;;  %6036 = vmatpush3.msra.mxu0 %v2666_v0 }
 0x75c   :  { %6026 = vmatprep.subr.mxu1 %v6748_v3  ;;  %6037 = vmatprep.subr.mxu0 %v2665_v55 }
 0x75d   :  { %6043 = vmatprep.mubr.msk.f32.mxu0 %vm141_vm0, %v7284_v57  ;;  %6027 = vmatpush3.msra.mxu1 %v6578_v11 }
 0x75e   :  { %6038 = vmatpush3.msra.mxu0 %v2665_v55  ;;  %6028 = vmatprep.subr.mxu1 %v6748_v3 }
 0x75f   :  { %6039 = vmatprep.subr.mxu0 %v2664_v60  ;;  %6029 = vmatpush3.msra.mxu1 %v6579_v13 }
 0x760   :  { %6040 = vmatpush3.msra.mxu0 %v2664_v60  ;;  %6030 = vmatprep.subr.mxu1 %v6748_v3 }
 0x761   :  { %6041 = vmatprep.subr.mxu0 %v2663_v12  ;;  %6031 = vmatpush3.msra.mxu1 %v6580_v14  ;;  %v7316_v24 = vld [vmem:[#allocation3 + $0x30] sm:$0xff] }
 0x762   :  { %6032 = vmatprep.mubr.msk.f32.mxu1 %vm6750_vm2, %v6748_v3  ;;  %6042 = vmatpush3.msra.mxu0 %v2663_v12 }
 0x763   :  { %6033 = vmatmul.mubr.msk.f32.vlgmr.msra.gmra.mxu1 %vm141_vm0, %v7275_v53  ;;  %6044 = vmatmul.mubr.msk.f32.vlgmr.msra.gmra.mxu0 %vm141_vm0, %v7292_v16 }
 0x764   :  { %6055 = vmatprep.subr.mxu1 %v2815_v15  ;;  %6046 = vmatprep.mubr.msk.f32.mxu0 %vm141_vm0, %v7298_v17 }
 0x765   :  { %6056 = vmatpush3.msra.mxu1 %v2815_v15  ;;  %6063 = vmatprep.mubr.msk.f32.mxu1 %vm141_vm0, %v7284_v57 }
 0x766   :  { %6057 = vmatprep.subr.mxu1 %v2814_v18  ;;  %6075 = vmatprep.subr.mxu0 %v2941_v28 }
 0x767   :  { %6058 = vmatpush3.msra.mxu1 %v2814_v18  ;;  %6047 = vmatmul.mubr.msk.f32.gmra.mxu0 %vm141_vm0, %v7304_v20 }
 0x768   :  { %6059 = vmatprep.subr.mxu1 %v2813_v19  ;;  %6049 = vmatprep.mubr.msk.f32.mxu0 %vm141_vm0, %v7308_v21 }
 0x769   :  { %6060 = vmatpush3.msra.mxu1 %v2813_v19  ;;  %6076 = vmatpush3.msra.mxu0 %v2941_v28 }
 0x76a   :  { %6061 = vmatprep.subr.mxu1 %v2812_v22  ;;  %6077 = vmatprep.subr.mxu0 %v2940_v29 }
 0x76b   :  { %6062 = vmatpush3.msra.mxu1 %v2812_v22  ;;  %6050 = vmatmul.mubr.msk.f32.gmra.mxu0 %vm141_vm0, %v7312_v23  ;;  %v6583_v22 = vld [vmem:[#allocation15 + $0x2] ss:$0 sm:$0xff] }
 0x76c   :  { %6064 = vmatmul.mubr.msk.f32.vlgmr.msra.gmra.mxu1 %vm141_vm0, %v7292_v16  ;;  %6052 = vmatprep.mubr.msk.f32.mxu0 %vm141_vm0, %v7316_v24 }
 0x76d   :  { %6066 = vmatprep.mubr.msk.f32.mxu1 %vm141_vm0, %v7298_v17  ;;  %6095 = vmatprep.subr.mxu1 %v6748_v3 }
 0x76e   :  { %6096 = vmatpush3.msra.mxu1 %v7333_v25  ;;  %6078 = vmatpush3.msra.mxu0 %v2940_v29 }
 0x76f   :  { %6097 = vmatprep.subr.mxu1 %v6748_v3  ;;  %6079 = vmatprep.subr.mxu0 %v2939_v31 }
 0x770   :  { %6067 = vmatmul.mubr.msk.f32.gmra.mxu1 %vm141_vm0, %v7304_v20  ;;  %6080 = vmatpush3.msra.mxu0 %v2939_v31 }
 0x771   :  { %6069 = vmatprep.mubr.msk.f32.mxu1 %vm141_vm0, %v7308_v21  ;;  %6098 = vmatpush3.msra.mxu1 %v7335_v26 }
 0x772   :  { %6099 = vmatprep.subr.mxu1 %v6748_v3  ;;  %6081 = vmatprep.subr.mxu0 %v2938_v33 }
 0x773   :  { %6100 = vmatpush3.msra.mxu1 %v7339_v30  ;;  %6082 = vmatpush3.msra.mxu0 %v2938_v33  ;;  %v2644_v33 = vld [vmem:[#allocation6 + $0x38] sm:$0xff] }
 0x774   :  { %6070 = vmatmul.mubr.msk.f32.gmra.mxu1 %vm141_vm0, %v7312_v23  ;;  %6101 = vmatprep.subr.mxu1 %v6748_v3 }
 0x775   :  { %6072 = vmatprep.mubr.msk.f32.mxu1 %vm141_vm0, %v7316_v24  ;;  %6102 = vmatpush3.msra.mxu1 %v7345_v32 }
 0x776   :  { %6106 = vmatprep.subr.mxu1 %v6748_v3  ;;  %6117 = vmatprep.subr.mxu0 %v6748_v3 }
 0x81a   :  { %v2481_v34 = vpop.f32.mrf.mxu1  ;;  %v2551_v35 = vpop.f32.mrf.mxu0 }
 0x81b   :  { %v2482_v37 = vadd.f32 %v6581_v36, %v2481_v34  ;;  %v2552_v39 = vadd.f32 %v6582_v6, %v2551_v35  ;;  %v7395_v6 = vld [vmem:[#allocation14 + $0x90] sm:$0xff] }
 0x81c   :  { %v6012_v61 = vpop.f32.mrf.mxu1  ;;  %v6023_v63 = vpop.f32.mrf.mxu0 }
 0x81d   :  { %v2627_v0 = vadd.f32 %v2626_v38, %v2482_v37  ;;  %v2636_v40 = vadd.f32 %v2635_v62, %v2552_v39  ;;  %v7397_v39 = vld [vmem:[#allocation14 + $0xb8] sm:$0xff]  ;;  %v7414_v62 = vld [vmem:[#allocation14 + $0xb0] sm:$0xff] }
 0x81f   :  { %v5330_v4 = vmul.f32 -1.442695, %v2627_v0  ;;  %v5331_v47 = vmul.f32 -1.442695, %v2636_v40 }
 0x821   :  { %6483 = vpow2.f32 %v5330_v4  ;;  %v7387_v4 = vld [vmem:[#allocation2 + $0x8] sm:$0xff] }
 0x822   :  { %6485 = vpow2.f32 %v5331_v47 }
 0x823   :  { %v2621_v41 = vpop.f32.mrf.mxu1  ;;  %v6045_v42 = vpop.f32.mrf.mxu0 }
 0x824   :  { %v2770_v43 = vadd.f32 %v6045_v42, %v7350_v1  ;;  %v2622_v28 = vadd.f32 %v6583_v22, %v2621_v41 }
 0x825   :  { %v6034_v45 = vpop.f32.mrf.mxu1  ;;  %v2764_v2 = vpop.f32.mrf.mxu0 }
 0x826   :  { %2804 = vst.msk [vmem:[#allocation4 + $0x8] sm:$0xff] %vm141_vm0, %v2770_v43  ;;  %v2765_v46 = vadd.f32 %v7350_v1, %v2764_v2  ;;  %v5350_v43 = vld [vmem:[#allocation12 + $0x2] ss:$0 sm:$0xff]  ;;  %v7466_v45 = vld [vmem:[#allocation15 + $0x3] ss:$0 sm:$0xff] }
 0x827   :  { %v6048_v48 = vpop.f32.mrf.mxu0 }
 0x828   :  { %2803 = vst.msk [vmem:[#allocation4] sm:$0xff] %vm141_vm0, %v2765_v46  ;;  %v2780_v5 = vadd.f32 %v6048_v48, %v7350_v1 }
 0x829   :  { %v2774_v49 = vpop.f32.mrf.mxu0 }
 0x82a   :  { %2806 = vst.msk [vmem:[#allocation4 + $0x18] sm:$0xff] %vm141_vm0, %v2780_v5  ;;  %v2775_v50 = vadd.f32 %v7350_v1, %v2774_v49 }
 0x82b   :  { %v6051_v44 = vpop.f32.mrf.mxu0 }
 0x82c   :  { %2805 = vst.msk [vmem:[#allocation4 + $0x10] sm:$0xff] %vm141_vm0, %v2775_v50  ;;  %v2790_v52 = vadd.f32 %v6051_v44, %v7350_v1  ;;  %v6065_v54 = vpop.f32.mrf.mxu1 }
 0x82d   :  { %v2896_v56 = vadd.f32 %v6065_v54, %v7359_v51  ;;  %v2784_v58 = vpop.f32.mrf.mxu0 }
 0x82e   :  { %v6484_v10 = vpop.eup %6483  ;;  %2808 = vst.msk [vmem:[#allocation4 + $0x28] sm:$0xff] %vm141_vm0, %v2790_v52  ;;  %v2785_v59 = vadd.f32 %v7350_v1, %v2784_v58  ;;  %v2890_v7 = vpop.f32.mrf.mxu1 }
 0x82f   :  { %v2631_v8 = vadd.f32 1.0, %v6484_v10  ;;  %2930 = vst.msk [vmem:[#allocation5 + $0x8] sm:$0xff] %vm141_vm0, %v2896_v56  ;;  %v2891_v9 = vadd.f32 %v7359_v51, %v2890_v7  ;;  %v6486_v18 = vpop.eup %6485  ;;  %v3317_v50 = vld [vmem:[#allocation4] sm:$0xff] }
 0x830   :  { %2807 = vst.msk [vmem:[#allocation4 + $0x20] sm:$0xff] %vm141_vm0, %v2785_v59  ;;  %v6068_v55 = vpop.f32.mrf.mxu1  ;;  %v2640_v19 = vadd.f32 1.0, %v6486_v18  ;;  %v7477_v59 = vld [vmem:[#allocation15 + $0x4] ss:$0 sm:$0xff] }
 0x831   :  { %6487 = vrcp.f32 %v2631_v8  ;;  %2929 = vst.msk [vmem:[#allocation5] sm:$0xff] %vm141_vm0, %v2891_v9  ;;  %v2906_v27 = vadd.f32 %v6068_v55, %v7359_v51 }
 0x832   :  { %v2900_v60 = vpop.f32.mrf.mxu1  ;;  %6489 = vrcp.f32 %v2640_v19 }
 0x833   :  { %2932 = vst.msk [vmem:[#allocation5 + $0x18] sm:$0xff] %vm141_vm0, %v2906_v27  ;;  %v2901_v11 = vadd.f32 %v7359_v51, %v2900_v60 }
 0x834   :  { %v6071_v12 = vpop.f32.mrf.mxu1 }
 0x835   :  { %2931 = vst.msk [vmem:[#allocation5 + $0x10] sm:$0xff] %vm141_vm0, %v2901_v11  ;;  %v2916_v13 = vadd.f32 %v6071_v12, %v7359_v51 }
 0x836   :  { %v2910_v14 = vpop.f32.mrf.mxu1 }
 0x837   :  { %2934 = vst.msk [vmem:[#allocation5 + $0x28] sm:$0xff] %vm141_vm0, %v2916_v13  ;;  %v2911_v15 = vadd.f32 %v7359_v51, %v2910_v14 }
 0x838   :  { %v3325_v60 = vld [vmem:[#allocation5] sm:$0xff] }
 0x839   :  { %2933 = vst.msk [vmem:[#allocation5 + $0x20] sm:$0xff] %vm141_vm0, %v2911_v15 }
 0x83e   :  { %v6488_v29 = vpop.eup %6487 }
 0x83f   :  { %v2645_v31 = vmul.f32 %v6488_v29, %v2622_v28  ;;  %v6490_v35 = vpop.eup %6489 }
 0x840   :  { %v2648_v36 = vsub.f32 1.0, %v6490_v35  ;;  %v2650_v38 = vmul.f32 %v6490_v35, %v7275_v53  ;;  %v7389_v53 = vld [vmem:[#allocation14 + $0x98] sm:$0xff] }
 0x841   :  { %v2646_v34 = vadd.f32 %v2645_v31, %v2644_v33 }
 0x843   :  { %6491 = vtanh.f32 %v2646_v34 }
 0x850   :  { %v6492_v37 = vpop.eup %6491 }
 0x851   :  { %v2649_v61 = vmul.f32 %v6492_v37, %v2648_v36  ;;  %v7486_v36 = vld [vmem:[#allocation15 + $0x5] ss:$0 sm:$0xff] }
 0x853   :  { %v2651_v63 = vadd.f32 %v2650_v38, %v2649_v61 }
 0x855   :  { %2653 = vst.msk [vmem:[#allocation3 + $0x38] sm:$0xff] %vm141_vm0, %v2651_v63  ;;  %2654 = vst.msk [vmem:[#allocation2] sm:$0xff] %vm141_vm0, %v2651_v63 }
 0x85c   :  { %v2662_v0 = vld [vmem:[#allocation3 + $0x38] sm:$0xff] }
 0x85d   :  { %6053 = vmatmul.mubr.msk.f32.gmra.mxu0 %vm141_vm0, %v2662_v0  ;;  %6073 = vmatmul.mubr.msk.f32.gmra.mxu1 %vm141_vm0, %v2662_v0 }
 0x85e   :  { %6083 = vmatprep.mubr.msk.f32.mxu0 %vm141_vm0, %v7284_v57  ;;  %6103 = vmatprep.mubr.msk.f32.mxu1 %vm6750_vm2, %v6748_v3  ;;  %v7403_v57 = vld [vmem:[#allocation14 + $0x88] sm:$0xff] }
 0x861   :  { %6084 = vmatmul.mubr.msk.f32.vlgmr.msra.gmra.mxu0 %vm141_vm0, %v7292_v16  ;;  %6104 = vmatmul.mubr.msk.f32.vlgmr.msra.gmra.mxu1 %vm141_vm0, %v7387_v4  ;;  %v7412_v16 = vld [vmem:[#allocation14 + $0x80] sm:$0xff] }
 0x862   :  { %6107 = vmatpush3.msra.mxu1 %v7389_v53  ;;  %6086 = vmatprep.mubr.msk.f32.mxu0 %vm141_vm0, %v7298_v17  ;;  %v7423_v17 = vld [vmem:[#allocation14 + $0xa8] sm:$0xff] }
 0x863   :  { %6108 = vmatprep.subr.mxu1 %v6748_v3  ;;  %6114 = vmatprep.mubr.msk.f32.mxu1 %vm6750_vm2, %v6748_v3 }
 0x864   :  { %6109 = vmatpush3.msra.mxu1 %v7395_v6  ;;  %6118 = vmatpush3.msra.mxu0 %v7397_v39 }
 0x865   :  { %6110 = vmatprep.subr.mxu1 %v6748_v3  ;;  %6087 = vmatmul.mubr.msk.f32.gmra.mxu0 %vm141_vm0, %v7304_v20  ;;  %v7433_v20 = vld [vmem:[#allocation14 + $0xa0] sm:$0xff] }
 0x866   :  { %6111 = vmatpush3.msra.mxu1 %v7403_v57  ;;  %6089 = vmatprep.mubr.msk.f32.mxu0 %vm141_vm0, %v7308_v21 }
 0x867   :  { %6112 = vmatprep.subr.mxu1 %v6748_v3  ;;  %6119 = vmatprep.subr.mxu0 %v6748_v3 }
 0x868   :  { %6113 = vmatpush3.msra.mxu1 %v7412_v16  ;;  %6120 = vmatpush3.msra.mxu0 %v7414_v62 }
 0x869   :  { %6115 = vmatmul.mubr.msk.f32.vlgmr.msra.gmra.mxu1 %vm141_vm0, %v7387_v4  ;;  %6090 = vmatmul.mubr.msk.f32.gmra.mxu0 %vm141_vm0, %v7312_v23 }
 0x86a   :  { %6092 = vmatprep.mubr.msk.f32.mxu0 %vm141_vm0, %v7316_v24  ;;  %6121 = vmatprep.subr.mxu0 %v6748_v3 }
 0x86b   :  { %6122 = vmatpush3.msra.mxu0 %v7423_v17  ;;  %6128 = vmatprep.subr.mxu1 %v6748_v3 }
 0x86c   :  { %6123 = vmatprep.subr.mxu0 %v6748_v3  ;;  %6129 = vmatpush3.msra.mxu1 %v7333_v25 }
 0x86d   :  { %6093 = vmatmul.mubr.msk.f32.gmra.mxu0 %vm141_vm0, %v2662_v0  ;;  %6130 = vmatprep.subr.mxu1 %v6748_v3 }
 0x86e   :  { %6124 = vmatpush3.msra.mxu0 %v7433_v20  ;;  %6125 = vmatprep.mubr.msk.f32.mxu0 %vm6750_vm2, %v6748_v3 }
 0x86f   :  { %6139 = vmatprep.subr.mxu0 %v6748_v3  ;;  %6131 = vmatpush3.msra.mxu1 %v7335_v26 }
 0x870   :  { %6132 = vmatprep.subr.mxu1 %v6748_v3  ;;  %6136 = vmatprep.mubr.msk.f32.mxu1 %vm6750_vm2, %v6748_v3 }
 0x871   :  { %6126 = vmatmul.mubr.msk.f32.vlgmr.msra.gmra.mxu0 %vm141_vm0, %v7387_v4  ;;  %6133 = vmatpush3.msra.mxu1 %v7339_v30 }
 0x872   :  { %6140 = vmatpush3.msra.mxu0 %v7389_v53  ;;  %6134 = vmatprep.subr.mxu1 %v6748_v3 }
 0x873   :  { %6141 = vmatprep.subr.mxu0 %v6748_v3  ;;  %6135 = vmatpush3.msra.mxu1 %v7345_v32 }
 0x874   :  { %6142 = vmatpush3.msra.mxu0 %v7395_v6  ;;  %6147 = vmatprep.mubr.msk.f32.mxu0 %vm6750_vm2, %v6748_v3 }
 0x875   :  { %6143 = vmatprep.subr.mxu0 %v6748_v3  ;;  %6150 = vmatprep.subr.mxu1 %v6748_v3 }
 0x876   :  { %6144 = vmatpush3.msra.mxu0 %v7403_v57 }
 0x877   :  { %6145 = vmatprep.subr.mxu0 %v6748_v3 }
 0x878   :  { %6146 = vmatpush3.msra.mxu0 %v7412_v16 }
 0x879   :  { %6161 = vmatprep.subr.mxu0 %v6748_v3 }
 0x91d   :  { %v6054_v21 = vpop.f32.mrf.mxu0  ;;  %v6074_v23 = vpop.f32.mrf.mxu1 }
 0x91e   :  { %v2800_v24 = vadd.f32 %v6054_v21, %v7350_v1  ;;  %v2926_v40 = vadd.f32 %v6074_v23, %v7359_v51 }
 0x91f   :  { %v2794_v41 = vpop.f32.mrf.mxu0  ;;  %v2920_v42 = vpop.f32.mrf.mxu1 }
 0x920   :  { %2810 = vst.msk [vmem:[#allocation4 + $0x38] sm:$0xff] %vm141_vm0, %v2800_v24  ;;  %2936 = vst.msk [vmem:[#allocation5 + $0x38] sm:$0xff] %vm141_vm0, %v2926_v40  ;;  %v2795_v2 = vadd.f32 %v7350_v1, %v2794_v41  ;;  %v2921_v46 = vadd.f32 %v7359_v51, %v2920_v42 }
 0x921   :  { %v6085_v47 = vpop.f32.mrf.mxu0  ;;  %v3173_v48 = vpop.f32.mrf.mxu1 }
 0x922   :  { %2809 = vst.msk [vmem:[#allocation4 + $0x30] sm:$0xff] %vm141_vm0, %v2795_v2  ;;  %2935 = vst.msk [vmem:[#allocation5 + $0x30] sm:$0xff] %vm141_vm0, %v2921_v46  ;;  %v3022_v5 = vadd.f32 %v6085_v47, %v5350_v43  ;;  %v3174_v49 = vadd.f32 %v7466_v45, %v3173_v48  ;;  %v3554_v47 = vld [vmem:[#allocation4 + $0x8] sm:$0xff] }
 0x923   :  { %v3016_v44 = vpop.f32.mrf.mxu0  ;;  %v6105_v52 = vpop.f32.mrf.mxu1 }
 0x924   :  { %3056 = vst.msk [vmem:[#allocation6 + $0x8] sm:$0xff] %vm141_vm0, %v3022_v5  ;;  %v3318_v54 = vadd.f32 %v3317_v50, %v3174_v49  ;;  %v3017_v56 = vadd.f32 %v5350_v43, %v3016_v44  ;;  %v3562_v52 = vld [vmem:[#allocation5 + $0x8] sm:$0xff] }
 0x925   :  { %v6088_v58 = vpop.f32.mrf.mxu0 }
 0x926   :  { %v5365_v1 = vmul.f32 -1.442695, %v3318_v54  ;;  %3055 = vst.msk [vmem:[#allocation6] sm:$0xff] %vm141_vm0, %v3017_v56  ;;  %v3032_v51 = vadd.f32 %v6088_v58, %v5350_v43 }
 0x927   :  { %v3026_v10 = vpop.f32.mrf.mxu0 }
 0x928   :  { %6493 = vpow2.f32 %v5365_v1  ;;  %3058 = vst.msk [vmem:[#allocation6 + $0x18] sm:$0xff] %vm141_vm0, %v3032_v51  ;;  %v3027_v7 = vadd.f32 %v5350_v43, %v3026_v10 }
 0x929   :  { %v3243_v8 = vpop.f32.mrf.mxu1  ;;  %v6091_v9 = vpop.f32.mrf.mxu0 }
 0x92a   :  { %3057 = vst.msk [vmem:[#allocation6 + $0x10] sm:$0xff] %vm141_vm0, %v3027_v7  ;;  %v3244_v55 = vadd.f32 %v7477_v59, %v3243_v8  ;;  %v3042_v27 = vadd.f32 %v6091_v9, %v5350_v43 }
 0x92b   :  { %v3036_v11 = vpop.f32.mrf.mxu0  ;;  %v6116_v12 = vpop.f32.mrf.mxu1 }
 0x92c   :  { %v3326_v13 = vadd.f32 %v3325_v60, %v3244_v55  ;;  %3060 = vst.msk [vmem:[#allocation6 + $0x28] sm:$0xff] %vm141_vm0, %v3042_v27  ;;  %v3037_v14 = vadd.f32 %v5350_v43, %v3036_v11  ;;  %v3570_v60 = vld [vmem:[#allocation6 + $0x8] sm:$0xff] }
 0x92d   :  { %v6094_v15 = vpop.f32.mrf.mxu0  ;;  %v3333_v0 = vld [vmem:[#allocation6] sm:$0xff] }
 0x92e   :  { %v5366_v18 = vmul.f32 -1.442695, %v3326_v13  ;;  %3059 = vst.msk [vmem:[#allocation6 + $0x20] sm:$0xff] %vm141_vm0, %v3037_v14  ;;  %v3052_v19 = vadd.f32 %v6094_v15, %v5350_v43 }
 0x92f   :  { %v3046_v22 = vpop.f32.mrf.mxu0 }
 0x930   :  { %3062 = vst.msk [vmem:[#allocation6 + $0x38] sm:$0xff] %vm141_vm0, %v3052_v19  ;;  %v3047_v28 = vadd.f32 %v5350_v43, %v3046_v22  ;;  %6495 = vpow2.f32 %v5366_v18 }
 0x931   :  { %v3313_v29 = vpop.f32.mrf.mxu0 }
 0x932   :  { %3061 = vst.msk [vmem:[#allocation6 + $0x30] sm:$0xff] %vm141_vm0, %v3047_v28  ;;  %v3314_v38 = vadd.f32 %v7486_v36, %v3313_v29 }
 0x933   :  { %v6127_v31 = vpop.f32.mrf.mxu0 }
 0x934   :  { %v3791_v31 = vld [vmem:[#allocation4 + $0x10] sm:$0xff] }
 0x935   :  { %v6494_v33 = vpop.eup %6493 }
 0x936   :  { %v3322_v34 = vadd.f32 1.0, %v6494_v33 }
 0x938   :  { %6497 = vrcp.f32 %v3322_v34 }
 0x93d   :  { %v6496_v35 = vpop.eup %6495 }
 0x93e   :  { %v3330_v37 = vadd.f32 1.0, %v6496_v35 }
 0x940   :  { %6499 = vrcp.f32 %v3330_v37 }
 0x945   :  { %v6498_v61 = vpop.eup %6497 }
 0x946   :  { %v3334_v63 = vmul.f32 %v6498_v61, %v3314_v38  ;;  %v3799_v61 = vld [vmem:[#allocation5 + $0x10] sm:$0xff] }
 0x948   :  { %v3335_v21 = vadd.f32 %v3334_v63, %v3333_v0 }
 0x94a   :  { %6501 = vtanh.f32 %v3335_v21 }
 0x94d   :  { %v6500_v23 = vpop.eup %6499 }
 0x94e   :  { %v3337_v24 = vsub.f32 1.0, %v6500_v23  ;;  %v3339_v42 = vmul.f32 %v6500_v23, %v7387_v4 }
 0x957   :  { %v6502_v40 = vpop.eup %6501 }
 0x958   :  { %v3338_v41 = vmul.f32 %v6502_v40, %v3337_v24 }
 0x95a   :  { %v7490_v43 = vadd.f32 %v3339_v42, %v3338_v41 }
 0x95c   :  { %6137 = vmatmul.mubr.msk.f32.vlgmr.msra.gmra.mxu1 %vm141_vm0, %v7490_v43  ;;  %6148 = vmatmul.mubr.msk.f32.vlgmr.msra.gmra.mxu0 %vm141_vm0, %v7490_v43 }
 0x95d   :  { %6151 = vmatpush3.msra.mxu1 %v7397_v39  ;;  %6158 = vmatprep.mubr.msk.f32.mxu1 %vm6750_vm2, %v6748_v3 }
 0x95e   :  { %6152 = vmatprep.subr.mxu1 %v6748_v3  ;;  %6162 = vmatpush3.msra.mxu0 %v7333_v25 }
 0x95f   :  { %6153 = vmatpush3.msra.mxu1 %v7414_v62  ;;  %6163 = vmatprep.subr.mxu0 %v6748_v3 }
 0x960   :  { %6154 = vmatprep.subr.mxu1 %v6748_v3  ;;  %6164 = vmatpush3.msra.mxu0 %v7335_v26 }
 0x961   :  { %6155 = vmatpush3.msra.mxu1 %v7423_v17  ;;  %6165 = vmatprep.subr.mxu0 %v6748_v3 }
 0x962   :  { %6156 = vmatprep.subr.mxu1 %v6748_v3  ;;  %6166 = vmatpush3.msra.mxu0 %v7339_v30 }
 0x963   :  { %6157 = vmatpush3.msra.mxu1 %v7433_v20  ;;  %6167 = vmatprep.subr.mxu0 %v6748_v3 }
 0x964   :  { %6159 = vmatmul.mubr.msk.f32.vlgmr.msra.gmra.mxu1 %vm141_vm0, %v7490_v43  ;;  %6172 = vmatprep.subr.mxu1 %v6748_v3 }
 0x965   :  { %6173 = vmatpush3.msra.mxu1 %v7389_v53  ;;  %6168 = vmatpush3.msra.mxu0 %v7345_v32 }
 0x966   :  { %6174 = vmatprep.subr.mxu1 %v6748_v3  ;;  %6169 = vmatprep.mubr.msk.f32.mxu0 %vm6750_vm2, %v6748_v3 }
 0x967   :  { %6175 = vmatpush3.msra.mxu1 %v7395_v6  ;;  %6180 = vmatprep.mubr.msk.f32.mxu1 %vm6750_vm2, %v6748_v3 }
 0x968   :  { %6176 = vmatprep.subr.mxu1 %v6748_v3  ;;  %6183 = vmatprep.subr.mxu0 %v6748_v3 }
 0x969   :  { %6177 = vmatpush3.msra.mxu1 %v7403_v57 }
 0x96a   :  { %6178 = vmatprep.subr.mxu1 %v6748_v3 }
 0x96b   :  { %6179 = vmatpush3.msra.mxu1 %v7412_v16 }
 0x96c   :  { %6194 = vmatprep.subr.mxu1 %v6748_v3 }
 0xa1c   :  { %v3410_v4 = vpop.f32.mrf.mxu1  ;;  %v3480_v2 = vpop.f32.mrf.mxu0 }
 0xa1d   :  { %v3411_v46 = vadd.f32 %v7466_v45, %v3410_v4  ;;  %v3481_v44 = vadd.f32 %v7477_v59, %v3480_v2 }
 0xa1e   :  { %v6138_v48 = vpop.f32.mrf.mxu1  ;;  %v6149_v5 = vpop.f32.mrf.mxu0 }
 0xa1f   :  { %v3555_v49 = vadd.f32 %v3554_v47, %v3411_v46  ;;  %v3563_v56 = vadd.f32 %v3562_v52, %v3481_v44  ;;  %v3807_v46 = vld [vmem:[#allocation6 + $0x10] sm:$0xff] }
 0xa21   :  { %v5370_v50 = vmul.f32 -1.442695, %v3555_v49  ;;  %v5371_v1 = vmul.f32 -1.442695, %v3563_v56 }
 0xa23   :  { %6503 = vpow2.f32 %v5370_v50 }
 0xa24   :  { %v3550_v54 = vpop.f32.mrf.mxu1  ;;  %6505 = vpow2.f32 %v5371_v1  ;;  %v4028_v1 = vld [vmem:[#allocation4 + $0x18] sm:$0xff] }
 0xa25   :  { %v3551_v9 = vadd.f32 %v7486_v36, %v3550_v54 }
 0xa26   :  { %v6160_v58 = vpop.f32.mrf.mxu1 }
 0xa30   :  { %v6504_v51 = vpop.eup %6503 }
 0xa31   :  { %v3559_v10 = vadd.f32 1.0, %v6504_v51  ;;  %v6506_v7 = vpop.eup %6505 }
 0xa32   :  { %v3567_v8 = vadd.f32 1.0, %v6506_v7 }
 0xa33   :  { %6507 = vrcp.f32 %v3559_v10 }
 0xa34   :  { %6509 = vrcp.f32 %v3567_v8 }
 0xa40   :  { %v6508_v55 = vpop.eup %6507 }
 0xa41   :  { %v3571_v27 = vmul.f32 %v6508_v55, %v3551_v9  ;;  %v6510_v12 = vpop.eup %6509  ;;  %v4036_v55 = vld [vmem:[#allocation5 + $0x18] sm:$0xff] }
 0xa42   :  { %v3574_v13 = vsub.f32 1.0, %v6510_v12  ;;  %v3576_v18 = vmul.f32 %v6510_v12, %v7490_v43 }
 0xa43   :  { %v3572_v11 = vadd.f32 %v3571_v27, %v3570_v60 }
 0xa45   :  { %6511 = vtanh.f32 %v3572_v11 }
 0xa52   :  { %v6512_v14 = vpop.eup %6511 }
 0xa53   :  { %v3575_v15 = vmul.f32 %v6512_v14, %v3574_v13 }
 0xa55   :  { %v7532_v19 = vadd.f32 %v3576_v18, %v3575_v15 }
 0xa57   :  { %6170 = vmatmul.mubr.msk.f32.vlgmr.msra.gmra.mxu0 %vm141_vm0, %v7532_v19  ;;  %6181 = vmatmul.mubr.msk.f32.vlgmr.msra.gmra.mxu1 %vm141_vm0, %v7532_v19 }
 0xa58   :  { %6184 = vmatpush3.msra.mxu0 %v7397_v39  ;;  %6191 = vmatprep.mubr.msk.f32.mxu0 %vm6750_vm2, %v6748_v3 }
 0xa59   :  { %6185 = vmatprep.subr.mxu0 %v6748_v3  ;;  %6195 = vmatpush3.msra.mxu1 %v7333_v25 }
 0xa5a   :  { %6186 = vmatpush3.msra.mxu0 %v7414_v62  ;;  %6196 = vmatprep.subr.mxu1 %v6748_v3 }
 0xa5b   :  { %6187 = vmatprep.subr.mxu0 %v6748_v3  ;;  %6197 = vmatpush3.msra.mxu1 %v7335_v26 }
 0xa5c   :  { %6188 = vmatpush3.msra.mxu0 %v7423_v17  ;;  %6198 = vmatprep.subr.mxu1 %v6748_v3 }
 0xa5d   :  { %6189 = vmatprep.subr.mxu0 %v6748_v3  ;;  %6199 = vmatpush3.msra.mxu1 %v7339_v30 }
 0xa5e   :  { %6190 = vmatpush3.msra.mxu0 %v7433_v20  ;;  %6200 = vmatprep.subr.mxu1 %v6748_v3 }
 0xa5f   :  { %6192 = vmatmul.mubr.msk.f32.vlgmr.msra.gmra.mxu0 %vm141_vm0, %v7532_v19  ;;  %6205 = vmatprep.subr.mxu0 %v6748_v3 }
 0xa60   :  { %6206 = vmatpush3.msra.mxu0 %v7389_v53  ;;  %6201 = vmatpush3.msra.mxu1 %v7345_v32 }
 0xa61   :  { %6207 = vmatprep.subr.mxu0 %v6748_v3  ;;  %6202 = vmatprep.mubr.msk.f32.mxu1 %vm6750_vm2, %v6748_v3 }
 0xa62   :  { %6208 = vmatpush3.msra.mxu0 %v7395_v6  ;;  %6213 = vmatprep.mubr.msk.f32.mxu0 %vm6750_vm2, %v6748_v3 }
 0xa63   :  { %6209 = vmatprep.subr.mxu0 %v6748_v3  ;;  %6216 = vmatprep.subr.mxu1 %v6748_v3 }
 0xa64   :  { %6210 = vmatpush3.msra.mxu0 %v7403_v57 }
 0xa65   :  { %6211 = vmatprep.subr.mxu0 %v6748_v3 }
 0xa66   :  { %6212 = vmatpush3.msra.mxu0 %v7412_v16 }
 0xa67   :  { %6227 = vmatprep.subr.mxu0 %v6748_v3 }
 0xb17   :  { %v3647_v22 = vpop.f32.mrf.mxu0  ;;  %v3717_v28 = vpop.f32.mrf.mxu1 }
 0xb18   :  { %v3648_v29 = vadd.f32 %v7466_v45, %v3647_v22  ;;  %v3718_v38 = vadd.f32 %v7477_v59, %v3717_v28 }
 0xb19   :  { %v6171_v33 = vpop.f32.mrf.mxu0  ;;  %v6182_v34 = vpop.f32.mrf.mxu1 }
 0xb1a   :  { %v3792_v35 = vadd.f32 %v3791_v31, %v3648_v29  ;;  %v3800_v0 = vadd.f32 %v3799_v61, %v3718_v38  ;;  %v4044_v29 = vld [vmem:[#allocation6 + $0x18] sm:$0xff] }
 0xb1c   :  { %v5375_v37 = vmul.f32 -1.442695, %v3792_v35  ;;  %v5376_v23 = vmul.f32 -1.442695, %v3800_v0 }
 0xb1e   :  { %6513 = vpow2.f32 %v5375_v37 }
 0xb1f   :  { %v3787_v63 = vpop.f32.mrf.mxu0  ;;  %6515 = vpow2.f32 %v5376_v23  ;;  %v4265_v23 = vld [vmem:[#allocation4 + $0x20] sm:$0xff] }
 0xb20   :  { %v3788_v43 = vadd.f32 %v7486_v36, %v3787_v63 }
 0xb21   :  { %v6193_v21 = vpop.f32.mrf.mxu0 }
 0xb2b   :  { %v6514_v24 = vpop.eup %6513 }
 0xb2c   :  { %v3796_v40 = vadd.f32 1.0, %v6514_v24  ;;  %v6516_v41 = vpop.eup %6515 }
 0xb2d   :  { %v3804_v42 = vadd.f32 1.0, %v6516_v41 }
 0xb2e   :  { %6517 = vrcp.f32 %v3796_v40 }
 0xb2f   :  { %6519 = vrcp.f32 %v3804_v42 }
 0xb3b   :  { %v6518_v4 = vpop.eup %6517 }
 0xb3c   :  { %v3808_v2 = vmul.f32 %v6518_v4, %v3788_v43  ;;  %v6520_v48 = vpop.eup %6519  ;;  %v4273_v4 = vld [vmem:[#allocation5 + $0x20] sm:$0xff] }
 0xb3d   :  { %v3811_v5 = vsub.f32 1.0, %v6520_v48  ;;  %v3813_v44 = vmul.f32 %v6520_v48, %v7532_v19 }
 0xb3e   :  { %v3809_v47 = vadd.f32 %v3808_v2, %v3807_v46 }
 0xb40   :  { %6521 = vtanh.f32 %v3809_v47 }
 0xb4d   :  { %v6522_v49 = vpop.eup %6521 }
 0xb4e   :  { %v3812_v50 = vmul.f32 %v6522_v49, %v3811_v5 }
 0xb50   :  { %v7574_v52 = vadd.f32 %v3813_v44, %v3812_v50 }
 0xb52   :  { %6203 = vmatmul.mubr.msk.f32.vlgmr.msra.gmra.mxu1 %vm141_vm0, %v7574_v52  ;;  %6214 = vmatmul.mubr.msk.f32.vlgmr.msra.gmra.mxu0 %vm141_vm0, %v7574_v52 }
 0xb53   :  { %6217 = vmatpush3.msra.mxu1 %v7397_v39  ;;  %6224 = vmatprep.mubr.msk.f32.mxu1 %vm6750_vm2, %v6748_v3 }
 0xb54   :  { %6218 = vmatprep.subr.mxu1 %v6748_v3  ;;  %6228 = vmatpush3.msra.mxu0 %v7333_v25 }
 0xb55   :  { %6219 = vmatpush3.msra.mxu1 %v7414_v62  ;;  %6229 = vmatprep.subr.mxu0 %v6748_v3 }
 0xb56   :  { %6220 = vmatprep.subr.mxu1 %v6748_v3  ;;  %6230 = vmatpush3.msra.mxu0 %v7335_v26 }
 0xb57   :  { %6221 = vmatpush3.msra.mxu1 %v7423_v17  ;;  %6231 = vmatprep.subr.mxu0 %v6748_v3 }
 0xb58   :  { %6222 = vmatprep.subr.mxu1 %v6748_v3  ;;  %6232 = vmatpush3.msra.mxu0 %v7339_v30 }
 0xb59   :  { %6223 = vmatpush3.msra.mxu1 %v7433_v20  ;;  %6233 = vmatprep.subr.mxu0 %v6748_v3 }
 0xb5a   :  { %6225 = vmatmul.mubr.msk.f32.vlgmr.msra.gmra.mxu1 %vm141_vm0, %v7574_v52  ;;  %6238 = vmatprep.subr.mxu1 %v6748_v3 }
 0xb5b   :  { %6239 = vmatpush3.msra.mxu1 %v7389_v53  ;;  %6234 = vmatpush3.msra.mxu0 %v7345_v32 }
 0xb5c   :  { %6240 = vmatprep.subr.mxu1 %v6748_v3  ;;  %6235 = vmatprep.mubr.msk.f32.mxu0 %vm6750_vm2, %v6748_v3 }
 0xb5d   :  { %6241 = vmatpush3.msra.mxu1 %v7395_v6  ;;  %6246 = vmatprep.mubr.msk.f32.mxu1 %vm6750_vm2, %v6748_v3 }
 0xb5e   :  { %6242 = vmatprep.subr.mxu1 %v6748_v3  ;;  %6249 = vmatprep.subr.mxu0 %v6748_v3 }
 0xb5f   :  { %6243 = vmatpush3.msra.mxu1 %v7403_v57 }
 0xb60   :  { %6244 = vmatprep.subr.mxu1 %v6748_v3 }
 0xb61   :  { %6245 = vmatpush3.msra.mxu1 %v7412_v16 }
 0xb62   :  { %6260 = vmatprep.subr.mxu1 %v6748_v3 }
 0xc12   :  { %v3884_v54 = vpop.f32.mrf.mxu1  ;;  %v3954_v56 = vpop.f32.mrf.mxu0 }
 0xc13   :  { %v3885_v58 = vadd.f32 %v7466_v45, %v3884_v54  ;;  %v3955_v9 = vadd.f32 %v7477_v59, %v3954_v56 }
 0xc14   :  { %v6204_v51 = vpop.f32.mrf.mxu1  ;;  %v6215_v10 = vpop.f32.mrf.mxu0 }
 0xc15   :  { %v4029_v7 = vadd.f32 %v4028_v1, %v3885_v58  ;;  %v4037_v60 = vadd.f32 %v4036_v55, %v3955_v9  ;;  %v4281_v58 = vld [vmem:[#allocation6 + $0x20] sm:$0xff] }
 0xc17   :  { %v5380_v8 = vmul.f32 -1.442695, %v4029_v7  ;;  %v5381_v12 = vmul.f32 -1.442695, %v4037_v60 }
 0xc19   :  { %6523 = vpow2.f32 %v5380_v8 }
 0xc1a   :  { %v4024_v27 = vpop.f32.mrf.mxu1  ;;  %6525 = vpow2.f32 %v5381_v12 }
 0xc1b   :  { %v4025_v19 = vadd.f32 %v7486_v36, %v4024_v27 }
 0xc1c   :  { %v6226_v11 = vpop.f32.mrf.mxu1 }
 0xc26   :  { %v6524_v13 = vpop.eup %6523 }
 0xc27   :  { %v4033_v14 = vadd.f32 1.0, %v6524_v13  ;;  %v6526_v15 = vpop.eup %6525 }
 0xc28   :  { %v4041_v18 = vadd.f32 1.0, %v6526_v15 }
 0xc29   :  { %6527 = vrcp.f32 %v4033_v14  ;;  %v4510_v14 = vld [vmem:[#allocation5 + $0x28] sm:$0xff] }
 0xc2a   :  { %6529 = vrcp.f32 %v4041_v18 }
 0xc36   :  { %v6528_v22 = vpop.eup %6527 }
 0xc37   :  { %v4045_v28 = vmul.f32 %v6528_v22, %v4025_v19  ;;  %v6530_v33 = vpop.eup %6529 }
 0xc38   :  { %v4048_v34 = vsub.f32 1.0, %v6530_v33  ;;  %v4050_v38 = vmul.f32 %v6530_v33, %v7574_v52 }
 0xc39   :  { %v4046_v31 = vadd.f32 %v4045_v28, %v4044_v29 }
 0xc3b   :  { %6531 = vtanh.f32 %v4046_v31 }
 0xc48   :  { %v6532_v35 = vpop.eup %6531 }
 0xc49   :  { %v4049_v37 = vmul.f32 %v6532_v35, %v4048_v34 }
 0xc4b   :  { %v7616_v61 = vadd.f32 %v4050_v38, %v4049_v37  ;;  %v4518_v38 = vld [vmem:[#allocation6 + $0x28] sm:$0xff] }
 0xc4d   :  { %6236 = vmatmul.mubr.msk.f32.vlgmr.msra.gmra.mxu0 %vm141_vm0, %v7616_v61  ;;  %6247 = vmatmul.mubr.msk.f32.vlgmr.msra.gmra.mxu1 %vm141_vm0, %v7616_v61 }
 0xc4e   :  { %6250 = vmatpush3.msra.mxu0 %v7397_v39  ;;  %6257 = vmatprep.mubr.msk.f32.mxu0 %vm6750_vm2, %v6748_v3 }
 0xc4f   :  { %6251 = vmatprep.subr.mxu0 %v6748_v3  ;;  %6261 = vmatpush3.msra.mxu1 %v7333_v25 }
 0xc50   :  { %6252 = vmatpush3.msra.mxu0 %v7414_v62  ;;  %6262 = vmatprep.subr.mxu1 %v6748_v3 }
 0xc51   :  { %6253 = vmatprep.subr.mxu0 %v6748_v3  ;;  %6263 = vmatpush3.msra.mxu1 %v7335_v26 }
 0xc52   :  { %6254 = vmatpush3.msra.mxu0 %v7423_v17  ;;  %6264 = vmatprep.subr.mxu1 %v6748_v3 }
 0xc53   :  { %6255 = vmatprep.subr.mxu0 %v6748_v3  ;;  %6265 = vmatpush3.msra.mxu1 %v7339_v30 }
 0xc54   :  { %6256 = vmatpush3.msra.mxu0 %v7433_v20  ;;  %6266 = vmatprep.subr.mxu1 %v6748_v3 }
 0xc55   :  { %6258 = vmatmul.mubr.msk.f32.vlgmr.msra.gmra.mxu0 %vm141_vm0, %v7616_v61  ;;  %6271 = vmatprep.subr.mxu0 %v6748_v3 }
 0xc56   :  { %6272 = vmatpush3.msra.mxu0 %v7389_v53  ;;  %6267 = vmatpush3.msra.mxu1 %v7345_v32 }
 0xc57   :  { %6273 = vmatprep.subr.mxu0 %v6748_v3  ;;  %6268 = vmatprep.mubr.msk.f32.mxu1 %vm6750_vm2, %v6748_v3 }
 0xc58   :  { %6274 = vmatpush3.msra.mxu0 %v7395_v6  ;;  %6279 = vmatprep.mubr.msk.f32.mxu0 %vm6750_vm2, %v6748_v3 }
 0xc59   :  { %6275 = vmatprep.subr.mxu0 %v6748_v3  ;;  %6282 = vmatprep.subr.mxu1 %v6748_v3 }
 0xc5a   :  { %6276 = vmatpush3.msra.mxu0 %v7403_v57 }
 0xc5b   :  { %6277 = vmatprep.subr.mxu0 %v6748_v3 }
 0xc5c   :  { %6278 = vmatpush3.msra.mxu0 %v7412_v16 }
 0xc5d   :  { %6293 = vmatprep.subr.mxu0 %v6748_v3 }
 0xd0d   :  { %v4121_v63 = vpop.f32.mrf.mxu0  ;;  %v4191_v0 = vpop.f32.mrf.mxu1 }
 0xd0e   :  { %v4122_v21 = vadd.f32 %v7466_v45, %v4121_v63  ;;  %v4192_v43 = vadd.f32 %v7477_v59, %v4191_v0 }
 0xd0f   :  { %v6237_v24 = vpop.f32.mrf.mxu0  ;;  %v6248_v40 = vpop.f32.mrf.mxu1 }
 0xd10   :  { %v4266_v41 = vadd.f32 %v4265_v23, %v4122_v21  ;;  %v4274_v46 = vadd.f32 %v4273_v4, %v4192_v43  ;;  %v6586_v43 = vld [vmem:[#allocation14 + $0x68] sm:$0xff]  ;;  %v6587_v4 = vld [vmem:[#allocation14 + $0x60] sm:$0xff] }
 0xd12   :  { %v5385_v42 = vmul.f32 -1.442695, %v4266_v41  ;;  %v5386_v48 = vmul.f32 -1.442695, %v4274_v46  ;;  %v6584_v41 = vld [vmem:[#allocation14 + $0x78] sm:$0xff] }
 0xd14   :  { %6533 = vpow2.f32 %v5385_v42  ;;  %v6585_v42 = vld [vmem:[#allocation14 + $0x70] sm:$0xff] }
 0xd15   :  { %v4261_v2 = vpop.f32.mrf.mxu0  ;;  %6535 = vpow2.f32 %v5386_v48 }
 0xd16   :  { %v4262_v52 = vadd.f32 %v7486_v36, %v4261_v2 }
 0xd17   :  { %v6259_v47 = vpop.f32.mrf.mxu0 }
 0xd21   :  { %v6534_v5 = vpop.eup %6533 }
 0xd22   :  { %v4270_v49 = vadd.f32 1.0, %v6534_v5  ;;  %v6536_v50 = vpop.eup %6535 }
 0xd23   :  { %v4278_v44 = vadd.f32 1.0, %v6536_v50 }
 0xd24   :  { %6537 = vrcp.f32 %v4270_v49 }
 0xd25   :  { %6539 = vrcp.f32 %v4278_v44  ;;  %v4747_v44 = vld [vmem:[#allocation5 + $0x30] sm:$0xff] }
 0xd31   :  { %v6538_v54 = vpop.eup %6537 }
 0xd32   :  { %v4282_v56 = vmul.f32 %v6538_v54, %v4262_v52  ;;  %v6540_v51 = vpop.eup %6539 }
 0xd33   :  { %v4285_v10 = vsub.f32 1.0, %v6540_v51  ;;  %v4287_v9 = vmul.f32 %v6540_v51, %v7616_v61 }
 0xd34   :  { %v4283_v1 = vadd.f32 %v4282_v56, %v4281_v58 }
 0xd36   :  { %6541 = vtanh.f32 %v4283_v1 }
 0xd43   :  { %v6542_v7 = vpop.eup %6541 }
 0xd44   :  { %v4286_v8 = vmul.f32 %v6542_v7, %v4285_v10 }
 0xd46   :  { %v7658_v55 = vadd.f32 %v4287_v9, %v4286_v8  ;;  %v4755_v9 = vld [vmem:[#allocation6 + $0x30] sm:$0xff] }
 0xd48   :  { %6269 = vmatmul.mubr.msk.f32.vlgmr.msra.gmra.mxu1 %vm141_vm0, %v7658_v55  ;;  %6280 = vmatmul.mubr.msk.f32.vlgmr.msra.gmra.mxu0 %vm141_vm0, %v7658_v55 }
 0xd49   :  { %6283 = vmatpush3.msra.mxu1 %v7397_v39  ;;  %6290 = vmatprep.mubr.msk.f32.mxu1 %vm6750_vm2, %v6748_v3 }
 0xd4a   :  { %6284 = vmatprep.subr.mxu1 %v6748_v3  ;;  %6294 = vmatpush3.msra.mxu0 %v7333_v25 }
 0xd4b   :  { %6285 = vmatpush3.msra.mxu1 %v7414_v62  ;;  %6295 = vmatprep.subr.mxu0 %v6748_v3 }
 0xd4c   :  { %6286 = vmatprep.subr.mxu1 %v6748_v3  ;;  %6296 = vmatpush3.msra.mxu0 %v7335_v26 }
 0xd4d   :  { %6287 = vmatpush3.msra.mxu1 %v7423_v17  ;;  %6297 = vmatprep.subr.mxu0 %v6748_v3 }
 0xd4e   :  { %6288 = vmatprep.subr.mxu1 %v6748_v3  ;;  %6298 = vmatpush3.msra.mxu0 %v7339_v30 }
 0xd4f   :  { %6289 = vmatpush3.msra.mxu1 %v7433_v20  ;;  %6299 = vmatprep.subr.mxu0 %v6748_v3 }
 0xd50   :  { %6291 = vmatmul.mubr.msk.f32.vlgmr.msra.gmra.mxu1 %vm141_vm0, %v7658_v55  ;;  %6304 = vmatprep.subr.mxu1 %v6748_v3 }
 0xd51   :  { %6305 = vmatpush3.msra.mxu1 %v7389_v53  ;;  %6300 = vmatpush3.msra.mxu0 %v7345_v32  ;;  %v4502_v32 = vld [vmem:[#allocation4 + $0x28] sm:$0xff] }
 0xd52   :  { %6306 = vmatprep.subr.mxu1 %v6748_v3  ;;  %6301 = vmatprep.mubr.msk.f32.mxu0 %vm6750_vm2, %v6748_v3 }
 0xd53   :  { %6307 = vmatpush3.msra.mxu1 %v7395_v6  ;;  %6312 = vmatprep.mubr.msk.f32.mxu1 %vm6750_vm2, %v6748_v3 }
 0xd54   :  { %6308 = vmatprep.subr.mxu1 %v6748_v3  ;;  %6315 = vmatprep.subr.mxu0 %v6748_v3 }
 0xd55   :  { %6309 = vmatpush3.msra.mxu1 %v7403_v57 }
 0xd56   :  { %6310 = vmatprep.subr.mxu1 %v6748_v3 }
 0xd57   :  { %6311 = vmatpush3.msra.mxu1 %v7412_v16 }
 0xd58   :  { %6326 = vmatprep.subr.mxu1 %v6748_v3 }
 0xe08   :  { %v4358_v25 = vpop.f32.mrf.mxu1  ;;  %v4428_v26 = vpop.f32.mrf.mxu0 }
 0xe09   :  { %v4359_v30 = vadd.f32 %v7466_v45, %v4358_v25  ;;  %v4429_v13 = vadd.f32 %v7477_v59, %v4428_v26 }
 0xe0a   :  { %v6270_v27 = vpop.f32.mrf.mxu1  ;;  %v6281_v60 = vpop.f32.mrf.mxu0 }
 0xe0b   :  { %v4503_v11 = vadd.f32 %v4502_v32, %v4359_v30  ;;  %v4511_v18 = vadd.f32 %v4510_v14, %v4429_v13  ;;  %v5089_v13 = vld [vmem:[%s7814_s10 + $0x8] sm:$0xff]  ;;  %v5088_v14 = vld [vmem:[%s7814_s10] sm:$0xff] }
 0xe0d   :  { %v5390_v12 = vmul.f32 -1.442695, %v4503_v11  ;;  %v5391_v22 = vmul.f32 -1.442695, %v4511_v18  ;;  %v5006_v11 = vld [vmem:[%s7812_s8] sm:$0xff] }
 0xe0f   :  { %6543 = vpow2.f32 %v5390_v12  ;;  %v5005_v12 = vld [vmem:[%s7805_s1] sm:$0xff] }
 0xe10   :  { %v4498_v15 = vpop.f32.mrf.mxu1  ;;  %6545 = vpow2.f32 %v5391_v22  ;;  %v4976_v22 = vld [vmem:[#allocation4 + $0x38] sm:$0xff] }
 0xe11   :  { %v4499_v34 = vadd.f32 %v7486_v36, %v4498_v15 }
 0xe12   :  { %v6292_v19 = vpop.f32.mrf.mxu1 }
 0xe1c   :  { %v6544_v28 = vpop.eup %6543 }
 0xe1d   :  { %v4507_v29 = vadd.f32 1.0, %v6544_v28  ;;  %v6546_v31 = vpop.eup %6545 }
 0xe1e   :  { %v4515_v33 = vadd.f32 1.0, %v6546_v31  ;;  %v5402_v31 = vld [vmem:[#allocation17] ss:$0 sm:$0xff] }
 0xe1f   :  { %6547 = vrcp.f32 %v4507_v29 }
 0xe20   :  { %6549 = vrcp.f32 %v4515_v33 }
 0xe2c   :  { %v6548_v35 = vpop.eup %6547 }
 0xe2d   :  { %v4519_v37 = vmul.f32 %v6548_v35, %v4499_v34  ;;  %v6550_v63 = vpop.eup %6549 }
 0xe2e   :  { %v4522_v0 = vsub.f32 1.0, %v6550_v63  ;;  %v4524_v24 = vmul.f32 %v6550_v63, %v7658_v55 }
 0xe2f   :  { %v4520_v61 = vadd.f32 %v4519_v37, %v4518_v38 }
 0xe31   :  { %6551 = vtanh.f32 %v4520_v61 }
 0xe3e   :  { %v6552_v21 = vpop.eup %6551 }
 0xe3f   :  { %v4523_v23 = vmul.f32 %v6552_v21, %v4522_v0 }
 0xe41   :  { %v7700_v40 = vadd.f32 %v4524_v24, %v4523_v23 }
 0xe43   :  { %6302 = vmatmul.mubr.msk.f32.vlgmr.msra.gmra.mxu0 %vm141_vm0, %v7700_v40  ;;  %6313 = vmatmul.mubr.msk.f32.vlgmr.msra.gmra.mxu1 %vm141_vm0, %v7700_v40 }
 0xe44   :  { %6316 = vmatpush3.msra.mxu0 %v7397_v39  ;;  %6323 = vmatprep.mubr.msk.f32.mxu0 %vm6750_vm2, %v6748_v3 }
 0xe45   :  { %6317 = vmatprep.subr.mxu0 %v6748_v3  ;;  %6327 = vmatpush3.msra.mxu1 %v6584_v41 }
 0xe46   :  { %6318 = vmatpush3.msra.mxu0 %v7414_v62  ;;  %6328 = vmatprep.subr.mxu1 %v6748_v3 }
 0xe47   :  { %6319 = vmatprep.subr.mxu0 %v6748_v3  ;;  %6329 = vmatpush3.msra.mxu1 %v6585_v42 }
 0xe48   :  { %6320 = vmatpush3.msra.mxu0 %v7423_v17  ;;  %6330 = vmatprep.subr.mxu1 %v6748_v3 }
 0xe49   :  { %6321 = vmatprep.subr.mxu0 %v6748_v3  ;;  %6331 = vmatpush3.msra.mxu1 %v6586_v43 }
 0xe4a   :  { %6322 = vmatpush3.msra.mxu0 %v7433_v20  ;;  %6332 = vmatprep.subr.mxu1 %v6748_v3 }
 0xe4b   :  { %6324 = vmatmul.mubr.msk.f32.vlgmr.msra.gmra.mxu0 %vm141_vm0, %v7700_v40  ;;  %6337 = vmatprep.subr.mxu0 %v6748_v3 }
 0xe4c   :  { %6338 = vmatpush3.msra.mxu0 %v7389_v53  ;;  %6333 = vmatpush3.msra.mxu1 %v6587_v4  ;;  %v4992_v4 = vld [vmem:[#allocation6 + $0x38] sm:$0xff] }
 0xe4d   :  { %6339 = vmatprep.subr.mxu0 %v6748_v3  ;;  %6334 = vmatprep.mubr.msk.f32.mxu1 %vm6750_vm2, %v6748_v3 }
 0xe4e   :  { %6340 = vmatpush3.msra.mxu0 %v7395_v6  ;;  %6345 = vmatprep.mubr.msk.f32.mxu0 %vm6750_vm2, %v6748_v3  ;;  %v4739_v6 = vld [vmem:[#allocation4 + $0x30] sm:$0xff] }
 0xe4f   :  { %6341 = vmatprep.subr.mxu0 %v6748_v3  ;;  %6348 = vmatprep.subr.mxu1 %v6748_v3 }
 0xe50   :  { %6342 = vmatpush3.msra.mxu0 %v7403_v57 }
 0xe51   :  { %6343 = vmatprep.subr.mxu0 %v6748_v3 }
 0xe52   :  { %6344 = vmatpush3.msra.mxu0 %v7412_v16 }
 0xe53   :  { %6359 = vmatprep.subr.mxu0 %v6748_v3 }
 0xf03   :  { %v4595_v53 = vpop.f32.mrf.mxu0  ;;  %v4665_v2 = vpop.f32.mrf.mxu1 }
 0xf04   :  { %v4596_v46 = vadd.f32 %v7466_v45, %v4595_v53  ;;  %v4666_v50 = vadd.f32 %v7477_v59, %v4665_v2 }
 0xf05   :  { %v6303_v47 = vpop.f32.mrf.mxu0  ;;  %v6314_v48 = vpop.f32.mrf.mxu1 }
 0xf06   :  { %v4740_v5 = vadd.f32 %v4739_v6, %v4596_v46  ;;  %v4748_v52 = vadd.f32 %v4747_v44, %v4666_v50 }
 0xf08   :  { %v5395_v49 = vmul.f32 -1.442695, %v4740_v5  ;;  %v5396_v56 = vmul.f32 -1.442695, %v4748_v52 }
 0xf0a   :  { %6553 = vpow2.f32 %v5395_v49 }
 0xf0b   :  { %v4735_v57 = vpop.f32.mrf.mxu0  ;;  %6555 = vpow2.f32 %v5396_v56 }
 0xf0c   :  { %v4736_v10 = vadd.f32 %v7486_v36, %v4735_v57  ;;  %v5406_v57 = vld [vmem:[%s7816_s12] ss:$0 sm:$0xff] }
 0xf0d   :  { %v6325_v54 = vpop.f32.mrf.mxu0 }
 0xf17   :  { %v6554_v16 = vpop.eup %6553 }
 0xf18   :  { %v4744_v58 = vadd.f32 1.0, %v6554_v16  ;;  %v6556_v1 = vpop.eup %6555 }
 0xf19   :  { %v4752_v51 = vadd.f32 1.0, %v6556_v1 }
 0xf1a   :  { %6557 = vrcp.f32 %v4744_v58 }
 0xf1b   :  { %6559 = vrcp.f32 %v4752_v51 }
 0xf27   :  { %v6558_v7 = vpop.eup %6557 }
 0xf28   :  { %v4756_v8 = vmul.f32 %v6558_v7, %v4736_v10  ;;  %v6560_v25 = vpop.eup %6559 }
 0xf29   :  { %v4759_v26 = vsub.f32 1.0, %v6560_v25  ;;  %v4761_v27 = vmul.f32 %v6560_v25, %v7700_v40 }
 0xf2a   :  { %v4757_v55 = vadd.f32 %v4756_v8, %v4755_v9 }
 0xf2c   :  { %6561 = vtanh.f32 %v4757_v55 }
 0xf39   :  { %v6562_v30 = vpop.eup %6561 }
 0xf3a   :  { %v4760_v32 = vmul.f32 %v6562_v30, %v4759_v26 }
 0xf3c   :  { %v7738_v60 = vadd.f32 %v4761_v27, %v4760_v32 }
 0xf3e   :  { %6335 = vmatmul.mubr.msk.f32.vlgmr.msra.gmra.mxu1 %vm141_vm0, %v7738_v60  ;;  %6346 = vmatmul.mubr.msk.f32.vlgmr.msra.gmra.mxu0 %vm141_vm0, %v7738_v60 }
 0xf3f   :  { %6349 = vmatpush3.msra.mxu1 %v7397_v39  ;;  %6356 = vmatprep.mubr.msk.f32.mxu1 %vm6750_vm2, %v6748_v3  ;;  %v5091_v39 = vld [vmem:[%s7814_s10 + $0x18] sm:$0xff] }
 0xf40   :  { %6350 = vmatprep.subr.mxu1 %v6748_v3  ;;  %6360 = vmatpush3.msra.mxu0 %v5006_v11 }
 0xf41   :  { %6351 = vmatpush3.msra.mxu1 %v7414_v62  ;;  %6361 = vmatprep.mubr.msk.f32.mxu0 %vm6750_vm2, %v6748_v3  ;;  %v5093_v62 = vld [vmem:[%s7815_s11 + $0x8] sm:$0xff] }
 0xf42   :  { %6352 = vmatprep.subr.mxu1 %v6748_v3  ;;  %6362 = vmatmul.mubr.msk.f32.vlgmr.msra.gmra.mxu0 %vm5014_vm3, %v5005_v12 }
 0xf43   :  { %6353 = vmatpush3.msra.mxu1 %v7423_v17  ;;  %6371 = vmatprep.subr.mxu0 %v6748_v3  ;;  %v5090_v17 = vld [vmem:[%s7814_s10 + $0x10] sm:$0xff] }
 0xf44   :  { %6354 = vmatprep.subr.mxu1 %v6748_v3  ;;  %6379 = vmatprep.mubr.msk.f32.mxu0 %vm6750_vm2, %v6748_v3 }
 0xf45   :  { %6355 = vmatpush3.msra.mxu1 %v7433_v20  ;;  %6372 = vmatpush3.msra.mxu0 %v5091_v39  ;;  %v5092_v20 = vld [vmem:[%s7815_s11] sm:$0xff] }
 0xf46   :  { %6357 = vmatmul.mubr.msk.f32.vlgmr.msra.gmra.mxu1 %vm141_vm0, %v7738_v60  ;;  %6364 = vmatprep.subr.mxu1 %v6748_v3 }
 0xf47   :  { %6368 = vmatprep.mubr.msk.f32.mxu1 %vm6750_vm2, %v6748_v3  ;;  %6365 = vmatpush3.msra.mxu1 %v5093_v62 }
 0xf48   :  { %6373 = vmatprep.subr.mxu0 %v6748_v3  ;;  %6366 = vmatprep.subr.mxu1 %v6748_v3 }
 0xf49   :  { %6374 = vmatpush3.msra.mxu0 %v5090_v17  ;;  %6367 = vmatpush3.msra.mxu1 %v5092_v20 }
 0xf4a   :  { %6375 = vmatprep.subr.mxu0 %v6748_v3 }
 0xf4b   :  { %6376 = vmatpush3.msra.mxu0 %v5089_v13 }
 0xf4c   :  { %6377 = vmatprep.subr.mxu0 %v6748_v3  ;;  %v4984_v3 = vld [vmem:[#allocation5 + $0x38] sm:$0xff] }
 0xf4d   :  { %6378 = vmatpush3.msra.mxu0 %v5088_v14 }
 0xffe   :  { %v4832_v15 = vpop.f32.mrf.mxu1  ;;  %v4902_v18 = vpop.f32.mrf.mxu0 }
 0xfff   :  { %v4833_v19 = vadd.f32 %v7466_v45, %v4832_v15  ;;  %v4903_v37 = vadd.f32 %v7477_v59, %v4902_v18 }
0x1000   :  { %v6336_v28 = vpop.f32.mrf.mxu1  ;;  %v6347_v29 = vpop.f32.mrf.mxu0 }
0x1001   :  { %v4977_v33 = vadd.f32 %v4976_v22, %v4833_v19  ;;  %v4985_v0 = vadd.f32 %v4984_v3, %v4903_v37 }
0x1002   :  { %v5084_v34 = vpop.f32.mrf.mxu0 }
0x1003   :  { %v5400_v35 = vmul.f32 -1.442695, %v4977_v33  ;;  %v5085_v38 = vadd.f32 %v5402_v31, %v5084_v34  ;;  %v5401_v23 = vmul.f32 -1.442695, %v4985_v0 }
0x1004   :  { %v6363_v61 = vpop.f32.mrf.mxu0 }
0x1005   :  { %6563 = vpow2.f32 %v5400_v35  ;;  %6369 = vmatmul.mubr.msk.f32.vlgmr.msra.gmra.mxu1 %vm297_vm1, %v5085_v38 }
0x1006   :  { %v4972_v63 = vpop.f32.mrf.mxu1  ;;  %6565 = vpow2.f32 %v5401_v23 }
0x1007   :  { %v4973_v42 = vadd.f32 %v7486_v36, %v4972_v63 }
0x1008   :  { %v6358_v21 = vpop.f32.mrf.mxu1 }
0x1012   :  { %v6564_v45 = vpop.eup %6563 }
0x1013   :  { %v4981_v24 = vadd.f32 1.0, %v6564_v45  ;;  %v6566_v40 = vpop.eup %6565 }
0x1014   :  { %v4989_v41 = vadd.f32 1.0, %v6566_v40 }
0x1015   :  { %6567 = vrcp.f32 %v4981_v24 }
0x1016   :  { %6569 = vrcp.f32 %v4989_v41 }
0x1022   :  { %v6568_v43 = vpop.eup %6567 }
0x1023   :  { %v4993_v59 = vmul.f32 %v6568_v43, %v4973_v42  ;;  %v6570_v2 = vpop.eup %6569 }
0x1024   :  { %v4996_v46 = vsub.f32 1.0, %v6570_v2  ;;  %v4998_v47 = vmul.f32 %v6570_v2, %v7738_v60 }
0x1025   :  { %v4994_v53 = vadd.f32 %v4993_v59, %v4992_v4 }
0x1027   :  { %6571 = vtanh.f32 %v4994_v53 }
0x1034   :  { %v6572_v6 = vpop.eup %6571 }
0x1035   :  { %v4997_v48 = vmul.f32 %v6572_v6, %v4996_v46 }
0x1037   :  { %v4999_v5 = vadd.f32 %v4998_v47, %v4997_v48 }
0x1039   :  { %5000 = vst.msk [vmem:[#allocation2 + $0x8] sm:$0xff] %vm141_vm0, %v4999_v5 }
0x1040   :  { %v5004_v49 = vld [vmem:[#allocation2 + $0x8] sm:$0xff] }
0x1041   :  { %6380 = vmatmul.mubr.msk.f32.vlgmr.msra.gmra.mxu0 %vm141_vm0, %v5004_v49 }
0x10c5   :  { %v5163_v50 = vpop.f32.mrf.mxu1 }
0x10c7   :  { %v6370_v36 = vpop.f32.mrf.mxu1 }
0x1101   :  { %v5236_v44 = vpop.f32.mrf.mxu0 }
0x1102   :  { %v5237_v52 = vadd.f32 %v5236_v44, %v5163_v50 }
0x1103   :  { %v6381_v54 = vpop.f32.mrf.mxu0 }
0x1104   :  { %v5247_v56 = vadd.f32 %v5406_v57, %v5237_v52 }
0x1106   :  { %5249 = vst.msk [vmem:[%s7817_s13] sm:$0xff] %vm5248_vm4, %v5247_v56 }
0x1107   :  { %5254 = vsyncpa [#allocation8], 1 }
0x1108   :  { %5255 = vsyncpa [#allocation10], 1 }
0x1109   :  { %5256 = vsyncpa [#allocation13], 1 }
0x110a   :  { %5257 = vsyncpa [#allocation16], 1 }

</bundles_post_ra>
